<compile_context>
chip_gen: v7x
topology: tpu7x:2x2x1
jax: 0.10.0
libtpu: 0.0.40
codegen_flags: <defaults>
</compile_context>

<pallas_src>
import functools

import jax
import jax.numpy as jnp
from jax.experimental import pallas as pl
from jax.experimental.pallas import tpu as pltpu

_SLAB_COLS = 128
_BIAS_COL = 127          # bias column inside the packed weight slab


# ----------------------------------------------------------------------------
# Fused kernel: HIM + Edge_EH + out_edge/edge_enhance + conv3/Fourier + head
# ----------------------------------------------------------------------------
def _fused_kernel(x_ref, pr_ref, x1_ref, x2_ref, prf_ref, x1f_ref, x2f_ref,
                  mask_ref, w_ref, y_ref, edge_ref, *, H, W, C, meta):
    HW = H * W
    mask3 = mask_ref[...]                      # (9, HW) 3x3-tap halo masks

    # ---- conv helper: one dot (or VPU reduce) per conv ----------------------
    def conv(x, name, act="none"):
        off, cout, cin, k = meta[name]
        kk = k * k * cin
        if k == 1:
            stacked = x
        else:
            pad = k // 2
            pieces = []
            for t in range(k * k):
                dy, dx = t // k - pad, t % k - pad
                if dy == 0 and dx == 0:
                    pieces.append(x)
                else:
                    s = dy * W + dx
                    xs = pltpu.roll(x, shift=(-s) % HW, axis=1)
                    pieces.append(xs * mask3[t:t + 1, :])
            stacked = jnp.concatenate(pieces, axis=0)          # (kk, HW)
        if cout == 1:
            # M=1 matmuls waste the MXU pass: VPU multiply + sublane reduce.
            wcol = w_ref[off:off + kk, 0:1]                    # (kk, 1)
            b = w_ref[off:off + 1, _BIAS_COL:_BIAS_COL + 1]    # (1, 1)
            y = jnp.sum(stacked * wcol, axis=0, keepdims=True) + b
        else:
            w = w_ref[off:off + cout, 0:kk]                    # (cout, kk)
            b = w_ref[off:off + cout, _BIAS_COL:_BIAS_COL + 1]  # (cout, 1)
            y = jnp.dot(w, stacked, preferred_element_type=jnp.float32) + b
        if act == "relu":
            return jnp.maximum(y, 0.0)
        if act == "sigmoid":
            return jax.nn.sigmoid(y)
        return y

    # ---- HIM fusion ----------------------------------------------------------
    x = x_ref[0]                               # (C, HW)   FI = X
    pr, x1p, x2p = pr_ref[0], x1_ref[0], x2_ref[0]
    sig_pr = jax.nn.sigmoid(pr)
    sig_x1 = jax.nn.sigmoid(x1p)
    sig_x2 = jax.nn.sigmoid(x2p)
    # TODO(synk): HIM4 undefined in the reference; elementwise placeholder:
    # FI * (1 + sig(prior) + sig(x1) + sig(x2)).
    yt = x * (1.0 + sig_pr + sig_x1 + sig_x2)

    # ---- Edge_EH -------------------------------------------------------------
    c0 = conv(yt, "e0_0")
    c0 = conv(c0, "e0_1")
    c0 = conv(c0, "e0_2", "relu")
    a = conv(c0, "sa_0", "relu")
    a = conv(a, "sa_1", "sigmoid")             # (1, HW) spatial attention
    x1b = c0 * a

    c1 = conv(yt, "e1_0")
    c1 = conv(c1, "e1_1")
    c1 = conv(c1, "e1_2", "relu")
    cc = conv(c1, "ec_0")
    cc = conv(cc, "ec_1")
    x2b = conv(cc, "ec_2", "relu")

    # Edge_EH.out: 1x1 conv over channel-concat -> sublane concat + single dot
    out_edge = conv(jnp.concatenate([x1b, x2b], axis=0), "eout", "relu")

    # ---- out_edge conv chain + edge_enhance ----------------------------------
    e = conv(out_edge, "oe_0")
    e = conv(e, "oe_1", "relu")
    e = conv(e, "oe_2")                        # (1, HW)

    # edge_enhance: sequential |diff| down rows then cols, then clamp(img - g)
    m_dn = mask3[7:8, :]                       # tap (+1, 0): valid for r < H-1
    down = pltpu.roll(e, shift=HW - W, axis=1)           # e[r+1, c]
    g1 = m_dn * jnp.abs(e - down) + (1.0 - m_dn) * e
    m_rt = mask3[5:6, :]                       # tap (0, +1): valid for c < W-1
    right = pltpu.roll(g1, shift=HW - 1, axis=1)         # g1[r, c+1]
    g2 = m_rt * jnp.abs(g1 - right) + (1.0 - m_rt) * g1
    edge_ref[0] = jnp.clip(e - g2, 0.0, 1.0)

    # ---- trunk: conv3 chain + Fourier-identity branch ------------------------
    t = conv(yt, "c3_0")
    t = conv(t, "c3_1")
    t = conv(t, "c3_2", "relu")
    noff = meta["__norm__"][0]
    ns = w_ref[noff:noff + C, 0:1]             # folded BN scale  (C, 1)
    nb = w_ref[noff:noff + C, 1:2]             # folded BN offset (C, 1)
    # ifft2(fft2(yt)) == yt  =>  |ifft2(fft2(yt))| == |yt|
    yt_f = jnp.maximum(jnp.abs(yt) * ns + nb, 0.0)
    yt_out = t + yt_f                          # (C, HW)

    # ---- head: reverse attention + output chain + prior residuals -----------
    r = (6.0 - sig_pr - sig_x1 - sig_x2
         - jax.nn.sigmoid(prf_ref[0]) - jax.nn.sigmoid(x1f_ref[0])
         - jax.nn.sigmoid(x2f_ref[0]))         # (1, HW)
    y_r = r * x                                # reverse attention on FI = X

    cat2 = jnp.concatenate([y_r, yt_out, out_edge], axis=0)   # (3C, HW)
    y = conv(cat2, "out_0")
    y = conv(y, "out_1", "relu")
    y = conv(y, "out_2")                       # (1, HW)
    y_ref[0] = y + pr + x1p + x2p


# ----------------------------------------------------------------------------
# Host-side weight folding / packing
# ----------------------------------------------------------------------------
def _round_up(x, m):
    return (x + m - 1) // m * m


def _fold_conv(conv_p, bn_p=None):
    """Fold conv bias + eval-mode BN into one (Cout, k*k*Cin) matrix + offset."""
    w = conv_p["w"]                            # (k, k, Cin, Cout)
    k, _, cin, cout = w.shape
    if bn_p is None:
        scale = jnp.ones((cout,), jnp.float32)
        offset = conv_p["b"]
    else:
        scale = bn_p["gamma"] / jnp.sqrt(bn_p["var"] + 1e-5)
        offset = bn_p["beta"] + (conv_p["b"] - bn_p["mean"]) * scale
    wt = jnp.transpose(w.reshape(k * k, cin, cout), (2, 0, 1))  # (Cout, kk, Cin)
    wt = wt * scale[:, None, None]
    return {"w2d": wt.reshape(cout, k * k * cin), "b": offset,
            "k": k, "cin": cin, "cout": cout}


def _pack_weight_slab(conv_items, norm_scale, norm_bias):
    """Pack all folded convs (+ Fourier-branch BN affine) into ONE (R,128) slab.

    cout>1 : rows [off, off+cout), cols [0, kk) = W, col 127 = bias.
    cout==1: rows [off, off+kk) col 0 = W (transposed), (off, 127) = bias.
    Norm   : col 0 = scale, col 1 = offset.
    Every block starts on an 8-row boundary so in-kernel slices stay aligned.
    """
    blocks, meta, row = [], {}, 0
    for name, f in conv_items:
        cout, cin, k = f["cout"], f["cin"], f["k"]
        kk = k * k * cin
        assert k in (1, 3) and kk < _BIAS_COL
        if cout == 1:
            rows = _round_up(kk, 8)
            blk = jnp.zeros((rows, _SLAB_COLS), jnp.float32)
            blk = blk.at[:kk, 0].set(f["w2d"][0])
            blk = blk.at[0, _BIAS_COL].set(f["b"][0])
        else:
            rows = _round_up(cout, 8)
            blk = jnp.zeros((rows, _SLAB_COLS), jnp.float32)
            blk = blk.at[:cout, :kk].set(f["w2d"])
            blk = blk.at[:cout, _BIAS_COL].set(f["b"])
        meta[name] = (row, cout, cin, k)
        blocks.append(blk)
        row += rows
    c = norm_scale.shape[0]
    nblk = jnp.zeros((_round_up(c, 8), _SLAB_COLS), jnp.float32)
    nblk = nblk.at[:c, 0].set(norm_scale)
    nblk = nblk.at[:c, 1].set(norm_bias)
    meta["__norm__"] = (row, c, 0, 0)
    blocks.append(nblk)
    return jnp.concatenate(blocks, axis=0), meta


def _make_halo_mask(H, W, k=3):
    pad = k // 2
    r = jnp.arange(H)[:, None]
    c = jnp.arange(W)[None, :]
    rows = []
    for ky in range(k):
        for kx in range(k):
            dy, dx = ky - pad, kx - pad
            m = ((r + dy >= 0) & (r + dy < H) & (c + dx >= 0) & (c + dx < W))
            rows.append(m.astype(jnp.float32).reshape(H * W))
    return jnp.stack(rows, axis=0)             # (k*k, H*W)


def _bilinear_align_corners_nchw(x, out_h, out_w):
    """PyTorch F.interpolate(mode='bilinear', align_corners=True), NCHW."""
    N, C, H, W = x.shape
    if H == out_h and W == out_w:
        return x

    def coords(n_in, n_out):
        if n_out == 1 or n_in == 1:
            return jnp.zeros((n_out,), jnp.float32)
        return jnp.arange(n_out, dtype=jnp.float32) * ((n_in - 1) / (n_out - 1))

    ys, xs = coords(H, out_h), coords(W, out_w)
    y0 = jnp.floor(ys).astype(jnp.int32)
    y1 = jnp.minimum(y0 + 1, H - 1)
    wy = (ys - y0.astype(jnp.float32))[None, None, :, None]
    x0 = jnp.floor(xs).astype(jnp.int32)
    x1i = jnp.minimum(x0 + 1, W - 1)
    wx = (xs - x0.astype(jnp.float32))[None, None, None, :]
    r0, r1 = x[:, :, y0, :], x[:, :, y1, :]
    a, b = r0[:, :, :, x0], r0[:, :, :, x1i]
    c, d = r1[:, :, :, x0], r1[:, :, :, x1i]
    top = a * (1.0 - wx) + b * wx
    bot = c * (1.0 - wx) + d * wx
    return top * (1.0 - wy) + bot * wy


# ----------------------------------------------------------------------------
# pallas_call wrapper
# ----------------------------------------------------------------------------
def _run_fused(Xl, pr, x1p, x2p, prf, x1f, x2f, mask3, slab, meta, H, W):
    n, c, hw = Xl.shape

    def act(ch):
        return pl.BlockSpec((1, ch, hw), lambda i: (i, 0, 0))

    def full(shape):
        return pl.BlockSpec(shape, lambda i: (0,) * len(shape))

    return pl.pallas_call(
        functools.partial(_fused_kernel, H=H, W=W, C=c, meta=meta),
        out_shape=(jax.ShapeDtypeStruct((n, 1, hw), jnp.float32),
                   jax.ShapeDtypeStruct((n, 1, hw), jnp.float32)),
        grid=(n,),
        in_specs=[act(c)] + [act(1)] * 6 + [full(mask3.shape), full(slab.shape)],
        out_specs=(pl.BlockSpec((1, 1, hw), lambda i: (i, 0, 0)),
                   pl.BlockSpec((1, 1, hw), lambda i: (i, 0, 0))),
        compiler_params=pltpu.CompilerParams(
            dimension_semantics=("parallel",),
            vmem_limit_bytes=32 * 1024 * 1024),
    )(Xl, pr, x1p, x2p, prf, x1f, x2f, mask3, slab)


# ----------------------------------------------------------------------------
# Parameter init (deterministic, synthetic)
# ----------------------------------------------------------------------------
def _init_conv(key, k, cin, cout):
    kw, kb = jax.random.split(key)
    w = jax.random.normal(kw, (k, k, cin, cout), jnp.float32)
    w = w * (0.3 / (k * k * cin) ** 0.5)
    b = 0.05 * jax.random.normal(kb, (cout,), jnp.float32)
    return {"w": w, "b": b}


def _init_bn(key, c):
    k1, k2, k3, k4 = jax.random.split(key, 4)
    return {
        "gamma": 1.0 + 0.1 * jax.random.normal(k1, (c,), jnp.float32),
        "beta": 0.05 * jax.random.normal(k2, (c,), jnp.float32),
        "mean": 0.05 * jax.random.normal(k3, (c,), jnp.float32),
        "var": 1.0 + 0.1 * jax.random.uniform(k4, (c,), jnp.float32),
    }


def init_params(key, C, M):
    keys = iter(jax.random.split(key, 64))

    def conv(k, cin, cout):
        return _init_conv(next(keys), k, cin, cout)

    def bn(c):
        return _init_bn(next(keys), c)

    def eh_triple(last_k):
        return [conv(1, C, 2 * C), bn(2 * C),
                conv(3, 2 * C, C), bn(C),
                conv(last_k, C, C), bn(C)]

    c4 = max(C // 4, 1)
    return {
        "edge": {
            "conv0": eh_triple(1),
            "conv1": eh_triple(1),
            "conv": eh_triple(3),
            "sa": [conv(3, C, c4), conv(3, c4, 1)],
            "out": [conv(1, 2 * C, C), bn(C)],
        },
        "out_edge": [conv(3, C, M // 2), bn(M // 2),
                     conv(3, M // 2, M // 4), bn(M // 4),
                     conv(3, M // 4, 1)],
        "conv3": [conv(1, C, C), bn(C), conv(3, C, C), bn(C),
                  conv(3, C, C), bn(C)],
        "out": [conv(3, 3 * C, M), bn(M), conv(3, M, M // 2), bn(M // 2),
                conv(3, M // 2, 1)],
        "norm": bn(C),
    }


# ----------------------------------------------------------------------------
# Module_2_3 forward
# ----------------------------------------------------------------------------
def module_2_3_forward(params, X, x1, x2, prior_cam):
    """X: (N,C,H,W), x1/x2/prior_cam: (N,1,h,w) -> (y, edge) in NCHW."""
    N, C, H, W = X.shape
    HW = H * W
    Xf = X.astype(jnp.float32).reshape(N, C, HW)

    prior = _bilinear_align_corners_nchw(prior_cam.astype(jnp.float32), H, W)
    x1p = _bilinear_align_corners_nchw(x1.astype(jnp.float32), H, W)
    x2p = _bilinear_align_corners_nchw(x2.astype(jnp.float32), H, W)

    # |fft2| of the upsampled priors (stays in XLA; no Pallas FFT).
    prf = jnp.abs(jnp.fft.fft2(prior, axes=(2, 3))).astype(jnp.float32)
    x1f = jnp.abs(jnp.fft.fft2(x1p, axes=(2, 3))).astype(jnp.float32)
    x2f = jnp.abs(jnp.fft.fft2(x2p, axes=(2, 3))).astype(jnp.float32)

    prior_l, x1_l, x2_l = (a.reshape(N, 1, HW) for a in (prior, x1p, x2p))
    prf_l, x1f_l, x2f_l = (a.reshape(N, 1, HW) for a in (prf, x1f, x2f))

    mask3 = _make_halo_mask(H, W)

    pe = params["edge"]
    conv_items = [
        ("e0_0", _fold_conv(pe["conv0"][0], pe["conv0"][1])),
        ("e0_1", _fold_conv(pe["conv0"][2], pe["conv0"][3])),
        ("e0_2", _fold_conv(pe["conv0"][4], pe["conv0"][5])),
        ("sa_0", _fold_conv(pe["sa"][0])),
        ("sa_1", _fold_conv(pe["sa"][1])),
        ("e1_0", _fold_conv(pe["conv1"][0], pe["conv1"][1])),
        ("e1_1", _fold_conv(pe["conv1"][2], pe["conv1"][3])),
        ("e1_2", _fold_conv(pe["conv1"][4], pe["conv1"][5])),
        ("ec_0", _fold_conv(pe["conv"][0], pe["conv"][1])),
        ("ec_1", _fold_conv(pe["conv"][2], pe["conv"][3])),
        ("ec_2", _fold_conv(pe["conv"][4], pe["conv"][5])),
        ("eout", _fold_conv(pe["out"][0], pe["out"][1])),
        ("oe_0", _fold_conv(params["out_edge"][0], params["out_edge"][1])),
        ("oe_1", _fold_conv(params["out_edge"][2], params["out_edge"][3])),
        ("oe_2", _fold_conv(params["out_edge"][4])),
        ("c3_0", _fold_conv(params["conv3"][0], params["conv3"][1])),
        ("c3_1", _fold_conv(params["conv3"][2], params["conv3"][3])),
        ("c3_2", _fold_conv(params["conv3"][4], params["conv3"][5])),
        ("out_0", _fold_conv(params["out"][0], params["out"][1])),
        ("out_1", _fold_conv(params["out"][2], params["out"][3])),
        ("out_2", _fold_conv(params["out"][4])),
    ]
    bn = params["norm"]
    ns = bn["gamma"] / jnp.sqrt(bn["var"] + 1e-5)
    nb = bn["beta"] - bn["mean"] * ns
    slab, meta = _pack_weight_slab(conv_items, ns, nb)

    y, edge = _run_fused(Xf, prior_l, x1_l, x2_l, prf_l, x1f_l, x2f_l,
                         mask3, slab, meta, H, W)
    return y.reshape(N, 1, H, W), edge.reshape(N, 1, H, W)


if __name__ == "__main__":
    root = jax.random.PRNGKey(0)
    pkey, xk, x1k, x2k, prk = jax.random.split(root, 5)

    in_channels, mid_channels = 4, 8
    params = init_params(pkey, in_channels, mid_channels)

    X = jax.random.normal(xk, (2, in_channels, 16, 16), jnp.float32)
    x1 = jax.random.normal(x1k, (2, 1, 8, 8), jnp.float32)
    x2 = jax.random.normal(x2k, (2, 1, 8, 8), jnp.float32)
    prior_cam = jax.random.normal(prk, (2, 1, 8, 8), jnp.float32)

    fwd = jax.jit(module_2_3_forward)
    y, edge = fwd(params, X, x1, x2, prior_cam)
    jax.block_until_ready((y, edge))
    assert y.shape == (2, 1, 16, 16) and edge.shape == (2, 1, 16, 16)
    assert bool(jnp.all(jnp.isfinite(y))) and bool(jnp.all(jnp.isfinite(edge)))
    print("KERNEL_OK")
</pallas_src>

<mosaic_0001>
module attributes {stable_mosaic.version = 11 : i64} {
  func.func @_fused_kernel(%arg0: i32, %arg1: memref<1x4x256xf32, #tpu.memory_space<vmem>>, %arg2: memref<1x1x256xf32, #tpu.memory_space<vmem>>, %arg3: memref<1x1x256xf32, #tpu.memory_space<vmem>>, %arg4: memref<1x1x256xf32, #tpu.memory_space<vmem>>, %arg5: memref<1x1x256xf32, #tpu.memory_space<vmem>>, %arg6: memref<1x1x256xf32, #tpu.memory_space<vmem>>, %arg7: memref<1x1x256xf32, #tpu.memory_space<vmem>>, %arg8: memref<9x256xf32, #tpu.memory_space<vmem>>, %arg9: memref<264x128xf32, #tpu.memory_space<vmem>>, %arg10: memref<1x1x256xf32, #tpu.memory_space<vmem>>, %arg11: memref<1x1x256xf32, #tpu.memory_space<vmem>>) attributes {dimension_semantics = [#tpu.dimension_semantics<parallel>], iteration_bounds = array<i64: 2>, scalar_prefetch = 0 : i64, scratch_operands = 0 : i64, tpu.core_type = #tpu.core_type<tc>, window_params = [{transform_indices = @transform_0, window_bounds = array<i64: 1, 4, 256>}, {transform_indices = @transform_1, window_bounds = array<i64: 1, 1, 256>}, {transform_indices = @transform_2, window_bounds = array<i64: 1, 1, 256>}, {transform_indices = @transform_3, window_bounds = array<i64: 1, 1, 256>}, {transform_indices = @transform_4, window_bounds = array<i64: 1, 1, 256>}, {transform_indices = @transform_5, window_bounds = array<i64: 1, 1, 256>}, {transform_indices = @transform_6, window_bounds = array<i64: 1, 1, 256>}, {pipeline_mode = #tpu.pipeline_mode<synchronous>, transform_indices = @transform_7, window_bounds = array<i64: 9, 256>}, {pipeline_mode = #tpu.pipeline_mode<synchronous>, transform_indices = @transform_8, window_bounds = array<i64: 264, 128>}, {transform_indices = @transform_9, window_bounds = array<i64: 1, 1, 256>}, {transform_indices = @transform_10, window_bounds = array<i64: 1, 1, 256>}]} {
    %c0 = arith.constant 0 : index
    %c0_0 = arith.constant 0 : index
    %0 = vector.load %arg8[%c0, %c0_0] : memref<9x256xf32, #tpu.memory_space<vmem>>, vector<9x256xf32>
    %c0_1 = arith.constant 0 : index
    %c0_2 = arith.constant 0 : index
    %c0_3 = arith.constant 0 : index
    %1 = vector.load %arg1[%c0_1, %c0_2, %c0_3] : memref<1x4x256xf32, #tpu.memory_space<vmem>>, vector<1x4x256xf32>
    %2 = vector.shape_cast %1 : vector<1x4x256xf32> to vector<4x256xf32>
    %c0_4 = arith.constant 0 : index
    %c0_5 = arith.constant 0 : index
    %c0_6 = arith.constant 0 : index
    %3 = vector.load %arg2[%c0_4, %c0_5, %c0_6] : memref<1x1x256xf32, #tpu.memory_space<vmem>>, vector<1x1x256xf32>
    %4 = vector.shape_cast %3 : vector<1x1x256xf32> to vector<1x256xf32>
    %c0_7 = arith.constant 0 : index
    %c0_8 = arith.constant 0 : index
    %c0_9 = arith.constant 0 : index
    %5 = vector.load %arg3[%c0_7, %c0_8, %c0_9] : memref<1x1x256xf32, #tpu.memory_space<vmem>>, vector<1x1x256xf32>
    %6 = vector.shape_cast %5 : vector<1x1x256xf32> to vector<1x256xf32>
    %c0_10 = arith.constant 0 : index
    %c0_11 = arith.constant 0 : index
    %c0_12 = arith.constant 0 : index
    %7 = vector.load %arg4[%c0_10, %c0_11, %c0_12] : memref<1x1x256xf32, #tpu.memory_space<vmem>>, vector<1x1x256xf32>
    %8 = vector.shape_cast %7 : vector<1x1x256xf32> to vector<1x256xf32>
    %9 = arith.negf %4 : vector<1x256xf32>
    %10 = math.exp %9 : vector<1x256xf32>
    %cst = arith.constant 1.000000e+00 : f32
    %11 = vector.broadcast %cst : f32 to vector<1x256xf32>
    %12 = arith.addf %11, %10 : vector<1x256xf32>
    %13 = arith.divf %11, %12 : vector<1x256xf32>
    %14 = arith.negf %6 : vector<1x256xf32>
    %15 = math.exp %14 : vector<1x256xf32>
    %cst_13 = arith.constant 1.000000e+00 : f32
    %16 = vector.broadcast %cst_13 : f32 to vector<1x256xf32>
    %17 = arith.addf %16, %15 : vector<1x256xf32>
    %18 = arith.divf %16, %17 : vector<1x256xf32>
    %19 = arith.negf %8 : vector<1x256xf32>
    %20 = math.exp %19 : vector<1x256xf32>
    %cst_14 = arith.constant 1.000000e+00 : f32
    %21 = vector.broadcast %cst_14 : f32 to vector<1x256xf32>
    %22 = arith.addf %21, %20 : vector<1x256xf32>
    %23 = arith.divf %21, %22 : vector<1x256xf32>
    %cst_15 = arith.constant 1.000000e+00 : f32
    %24 = vector.broadcast %cst_15 : f32 to vector<1x256xf32>
    %25 = arith.addf %24, %13 : vector<1x256xf32>
    %26 = arith.addf %25, %18 : vector<1x256xf32>
    %27 = arith.addf %26, %23 : vector<1x256xf32>
    %28 = vector.broadcast %27 : vector<1x256xf32> to vector<4x256xf32>
    %29 = arith.mulf %2, %28 : vector<4x256xf32>
    %c0_16 = arith.constant 0 : index
    %c0_17 = arith.constant 0 : index
    %30 = vector.load %arg9[%c0_16, %c0_17] : memref<264x128xf32, #tpu.memory_space<vmem>>, vector<8x4xf32>
    %c0_18 = arith.constant 0 : index
    %c127 = arith.constant 127 : index
    %31 = vector.load %arg9[%c0_18, %c127] : memref<264x128xf32, #tpu.memory_space<vmem>>, vector<8x1xf32>
    %cst_19 = arith.constant dense<0.000000e+00> : vector<8x256xf32>
    %32 = tpu.matmul %30, %29, %cst_19 {dimension_numbers = #tpu.dot_dimension_numbers<[1], [0], [0], [1], [0, 0, 1, 1], [], []>} : vector<8x4xf32>, vector<4x256xf32>, vector<8x256xf32> -> vector<8x256xf32>
    %33 = vector.broadcast %31 : vector<8x1xf32> to vector<8x256xf32>
    %34 = arith.addf %32, %33 : vector<8x256xf32>
    %c17_i32 = arith.constant 17 : i32
    %35 = tpu.dynamic_rotate %34 by %c17_i32 dim 1 : vector<8x256xf32>, i32 -> vector<8x256xf32>
    %36 = vector.extract_strided_slice %0 {offsets = [0, 0], sizes = [1, 256], strides = [1, 1]} : vector<9x256xf32> to vector<1x256xf32>
    %37 = vector.broadcast %36 : vector<1x256xf32> to vector<8x256xf32>
    %38 = arith.mulf %35, %37 : vector<8x256xf32>
    %c16_i32 = arith.constant 16 : i32
    %39 = tpu.dynamic_rotate %34 by %c16_i32 dim 1 : vector<8x256xf32>, i32 -> vector<8x256xf32>
    %40 = vector.extract_strided_slice %0 {offsets = [1, 0], sizes = [1, 256], strides = [1, 1]} : vector<9x256xf32> to vector<1x256xf32>
    %41 = vector.broadcast %40 : vector<1x256xf32> to vector<8x256xf32>
    %42 = arith.mulf %39, %41 : vector<8x256xf32>
    %c15_i32 = arith.constant 15 : i32
    %43 = tpu.dynamic_rotate %34 by %c15_i32 dim 1 : vector<8x256xf32>, i32 -> vector<8x256xf32>
    %44 = vector.extract_strided_slice %0 {offsets = [2, 0], sizes = [1, 256], strides = [1, 1]} : vector<9x256xf32> to vector<1x256xf32>
    %45 = vector.broadcast %44 : vector<1x256xf32> to vector<8x256xf32>
    %46 = arith.mulf %43, %45 : vector<8x256xf32>
    %c1_i32 = arith.constant 1 : i32
    %47 = tpu.dynamic_rotate %34 by %c1_i32 dim 1 : vector<8x256xf32>, i32 -> vector<8x256xf32>
    %48 = vector.extract_strided_slice %0 {offsets = [3, 0], sizes = [1, 256], strides = [1, 1]} : vector<9x256xf32> to vector<1x256xf32>
    %49 = vector.broadcast %48 : vector<1x256xf32> to vector<8x256xf32>
    %50 = arith.mulf %47, %49 : vector<8x256xf32>
    %c255_i32 = arith.constant 255 : i32
    %51 = tpu.dynamic_rotate %34 by %c255_i32 dim 1 : vector<8x256xf32>, i32 -> vector<8x256xf32>
    %52 = vector.extract_strided_slice %0 {offsets = [5, 0], sizes = [1, 256], strides = [1, 1]} : vector<9x256xf32> to vector<1x256xf32>
    %53 = vector.broadcast %52 : vector<1x256xf32> to vector<8x256xf32>
    %54 = arith.mulf %51, %53 : vector<8x256xf32>
    %c241_i32 = arith.constant 241 : i32
    %55 = tpu.dynamic_rotate %34 by %c241_i32 dim 1 : vector<8x256xf32>, i32 -> vector<8x256xf32>
    %56 = vector.extract_strided_slice %0 {offsets = [6, 0], sizes = [1, 256], strides = [1, 1]} : vector<9x256xf32> to vector<1x256xf32>
    %57 = vector.broadcast %56 : vector<1x256xf32> to vector<8x256xf32>
    %58 = arith.mulf %55, %57 : vector<8x256xf32>
    %c240_i32 = arith.constant 240 : i32
    %59 = tpu.dynamic_rotate %34 by %c240_i32 dim 1 : vector<8x256xf32>, i32 -> vector<8x256xf32>
    %60 = vector.extract_strided_slice %0 {offsets = [7, 0], sizes = [1, 256], strides = [1, 1]} : vector<9x256xf32> to vector<1x256xf32>
    %61 = vector.broadcast %60 : vector<1x256xf32> to vector<8x256xf32>
    %62 = arith.mulf %59, %61 : vector<8x256xf32>
    %c239_i32 = arith.constant 239 : i32
    %63 = tpu.dynamic_rotate %34 by %c239_i32 dim 1 : vector<8x256xf32>, i32 -> vector<8x256xf32>
    %64 = vector.extract_strided_slice %0 {offsets = [8, 0], sizes = [1, 256], strides = [1, 1]} : vector<9x256xf32> to vector<1x256xf32>
    %65 = vector.broadcast %64 : vector<1x256xf32> to vector<8x256xf32>
    %66 = arith.mulf %63, %65 : vector<8x256xf32>
    %67 = tpu.concatenate %38, %42, %46, %50, %34, %54, %58, %62, %66 in 0 : vector<8x256xf32>, vector<8x256xf32>, vector<8x256xf32>, vector<8x256xf32>, vector<8x256xf32>, vector<8x256xf32>, vector<8x256xf32>, vector<8x256xf32>, vector<8x256xf32> -> vector<72x256xf32>
    %c8 = arith.constant 8 : index
    %c0_20 = arith.constant 0 : index
    %68 = vector.load %arg9[%c8, %c0_20] : memref<264x128xf32, #tpu.memory_space<vmem>>, vector<4x72xf32>
    %c8_21 = arith.constant 8 : index
    %c127_22 = arith.constant 127 : index
    %69 = vector.load %arg9[%c8_21, %c127_22] : memref<264x128xf32, #tpu.memory_space<vmem>>, vector<4x1xf32>
    %cst_23 = arith.constant dense<0.000000e+00> : vector<4x256xf32>
    %70 = tpu.matmul %68, %67, %cst_23 {dimension_numbers = #tpu.dot_dimension_numbers<[1], [0], [0], [1], [0, 0, 1, 1], [], []>} : vector<4x72xf32>, vector<72x256xf32>, vector<4x256xf32> -> vector<4x256xf32>
    %71 = vector.broadcast %69 : vector<4x1xf32> to vector<4x256xf32>
    %72 = arith.addf %70, %71 : vector<4x256xf32>
    %c16 = arith.constant 16 : index
    %c0_24 = arith.constant 0 : index
    %73 = vector.load %arg9[%c16, %c0_24] : memref<264x128xf32, #tpu.memory_space<vmem>>, vector<4x4xf32>
    %c16_25 = arith.constant 16 : index
    %c127_26 = arith.constant 127 : index
    %74 = vector.load %arg9[%c16_25, %c127_26] : memref<264x128xf32, #tpu.memory_space<vmem>>, vector<4x1xf32>
    %cst_27 = arith.constant dense<0.000000e+00> : vector<4x256xf32>
    %75 = tpu.matmul %73, %72, %cst_27 {dimension_numbers = #tpu.dot_dimension_numbers<[1], [0], [0], [1], [0, 0, 1, 1], [], []>} : vector<4x4xf32>, vector<4x256xf32>, vector<4x256xf32> -> vector<4x256xf32>
    %76 = vector.broadcast %74 : vector<4x1xf32> to vector<4x256xf32>
    %77 = arith.addf %75, %76 : vector<4x256xf32>
    %cst_28 = arith.constant 0.000000e+00 : f32
    %78 = vector.broadcast %cst_28 : f32 to vector<4x256xf32>
    %79 = arith.maximumf %77, %78 : vector<4x256xf32>
    %c17_i32_29 = arith.constant 17 : i32
    %80 = tpu.dynamic_rotate %79 by %c17_i32_29 dim 1 : vector<4x256xf32>, i32 -> vector<4x256xf32>
    %81 = vector.extract_strided_slice %0 {offsets = [0, 0], sizes = [1, 256], strides = [1, 1]} : vector<9x256xf32> to vector<1x256xf32>
    %82 = vector.broadcast %81 : vector<1x256xf32> to vector<4x256xf32>
    %83 = arith.mulf %80, %82 : vector<4x256xf32>
    %c16_i32_30 = arith.constant 16 : i32
    %84 = tpu.dynamic_rotate %79 by %c16_i32_30 dim 1 : vector<4x256xf32>, i32 -> vector<4x256xf32>
    %85 = vector.extract_strided_slice %0 {offsets = [1, 0], sizes = [1, 256], strides = [1, 1]} : vector<9x256xf32> to vector<1x256xf32>
    %86 = vector.broadcast %85 : vector<1x256xf32> to vector<4x256xf32>
    %87 = arith.mulf %84, %86 : vector<4x256xf32>
    %c15_i32_31 = arith.constant 15 : i32
    %88 = tpu.dynamic_rotate %79 by %c15_i32_31 dim 1 : vector<4x256xf32>, i32 -> vector<4x256xf32>
    %89 = vector.extract_strided_slice %0 {offsets = [2, 0], sizes = [1, 256], strides = [1, 1]} : vector<9x256xf32> to vector<1x256xf32>
    %90 = vector.broadcast %89 : vector<1x256xf32> to vector<4x256xf32>
    %91 = arith.mulf %88, %90 : vector<4x256xf32>
    %c1_i32_32 = arith.constant 1 : i32
    %92 = tpu.dynamic_rotate %79 by %c1_i32_32 dim 1 : vector<4x256xf32>, i32 -> vector<4x256xf32>
    %93 = vector.extract_strided_slice %0 {offsets = [3, 0], sizes = [1, 256], strides = [1, 1]} : vector<9x256xf32> to vector<1x256xf32>
    %94 = vector.broadcast %93 : vector<1x256xf32> to vector<4x256xf32>
    %95 = arith.mulf %92, %94 : vector<4x256xf32>
    %c255_i32_33 = arith.constant 255 : i32
    %96 = tpu.dynamic_rotate %79 by %c255_i32_33 dim 1 : vector<4x256xf32>, i32 -> vector<4x256xf32>
    %97 = vector.extract_strided_slice %0 {offsets = [5, 0], sizes = [1, 256], strides = [1, 1]} : vector<9x256xf32> to vector<1x256xf32>
    %98 = vector.broadcast %97 : vector<1x256xf32> to vector<4x256xf32>
    %99 = arith.mulf %96, %98 : vector<4x256xf32>
    %c241_i32_34 = arith.constant 241 : i32
    %100 = tpu.dynamic_rotate %79 by %c241_i32_34 dim 1 : vector<4x256xf32>, i32 -> vector<4x256xf32>
    %101 = vector.extract_strided_slice %0 {offsets = [6, 0], sizes = [1, 256], strides = [1, 1]} : vector<9x256xf32> to vector<1x256xf32>
    %102 = vector.broadcast %101 : vector<1x256xf32> to vector<4x256xf32>
    %103 = arith.mulf %100, %102 : vector<4x256xf32>
    %c240_i32_35 = arith.constant 240 : i32
    %104 = tpu.dynamic_rotate %79 by %c240_i32_35 dim 1 : vector<4x256xf32>, i32 -> vector<4x256xf32>
    %105 = vector.extract_strided_slice %0 {offsets = [7, 0], sizes = [1, 256], strides = [1, 1]} : vector<9x256xf32> to vector<1x256xf32>
    %106 = vector.broadcast %105 : vector<1x256xf32> to vector<4x256xf32>
    %107 = arith.mulf %104, %106 : vector<4x256xf32>
    %c239_i32_36 = arith.constant 239 : i32
    %108 = tpu.dynamic_rotate %79 by %c239_i32_36 dim 1 : vector<4x256xf32>, i32 -> vector<4x256xf32>
    %109 = vector.extract_strided_slice %0 {offsets = [8, 0], sizes = [1, 256], strides = [1, 1]} : vector<9x256xf32> to vector<1x256xf32>
    %110 = vector.broadcast %109 : vector<1x256xf32> to vector<4x256xf32>
    %111 = arith.mulf %108, %110 : vector<4x256xf32>
    %112 = tpu.concatenate %83, %87, %91, %95, %79, %99, %103, %107, %111 in 0 : vector<4x256xf32>, vector<4x256xf32>, vector<4x256xf32>, vector<4x256xf32>, vector<4x256xf32>, vector<4x256xf32>, vector<4x256xf32>, vector<4x256xf32>, vector<4x256xf32> -> vector<36x256xf32>
    %c24 = arith.constant 24 : index
    %c0_37 = arith.constant 0 : index
    %113 = vector.load %arg9[%c24, %c0_37] : memref<264x128xf32, #tpu.memory_space<vmem>>, vector<36x1xf32>
    %c24_38 = arith.constant 24 : index
    %c127_39 = arith.constant 127 : index
    %114 = vector.load %arg9[%c24_38, %c127_39] : memref<264x128xf32, #tpu.memory_space<vmem>>, vector<1x1xf32>
    %115 = vector.broadcast %113 : vector<36x1xf32> to vector<36x256xf32>
    %116 = arith.mulf %112, %115 : vector<36x256xf32>
    %cst_40 = arith.constant dense<0.000000e+00> : vector<256xf32>
    %117 = vector.multi_reduction <add>, %116, %cst_40 [0] : vector<36x256xf32> to vector<256xf32>
    %118 = vector.shape_cast %117 : vector<256xf32> to vector<1x256xf32>
    %119 = vector.broadcast %114 : vector<1x1xf32> to vector<1x256xf32>
    %120 = arith.addf %118, %119 : vector<1x256xf32>
    %cst_41 = arith.constant 0.000000e+00 : f32
    %121 = vector.broadcast %cst_41 : f32 to vector<1x256xf32>
    %122 = arith.maximumf %120, %121 : vector<1x256xf32>
    %c17_i32_42 = arith.constant 17 : i32
    %123 = tpu.dynamic_rotate %122 by %c17_i32_42 dim 1 : vector<1x256xf32>, i32 -> vector<1x256xf32>
    %124 = vector.extract_strided_slice %0 {offsets = [0, 0], sizes = [1, 256], strides = [1, 1]} : vector<9x256xf32> to vector<1x256xf32>
    %125 = arith.mulf %123, %124 : vector<1x256xf32>
    %c16_i32_43 = arith.constant 16 : i32
    %126 = tpu.dynamic_rotate %122 by %c16_i32_43 dim 1 : vector<1x256xf32>, i32 -> vector<1x256xf32>
    %127 = vector.extract_strided_slice %0 {offsets = [1, 0], sizes = [1, 256], strides = [1, 1]} : vector<9x256xf32> to vector<1x256xf32>
    %128 = arith.mulf %126, %127 : vector<1x256xf32>
    %c15_i32_44 = arith.constant 15 : i32
    %129 = tpu.dynamic_rotate %122 by %c15_i32_44 dim 1 : vector<1x256xf32>, i32 -> vector<1x256xf32>
    %130 = vector.extract_strided_slice %0 {offsets = [2, 0], sizes = [1, 256], strides = [1, 1]} : vector<9x256xf32> to vector<1x256xf32>
    %131 = arith.mulf %129, %130 : vector<1x256xf32>
    %c1_i32_45 = arith.constant 1 : i32
    %132 = tpu.dynamic_rotate %122 by %c1_i32_45 dim 1 : vector<1x256xf32>, i32 -> vector<1x256xf32>
    %133 = vector.extract_strided_slice %0 {offsets = [3, 0], sizes = [1, 256], strides = [1, 1]} : vector<9x256xf32> to vector<1x256xf32>
    %134 = arith.mulf %132, %133 : vector<1x256xf32>
    %c255_i32_46 = arith.constant 255 : i32
    %135 = tpu.dynamic_rotate %122 by %c255_i32_46 dim 1 : vector<1x256xf32>, i32 -> vector<1x256xf32>
    %136 = vector.extract_strided_slice %0 {offsets = [5, 0], sizes = [1, 256], strides = [1, 1]} : vector<9x256xf32> to vector<1x256xf32>
    %137 = arith.mulf %135, %136 : vector<1x256xf32>
    %c241_i32_47 = arith.constant 241 : i32
    %138 = tpu.dynamic_rotate %122 by %c241_i32_47 dim 1 : vector<1x256xf32>, i32 -> vector<1x256xf32>
    %139 = vector.extract_strided_slice %0 {offsets = [6, 0], sizes = [1, 256], strides = [1, 1]} : vector<9x256xf32> to vector<1x256xf32>
    %140 = arith.mulf %138, %139 : vector<1x256xf32>
    %c240_i32_48 = arith.constant 240 : i32
    %141 = tpu.dynamic_rotate %122 by %c240_i32_48 dim 1 : vector<1x256xf32>, i32 -> vector<1x256xf32>
    %142 = vector.extract_strided_slice %0 {offsets = [7, 0], sizes = [1, 256], strides = [1, 1]} : vector<9x256xf32> to vector<1x256xf32>
    %143 = arith.mulf %141, %142 : vector<1x256xf32>
    %c239_i32_49 = arith.constant 239 : i32
    %144 = tpu.dynamic_rotate %122 by %c239_i32_49 dim 1 : vector<1x256xf32>, i32 -> vector<1x256xf32>
    %145 = vector.extract_strided_slice %0 {offsets = [8, 0], sizes = [1, 256], strides = [1, 1]} : vector<9x256xf32> to vector<1x256xf32>
    %146 = arith.mulf %144, %145 : vector<1x256xf32>
    %147 = tpu.concatenate %125, %128, %131, %134, %122, %137, %140, %143, %146 in 0 : vector<1x256xf32>, vector<1x256xf32>, vector<1x256xf32>, vector<1x256xf32>, vector<1x256xf32>, vector<1x256xf32>, vector<1x256xf32>, vector<1x256xf32>, vector<1x256xf32> -> vector<9x256xf32>
    %c64 = arith.constant 64 : index
    %c0_50 = arith.constant 0 : index
    %148 = vector.load %arg9[%c64, %c0_50] : memref<264x128xf32, #tpu.memory_space<vmem>>, vector<9x1xf32>
    %c64_51 = arith.constant 64 : index
    %c127_52 = arith.constant 127 : index
    %149 = vector.load %arg9[%c64_51, %c127_52] : memref<264x128xf32, #tpu.memory_space<vmem>>, vector<1x1xf32>
    %150 = vector.broadcast %148 : vector<9x1xf32> to vector<9x256xf32>
    %151 = arith.mulf %147, %150 : vector<9x256xf32>
    %cst_53 = arith.constant dense<0.000000e+00> : vector<256xf32>
    %152 = vector.multi_reduction <add>, %151, %cst_53 [0] : vector<9x256xf32> to vector<256xf32>
    %153 = vector.shape_cast %152 : vector<256xf32> to vector<1x256xf32>
    %154 = vector.broadcast %149 : vector<1x1xf32> to vector<1x256xf32>
    %155 = arith.addf %153, %154 : vector<1x256xf32>
    %156 = arith.negf %155 : vector<1x256xf32>
    %157 = math.exp %156 : vector<1x256xf32>
    %cst_54 = arith.constant 1.000000e+00 : f32
    %158 = vector.broadcast %cst_54 : f32 to vector<1x256xf32>
    %159 = arith.addf %158, %157 : vector<1x256xf32>
    %160 = arith.divf %158, %159 : vector<1x256xf32>
    %161 = vector.broadcast %160 : vector<1x256xf32> to vector<4x256xf32>
    %162 = arith.mulf %79, %161 : vector<4x256xf32>
    %c80 = arith.constant 80 : index
    %c0_55 = arith.constant 0 : index
    %163 = vector.load %arg9[%c80, %c0_55] : memref<264x128xf32, #tpu.memory_space<vmem>>, vector<8x4xf32>
    %c80_56 = arith.constant 80 : index
    %c127_57 = arith.constant 127 : index
    %164 = vector.load %arg9[%c80_56, %c127_57] : memref<264x128xf32, #tpu.memory_space<vmem>>, vector<8x1xf32>
    %cst_58 = arith.constant dense<0.000000e+00> : vector<8x256xf32>
    %165 = tpu.matmul %163, %29, %cst_58 {dimension_numbers = #tpu.dot_dimension_numbers<[1], [0], [0], [1], [0, 0, 1, 1], [], []>} : vector<8x4xf32>, vector<4x256xf32>, vector<8x256xf32> -> vector<8x256xf32>
    %166 = vector.broadcast %164 : vector<8x1xf32> to vector<8x256xf32>
    %167 = arith.addf %165, %166 : vector<8x256xf32>
    %c17_i32_59 = arith.constant 17 : i32
    %168 = tpu.dynamic_rotate %167 by %c17_i32_59 dim 1 : vector<8x256xf32>, i32 -> vector<8x256xf32>
    %169 = vector.extract_strided_slice %0 {offsets = [0, 0], sizes = [1, 256], strides = [1, 1]} : vector<9x256xf32> to vector<1x256xf32>
    %170 = vector.broadcast %169 : vector<1x256xf32> to vector<8x256xf32>
    %171 = arith.mulf %168, %170 : vector<8x256xf32>
    %c16_i32_60 = arith.constant 16 : i32
    %172 = tpu.dynamic_rotate %167 by %c16_i32_60 dim 1 : vector<8x256xf32>, i32 -> vector<8x256xf32>
    %173 = vector.extract_strided_slice %0 {offsets = [1, 0], sizes = [1, 256], strides = [1, 1]} : vector<9x256xf32> to vector<1x256xf32>
    %174 = vector.broadcast %173 : vector<1x256xf32> to vector<8x256xf32>
    %175 = arith.mulf %172, %174 : vector<8x256xf32>
    %c15_i32_61 = arith.constant 15 : i32
    %176 = tpu.dynamic_rotate %167 by %c15_i32_61 dim 1 : vector<8x256xf32>, i32 -> vector<8x256xf32>
    %177 = vector.extract_strided_slice %0 {offsets = [2, 0], sizes = [1, 256], strides = [1, 1]} : vector<9x256xf32> to vector<1x256xf32>
    %178 = vector.broadcast %177 : vector<1x256xf32> to vector<8x256xf32>
    %179 = arith.mulf %176, %178 : vector<8x256xf32>
    %c1_i32_62 = arith.constant 1 : i32
    %180 = tpu.dynamic_rotate %167 by %c1_i32_62 dim 1 : vector<8x256xf32>, i32 -> vector<8x256xf32>
    %181 = vector.extract_strided_slice %0 {offsets = [3, 0], sizes = [1, 256], strides = [1, 1]} : vector<9x256xf32> to vector<1x256xf32>
    %182 = vector.broadcast %181 : vector<1x256xf32> to vector<8x256xf32>
    %183 = arith.mulf %180, %182 : vector<8x256xf32>
    %c255_i32_63 = arith.constant 255 : i32
    %184 = tpu.dynamic_rotate %167 by %c255_i32_63 dim 1 : vector<8x256xf32>, i32 -> vector<8x256xf32>
    %185 = vector.extract_strided_slice %0 {offsets = [5, 0], sizes = [1, 256], strides = [1, 1]} : vector<9x256xf32> to vector<1x256xf32>
    %186 = vector.broadcast %185 : vector<1x256xf32> to vector<8x256xf32>
    %187 = arith.mulf %184, %186 : vector<8x256xf32>
    %c241_i32_64 = arith.constant 241 : i32
    %188 = tpu.dynamic_rotate %167 by %c241_i32_64 dim 1 : vector<8x256xf32>, i32 -> vector<8x256xf32>
    %189 = vector.extract_strided_slice %0 {offsets = [6, 0], sizes = [1, 256], strides = [1, 1]} : vector<9x256xf32> to vector<1x256xf32>
    %190 = vector.broadcast %189 : vector<1x256xf32> to vector<8x256xf32>
    %191 = arith.mulf %188, %190 : vector<8x256xf32>
    %c240_i32_65 = arith.constant 240 : i32
    %192 = tpu.dynamic_rotate %167 by %c240_i32_65 dim 1 : vector<8x256xf32>, i32 -> vector<8x256xf32>
    %193 = vector.extract_strided_slice %0 {offsets = [7, 0], sizes = [1, 256], strides = [1, 1]} : vector<9x256xf32> to vector<1x256xf32>
    %194 = vector.broadcast %193 : vector<1x256xf32> to vector<8x256xf32>
    %195 = arith.mulf %192, %194 : vector<8x256xf32>
    %c239_i32_66 = arith.constant 239 : i32
    %196 = tpu.dynamic_rotate %167 by %c239_i32_66 dim 1 : vector<8x256xf32>, i32 -> vector<8x256xf32>
    %197 = vector.extract_strided_slice %0 {offsets = [8, 0], sizes = [1, 256], strides = [1, 1]} : vector<9x256xf32> to vector<1x256xf32>
    %198 = vector.broadcast %197 : vector<1x256xf32> to vector<8x256xf32>
    %199 = arith.mulf %196, %198 : vector<8x256xf32>
    %200 = tpu.concatenate %171, %175, %179, %183, %167, %187, %191, %195, %199 in 0 : vector<8x256xf32>, vector<8x256xf32>, vector<8x256xf32>, vector<8x256xf32>, vector<8x256xf32>, vector<8x256xf32>, vector<8x256xf32>, vector<8x256xf32>, vector<8x256xf32> -> vector<72x256xf32>
    %c88 = arith.constant 88 : index
    %c0_67 = arith.constant 0 : index
    %201 = vector.load %arg9[%c88, %c0_67] : memref<264x128xf32, #tpu.memory_space<vmem>>, vector<4x72xf32>
    %c88_68 = arith.constant 88 : index
    %c127_69 = arith.constant 127 : index
    %202 = vector.load %arg9[%c88_68, %c127_69] : memref<264x128xf32, #tpu.memory_space<vmem>>, vector<4x1xf32>
    %cst_70 = arith.constant dense<0.000000e+00> : vector<4x256xf32>
    %203 = tpu.matmul %201, %200, %cst_70 {dimension_numbers = #tpu.dot_dimension_numbers<[1], [0], [0], [1], [0, 0, 1, 1], [], []>} : vector<4x72xf32>, vector<72x256xf32>, vector<4x256xf32> -> vector<4x256xf32>
    %204 = vector.broadcast %202 : vector<4x1xf32> to vector<4x256xf32>
    %205 = arith.addf %203, %204 : vector<4x256xf32>
    %c96 = arith.constant 96 : index
    %c0_71 = arith.constant 0 : index
    %206 = vector.load %arg9[%c96, %c0_71] : memref<264x128xf32, #tpu.memory_space<vmem>>, vector<4x4xf32>
    %c96_72 = arith.constant 96 : index
    %c127_73 = arith.constant 127 : index
    %207 = vector.load %arg9[%c96_72, %c127_73] : memref<264x128xf32, #tpu.memory_space<vmem>>, vector<4x1xf32>
    %cst_74 = arith.constant dense<0.000000e+00> : vector<4x256xf32>
    %208 = tpu.matmul %206, %205, %cst_74 {dimension_numbers = #tpu.dot_dimension_numbers<[1], [0], [0], [1], [0, 0, 1, 1], [], []>} : vector<4x4xf32>, vector<4x256xf32>, vector<4x256xf32> -> vector<4x256xf32>
    %209 = vector.broadcast %207 : vector<4x1xf32> to vector<4x256xf32>
    %210 = arith.addf %208, %209 : vector<4x256xf32>
    %cst_75 = arith.constant 0.000000e+00 : f32
    %211 = vector.broadcast %cst_75 : f32 to vector<4x256xf32>
    %212 = arith.maximumf %210, %211 : vector<4x256xf32>
    %c104 = arith.constant 104 : index
    %c0_76 = arith.constant 0 : index
    %213 = vector.load %arg9[%c104, %c0_76] : memref<264x128xf32, #tpu.memory_space<vmem>>, vector<8x4xf32>
    %c104_77 = arith.constant 104 : index
    %c127_78 = arith.constant 127 : index
    %214 = vector.load %arg9[%c104_77, %c127_78] : memref<264x128xf32, #tpu.memory_space<vmem>>, vector<8x1xf32>
    %cst_79 = arith.constant dense<0.000000e+00> : vector<8x256xf32>
    %215 = tpu.matmul %213, %212, %cst_79 {dimension_numbers = #tpu.dot_dimension_numbers<[1], [0], [0], [1], [0, 0, 1, 1], [], []>} : vector<8x4xf32>, vector<4x256xf32>, vector<8x256xf32> -> vector<8x256xf32>
    %216 = vector.broadcast %214 : vector<8x1xf32> to vector<8x256xf32>
    %217 = arith.addf %215, %216 : vector<8x256xf32>
    %c17_i32_80 = arith.constant 17 : i32
    %218 = tpu.dynamic_rotate %217 by %c17_i32_80 dim 1 : vector<8x256xf32>, i32 -> vector<8x256xf32>
    %219 = vector.extract_strided_slice %0 {offsets = [0, 0], sizes = [1, 256], strides = [1, 1]} : vector<9x256xf32> to vector<1x256xf32>
    %220 = vector.broadcast %219 : vector<1x256xf32> to vector<8x256xf32>
    %221 = arith.mulf %218, %220 : vector<8x256xf32>
    %c16_i32_81 = arith.constant 16 : i32
    %222 = tpu.dynamic_rotate %217 by %c16_i32_81 dim 1 : vector<8x256xf32>, i32 -> vector<8x256xf32>
    %223 = vector.extract_strided_slice %0 {offsets = [1, 0], sizes = [1, 256], strides = [1, 1]} : vector<9x256xf32> to vector<1x256xf32>
    %224 = vector.broadcast %223 : vector<1x256xf32> to vector<8x256xf32>
    %225 = arith.mulf %222, %224 : vector<8x256xf32>
    %c15_i32_82 = arith.constant 15 : i32
    %226 = tpu.dynamic_rotate %217 by %c15_i32_82 dim 1 : vector<8x256xf32>, i32 -> vector<8x256xf32>
    %227 = vector.extract_strided_slice %0 {offsets = [2, 0], sizes = [1, 256], strides = [1, 1]} : vector<9x256xf32> to vector<1x256xf32>
    %228 = vector.broadcast %227 : vector<1x256xf32> to vector<8x256xf32>
    %229 = arith.mulf %226, %228 : vector<8x256xf32>
    %c1_i32_83 = arith.constant 1 : i32
    %230 = tpu.dynamic_rotate %217 by %c1_i32_83 dim 1 : vector<8x256xf32>, i32 -> vector<8x256xf32>
    %231 = vector.extract_strided_slice %0 {offsets = [3, 0], sizes = [1, 256], strides = [1, 1]} : vector<9x256xf32> to vector<1x256xf32>
    %232 = vector.broadcast %231 : vector<1x256xf32> to vector<8x256xf32>
    %233 = arith.mulf %230, %232 : vector<8x256xf32>
    %c255_i32_84 = arith.constant 255 : i32
    %234 = tpu.dynamic_rotate %217 by %c255_i32_84 dim 1 : vector<8x256xf32>, i32 -> vector<8x256xf32>
    %235 = vector.extract_strided_slice %0 {offsets = [5, 0], sizes = [1, 256], strides = [1, 1]} : vector<9x256xf32> to vector<1x256xf32>
    %236 = vector.broadcast %235 : vector<1x256xf32> to vector<8x256xf32>
    %237 = arith.mulf %234, %236 : vector<8x256xf32>
    %c241_i32_85 = arith.constant 241 : i32
    %238 = tpu.dynamic_rotate %217 by %c241_i32_85 dim 1 : vector<8x256xf32>, i32 -> vector<8x256xf32>
    %239 = vector.extract_strided_slice %0 {offsets = [6, 0], sizes = [1, 256], strides = [1, 1]} : vector<9x256xf32> to vector<1x256xf32>
    %240 = vector.broadcast %239 : vector<1x256xf32> to vector<8x256xf32>
    %241 = arith.mulf %238, %240 : vector<8x256xf32>
    %c240_i32_86 = arith.constant 240 : i32
    %242 = tpu.dynamic_rotate %217 by %c240_i32_86 dim 1 : vector<8x256xf32>, i32 -> vector<8x256xf32>
    %243 = vector.extract_strided_slice %0 {offsets = [7, 0], sizes = [1, 256], strides = [1, 1]} : vector<9x256xf32> to vector<1x256xf32>
    %244 = vector.broadcast %243 : vector<1x256xf32> to vector<8x256xf32>
    %245 = arith.mulf %242, %244 : vector<8x256xf32>
    %c239_i32_87 = arith.constant 239 : i32
    %246 = tpu.dynamic_rotate %217 by %c239_i32_87 dim 1 : vector<8x256xf32>, i32 -> vector<8x256xf32>
    %247 = vector.extract_strided_slice %0 {offsets = [8, 0], sizes = [1, 256], strides = [1, 1]} : vector<9x256xf32> to vector<1x256xf32>
    %248 = vector.broadcast %247 : vector<1x256xf32> to vector<8x256xf32>
    %249 = arith.mulf %246, %248 : vector<8x256xf32>
    %250 = tpu.concatenate %221, %225, %229, %233, %217, %237, %241, %245, %249 in 0 : vector<8x256xf32>, vector<8x256xf32>, vector<8x256xf32>, vector<8x256xf32>, vector<8x256xf32>, vector<8x256xf32>, vector<8x256xf32>, vector<8x256xf32>, vector<8x256xf32> -> vector<72x256xf32>
    %c112 = arith.constant 112 : index
    %c0_88 = arith.constant 0 : index
    %251 = vector.load %arg9[%c112, %c0_88] : memref<264x128xf32, #tpu.memory_space<vmem>>, vector<4x72xf32>
    %c112_89 = arith.constant 112 : index
    %c127_90 = arith.constant 127 : index
    %252 = vector.load %arg9[%c112_89, %c127_90] : memref<264x128xf32, #tpu.memory_space<vmem>>, vector<4x1xf32>
    %cst_91 = arith.constant dense<0.000000e+00> : vector<4x256xf32>
    %253 = tpu.matmul %251, %250, %cst_91 {dimension_numbers = #tpu.dot_dimension_numbers<[1], [0], [0], [1], [0, 0, 1, 1], [], []>} : vector<4x72xf32>, vector<72x256xf32>, vector<4x256xf32> -> vector<4x256xf32>
    %254 = vector.broadcast %252 : vector<4x1xf32> to vector<4x256xf32>
    %255 = arith.addf %253, %254 : vector<4x256xf32>
    %c17_i32_92 = arith.constant 17 : i32
    %256 = tpu.dynamic_rotate %255 by %c17_i32_92 dim 1 : vector<4x256xf32>, i32 -> vector<4x256xf32>
    %257 = vector.extract_strided_slice %0 {offsets = [0, 0], sizes = [1, 256], strides = [1, 1]} : vector<9x256xf32> to vector<1x256xf32>
    %258 = vector.broadcast %257 : vector<1x256xf32> to vector<4x256xf32>
    %259 = arith.mulf %256, %258 : vector<4x256xf32>
    %c16_i32_93 = arith.constant 16 : i32
    %260 = tpu.dynamic_rotate %255 by %c16_i32_93 dim 1 : vector<4x256xf32>, i32 -> vector<4x256xf32>
    %261 = vector.extract_strided_slice %0 {offsets = [1, 0], sizes = [1, 256], strides = [1, 1]} : vector<9x256xf32> to vector<1x256xf32>
    %262 = vector.broadcast %261 : vector<1x256xf32> to vector<4x256xf32>
    %263 = arith.mulf %260, %262 : vector<4x256xf32>
    %c15_i32_94 = arith.constant 15 : i32
    %264 = tpu.dynamic_rotate %255 by %c15_i32_94 dim 1 : vector<4x256xf32>, i32 -> vector<4x256xf32>
    %265 = vector.extract_strided_slice %0 {offsets = [2, 0], sizes = [1, 256], strides = [1, 1]} : vector<9x256xf32> to vector<1x256xf32>
    %266 = vector.broadcast %265 : vector<1x256xf32> to vector<4x256xf32>
    %267 = arith.mulf %264, %266 : vector<4x256xf32>
    %c1_i32_95 = arith.constant 1 : i32
    %268 = tpu.dynamic_rotate %255 by %c1_i32_95 dim 1 : vector<4x256xf32>, i32 -> vector<4x256xf32>
    %269 = vector.extract_strided_slice %0 {offsets = [3, 0], sizes = [1, 256], strides = [1, 1]} : vector<9x256xf32> to vector<1x256xf32>
    %270 = vector.broadcast %269 : vector<1x256xf32> to vector<4x256xf32>
    %271 = arith.mulf %268, %270 : vector<4x256xf32>
    %c255_i32_96 = arith.constant 255 : i32
    %272 = tpu.dynamic_rotate %255 by %c255_i32_96 dim 1 : vector<4x256xf32>, i32 -> vector<4x256xf32>
    %273 = vector.extract_strided_slice %0 {offsets = [5, 0], sizes = [1, 256], strides = [1, 1]} : vector<9x256xf32> to vector<1x256xf32>
    %274 = vector.broadcast %273 : vector<1x256xf32> to vector<4x256xf32>
    %275 = arith.mulf %272, %274 : vector<4x256xf32>
    %c241_i32_97 = arith.constant 241 : i32
    %276 = tpu.dynamic_rotate %255 by %c241_i32_97 dim 1 : vector<4x256xf32>, i32 -> vector<4x256xf32>
    %277 = vector.extract_strided_slice %0 {offsets = [6, 0], sizes = [1, 256], strides = [1, 1]} : vector<9x256xf32> to vector<1x256xf32>
    %278 = vector.broadcast %277 : vector<1x256xf32> to vector<4x256xf32>
    %279 = arith.mulf %276, %278 : vector<4x256xf32>
    %c240_i32_98 = arith.constant 240 : i32
    %280 = tpu.dynamic_rotate %255 by %c240_i32_98 dim 1 : vector<4x256xf32>, i32 -> vector<4x256xf32>
    %281 = vector.extract_strided_slice %0 {offsets = [7, 0], sizes = [1, 256], strides = [1, 1]} : vector<9x256xf32> to vector<1x256xf32>
    %282 = vector.broadcast %281 : vector<1x256xf32> to vector<4x256xf32>
    %283 = arith.mulf %280, %282 : vector<4x256xf32>
    %c239_i32_99 = arith.constant 239 : i32
    %284 = tpu.dynamic_rotate %255 by %c239_i32_99 dim 1 : vector<4x256xf32>, i32 -> vector<4x256xf32>
    %285 = vector.extract_strided_slice %0 {offsets = [8, 0], sizes = [1, 256], strides = [1, 1]} : vector<9x256xf32> to vector<1x256xf32>
    %286 = vector.broadcast %285 : vector<1x256xf32> to vector<4x256xf32>
    %287 = arith.mulf %284, %286 : vector<4x256xf32>
    %288 = tpu.concatenate %259, %263, %267, %271, %255, %275, %279, %283, %287 in 0 : vector<4x256xf32>, vector<4x256xf32>, vector<4x256xf32>, vector<4x256xf32>, vector<4x256xf32>, vector<4x256xf32>, vector<4x256xf32>, vector<4x256xf32>, vector<4x256xf32> -> vector<36x256xf32>
    %c120 = arith.constant 120 : index
    %c0_100 = arith.constant 0 : index
    %289 = vector.load %arg9[%c120, %c0_100] : memref<264x128xf32, #tpu.memory_space<vmem>>, vector<4x36xf32>
    %c120_101 = arith.constant 120 : index
    %c127_102 = arith.constant 127 : index
    %290 = vector.load %arg9[%c120_101, %c127_102] : memref<264x128xf32, #tpu.memory_space<vmem>>, vector<4x1xf32>
    %cst_103 = arith.constant dense<0.000000e+00> : vector<4x256xf32>
    %291 = tpu.matmul %289, %288, %cst_103 {dimension_numbers = #tpu.dot_dimension_numbers<[1], [0], [0], [1], [0, 0, 1, 1], [], []>} : vector<4x36xf32>, vector<36x256xf32>, vector<4x256xf32> -> vector<4x256xf32>
    %292 = vector.broadcast %290 : vector<4x1xf32> to vector<4x256xf32>
    %293 = arith.addf %291, %292 : vector<4x256xf32>
    %cst_104 = arith.constant 0.000000e+00 : f32
    %294 = vector.broadcast %cst_104 : f32 to vector<4x256xf32>
    %295 = arith.maximumf %293, %294 : vector<4x256xf32>
    %296 = tpu.concatenate %162, %295 in 0 : vector<4x256xf32>, vector<4x256xf32> -> vector<8x256xf32>
    %c128 = arith.constant 128 : index
    %c0_105 = arith.constant 0 : index
    %297 = vector.load %arg9[%c128, %c0_105] : memref<264x128xf32, #tpu.memory_space<vmem>>, vector<4x8xf32>
    %c128_106 = arith.constant 128 : index
    %c127_107 = arith.constant 127 : index
    %298 = vector.load %arg9[%c128_106, %c127_107] : memref<264x128xf32, #tpu.memory_space<vmem>>, vector<4x1xf32>
    %cst_108 = arith.constant dense<0.000000e+00> : vector<4x256xf32>
    %299 = tpu.matmul %297, %296, %cst_108 {dimension_numbers = #tpu.dot_dimension_numbers<[1], [0], [0], [1], [0, 0, 1, 1], [], []>} : vector<4x8xf32>, vector<8x256xf32>, vector<4x256xf32> -> vector<4x256xf32>
    %300 = vector.broadcast %298 : vector<4x1xf32> to vector<4x256xf32>
    %301 = arith.addf %299, %300 : vector<4x256xf32>
    %cst_109 = arith.constant 0.000000e+00 : f32
    %302 = vector.broadcast %cst_109 : f32 to vector<4x256xf32>
    %303 = arith.maximumf %301, %302 : vector<4x256xf32>
    %c17_i32_110 = arith.constant 17 : i32
    %304 = tpu.dynamic_rotate %303 by %c17_i32_110 dim 1 : vector<4x256xf32>, i32 -> vector<4x256xf32>
    %305 = vector.extract_strided_slice %0 {offsets = [0, 0], sizes = [1, 256], strides = [1, 1]} : vector<9x256xf32> to vector<1x256xf32>
    %306 = vector.broadcast %305 : vector<1x256xf32> to vector<4x256xf32>
    %307 = arith.mulf %304, %306 : vector<4x256xf32>
    %c16_i32_111 = arith.constant 16 : i32
    %308 = tpu.dynamic_rotate %303 by %c16_i32_111 dim 1 : vector<4x256xf32>, i32 -> vector<4x256xf32>
    %309 = vector.extract_strided_slice %0 {offsets = [1, 0], sizes = [1, 256], strides = [1, 1]} : vector<9x256xf32> to vector<1x256xf32>
    %310 = vector.broadcast %309 : vector<1x256xf32> to vector<4x256xf32>
    %311 = arith.mulf %308, %310 : vector<4x256xf32>
    %c15_i32_112 = arith.constant 15 : i32
    %312 = tpu.dynamic_rotate %303 by %c15_i32_112 dim 1 : vector<4x256xf32>, i32 -> vector<4x256xf32>
    %313 = vector.extract_strided_slice %0 {offsets = [2, 0], sizes = [1, 256], strides = [1, 1]} : vector<9x256xf32> to vector<1x256xf32>
    %314 = vector.broadcast %313 : vector<1x256xf32> to vector<4x256xf32>
    %315 = arith.mulf %312, %314 : vector<4x256xf32>
    %c1_i32_113 = arith.constant 1 : i32
    %316 = tpu.dynamic_rotate %303 by %c1_i32_113 dim 1 : vector<4x256xf32>, i32 -> vector<4x256xf32>
    %317 = vector.extract_strided_slice %0 {offsets = [3, 0], sizes = [1, 256], strides = [1, 1]} : vector<9x256xf32> to vector<1x256xf32>
    %318 = vector.broadcast %317 : vector<1x256xf32> to vector<4x256xf32>
    %319 = arith.mulf %316, %318 : vector<4x256xf32>
    %c255_i32_114 = arith.constant 255 : i32
    %320 = tpu.dynamic_rotate %303 by %c255_i32_114 dim 1 : vector<4x256xf32>, i32 -> vector<4x256xf32>
    %321 = vector.extract_strided_slice %0 {offsets = [5, 0], sizes = [1, 256], strides = [1, 1]} : vector<9x256xf32> to vector<1x256xf32>
    %322 = vector.broadcast %321 : vector<1x256xf32> to vector<4x256xf32>
    %323 = arith.mulf %320, %322 : vector<4x256xf32>
    %c241_i32_115 = arith.constant 241 : i32
    %324 = tpu.dynamic_rotate %303 by %c241_i32_115 dim 1 : vector<4x256xf32>, i32 -> vector<4x256xf32>
    %325 = vector.extract_strided_slice %0 {offsets = [6, 0], sizes = [1, 256], strides = [1, 1]} : vector<9x256xf32> to vector<1x256xf32>
    %326 = vector.broadcast %325 : vector<1x256xf32> to vector<4x256xf32>
    %327 = arith.mulf %324, %326 : vector<4x256xf32>
    %c240_i32_116 = arith.constant 240 : i32
    %328 = tpu.dynamic_rotate %303 by %c240_i32_116 dim 1 : vector<4x256xf32>, i32 -> vector<4x256xf32>
    %329 = vector.extract_strided_slice %0 {offsets = [7, 0], sizes = [1, 256], strides = [1, 1]} : vector<9x256xf32> to vector<1x256xf32>
    %330 = vector.broadcast %329 : vector<1x256xf32> to vector<4x256xf32>
    %331 = arith.mulf %328, %330 : vector<4x256xf32>
    %c239_i32_117 = arith.constant 239 : i32
    %332 = tpu.dynamic_rotate %303 by %c239_i32_117 dim 1 : vector<4x256xf32>, i32 -> vector<4x256xf32>
    %333 = vector.extract_strided_slice %0 {offsets = [8, 0], sizes = [1, 256], strides = [1, 1]} : vector<9x256xf32> to vector<1x256xf32>
    %334 = vector.broadcast %333 : vector<1x256xf32> to vector<4x256xf32>
    %335 = arith.mulf %332, %334 : vector<4x256xf32>
    %336 = tpu.concatenate %307, %311, %315, %319, %303, %323, %327, %331, %335 in 0 : vector<4x256xf32>, vector<4x256xf32>, vector<4x256xf32>, vector<4x256xf32>, vector<4x256xf32>, vector<4x256xf32>, vector<4x256xf32>, vector<4x256xf32>, vector<4x256xf32> -> vector<36x256xf32>
    %c136 = arith.constant 136 : index
    %c0_118 = arith.constant 0 : index
    %337 = vector.load %arg9[%c136, %c0_118] : memref<264x128xf32, #tpu.memory_space<vmem>>, vector<4x36xf32>
    %c136_119 = arith.constant 136 : index
    %c127_120 = arith.constant 127 : index
    %338 = vector.load %arg9[%c136_119, %c127_120] : memref<264x128xf32, #tpu.memory_space<vmem>>, vector<4x1xf32>
    %cst_121 = arith.constant dense<0.000000e+00> : vector<4x256xf32>
    %339 = tpu.matmul %337, %336, %cst_121 {dimension_numbers = #tpu.dot_dimension_numbers<[1], [0], [0], [1], [0, 0, 1, 1], [], []>} : vector<4x36xf32>, vector<36x256xf32>, vector<4x256xf32> -> vector<4x256xf32>
    %340 = vector.broadcast %338 : vector<4x1xf32> to vector<4x256xf32>
    %341 = arith.addf %339, %340 : vector<4x256xf32>
    %c17_i32_122 = arith.constant 17 : i32
    %342 = tpu.dynamic_rotate %341 by %c17_i32_122 dim 1 : vector<4x256xf32>, i32 -> vector<4x256xf32>
    %343 = vector.extract_strided_slice %0 {offsets = [0, 0], sizes = [1, 256], strides = [1, 1]} : vector<9x256xf32> to vector<1x256xf32>
    %344 = vector.broadcast %343 : vector<1x256xf32> to vector<4x256xf32>
    %345 = arith.mulf %342, %344 : vector<4x256xf32>
    %c16_i32_123 = arith.constant 16 : i32
    %346 = tpu.dynamic_rotate %341 by %c16_i32_123 dim 1 : vector<4x256xf32>, i32 -> vector<4x256xf32>
    %347 = vector.extract_strided_slice %0 {offsets = [1, 0], sizes = [1, 256], strides = [1, 1]} : vector<9x256xf32> to vector<1x256xf32>
    %348 = vector.broadcast %347 : vector<1x256xf32> to vector<4x256xf32>
    %349 = arith.mulf %346, %348 : vector<4x256xf32>
    %c15_i32_124 = arith.constant 15 : i32
    %350 = tpu.dynamic_rotate %341 by %c15_i32_124 dim 1 : vector<4x256xf32>, i32 -> vector<4x256xf32>
    %351 = vector.extract_strided_slice %0 {offsets = [2, 0], sizes = [1, 256], strides = [1, 1]} : vector<9x256xf32> to vector<1x256xf32>
    %352 = vector.broadcast %351 : vector<1x256xf32> to vector<4x256xf32>
    %353 = arith.mulf %350, %352 : vector<4x256xf32>
    %c1_i32_125 = arith.constant 1 : i32
    %354 = tpu.dynamic_rotate %341 by %c1_i32_125 dim 1 : vector<4x256xf32>, i32 -> vector<4x256xf32>
    %355 = vector.extract_strided_slice %0 {offsets = [3, 0], sizes = [1, 256], strides = [1, 1]} : vector<9x256xf32> to vector<1x256xf32>
    %356 = vector.broadcast %355 : vector<1x256xf32> to vector<4x256xf32>
    %357 = arith.mulf %354, %356 : vector<4x256xf32>
    %c255_i32_126 = arith.constant 255 : i32
    %358 = tpu.dynamic_rotate %341 by %c255_i32_126 dim 1 : vector<4x256xf32>, i32 -> vector<4x256xf32>
    %359 = vector.extract_strided_slice %0 {offsets = [5, 0], sizes = [1, 256], strides = [1, 1]} : vector<9x256xf32> to vector<1x256xf32>
    %360 = vector.broadcast %359 : vector<1x256xf32> to vector<4x256xf32>
    %361 = arith.mulf %358, %360 : vector<4x256xf32>
    %c241_i32_127 = arith.constant 241 : i32
    %362 = tpu.dynamic_rotate %341 by %c241_i32_127 dim 1 : vector<4x256xf32>, i32 -> vector<4x256xf32>
    %363 = vector.extract_strided_slice %0 {offsets = [6, 0], sizes = [1, 256], strides = [1, 1]} : vector<9x256xf32> to vector<1x256xf32>
    %364 = vector.broadcast %363 : vector<1x256xf32> to vector<4x256xf32>
    %365 = arith.mulf %362, %364 : vector<4x256xf32>
    %c240_i32_128 = arith.constant 240 : i32
    %366 = tpu.dynamic_rotate %341 by %c240_i32_128 dim 1 : vector<4x256xf32>, i32 -> vector<4x256xf32>
    %367 = vector.extract_strided_slice %0 {offsets = [7, 0], sizes = [1, 256], strides = [1, 1]} : vector<9x256xf32> to vector<1x256xf32>
    %368 = vector.broadcast %367 : vector<1x256xf32> to vector<4x256xf32>
    %369 = arith.mulf %366, %368 : vector<4x256xf32>
    %c239_i32_129 = arith.constant 239 : i32
    %370 = tpu.dynamic_rotate %341 by %c239_i32_129 dim 1 : vector<4x256xf32>, i32 -> vector<4x256xf32>
    %371 = vector.extract_strided_slice %0 {offsets = [8, 0], sizes = [1, 256], strides = [1, 1]} : vector<9x256xf32> to vector<1x256xf32>
    %372 = vector.broadcast %371 : vector<1x256xf32> to vector<4x256xf32>
    %373 = arith.mulf %370, %372 : vector<4x256xf32>
    %374 = tpu.concatenate %345, %349, %353, %357, %341, %361, %365, %369, %373 in 0 : vector<4x256xf32>, vector<4x256xf32>, vector<4x256xf32>, vector<4x256xf32>, vector<4x256xf32>, vector<4x256xf32>, vector<4x256xf32>, vector<4x256xf32>, vector<4x256xf32> -> vector<36x256xf32>
    %c144 = arith.constant 144 : index
    %c0_130 = arith.constant 0 : index
    %375 = vector.load %arg9[%c144, %c0_130] : memref<264x128xf32, #tpu.memory_space<vmem>>, vector<2x36xf32>
    %c144_131 = arith.constant 144 : index
    %c127_132 = arith.constant 127 : index
    %376 = vector.load %arg9[%c144_131, %c127_132] : memref<264x128xf32, #tpu.memory_space<vmem>>, vector<2x1xf32>
    %cst_133 = arith.constant dense<0.000000e+00> : vector<2x256xf32>
    %377 = tpu.matmul %375, %374, %cst_133 {dimension_numbers = #tpu.dot_dimension_numbers<[1], [0], [0], [1], [0, 0, 1, 1], [], []>} : vector<2x36xf32>, vector<36x256xf32>, vector<2x256xf32> -> vector<2x256xf32>
    %378 = vector.broadcast %376 : vector<2x1xf32> to vector<2x256xf32>
    %379 = arith.addf %377, %378 : vector<2x256xf32>
    %cst_134 = arith.constant 0.000000e+00 : f32
    %380 = vector.broadcast %cst_134 : f32 to vector<2x256xf32>
    %381 = arith.maximumf %379, %380 : vector<2x256xf32>
    %c17_i32_135 = arith.constant 17 : i32
    %382 = tpu.dynamic_rotate %381 by %c17_i32_135 dim 1 : vector<2x256xf32>, i32 -> vector<2x256xf32>
    %383 = vector.extract_strided_slice %0 {offsets = [0, 0], sizes = [1, 256], strides = [1, 1]} : vector<9x256xf32> to vector<1x256xf32>
    %384 = vector.broadcast %383 : vector<1x256xf32> to vector<2x256xf32>
    %385 = arith.mulf %382, %384 : vector<2x256xf32>
    %c16_i32_136 = arith.constant 16 : i32
    %386 = tpu.dynamic_rotate %381 by %c16_i32_136 dim 1 : vector<2x256xf32>, i32 -> vector<2x256xf32>
    %387 = vector.extract_strided_slice %0 {offsets = [1, 0], sizes = [1, 256], strides = [1, 1]} : vector<9x256xf32> to vector<1x256xf32>
    %388 = vector.broadcast %387 : vector<1x256xf32> to vector<2x256xf32>
    %389 = arith.mulf %386, %388 : vector<2x256xf32>
    %c15_i32_137 = arith.constant 15 : i32
    %390 = tpu.dynamic_rotate %381 by %c15_i32_137 dim 1 : vector<2x256xf32>, i32 -> vector<2x256xf32>
    %391 = vector.extract_strided_slice %0 {offsets = [2, 0], sizes = [1, 256], strides = [1, 1]} : vector<9x256xf32> to vector<1x256xf32>
    %392 = vector.broadcast %391 : vector<1x256xf32> to vector<2x256xf32>
    %393 = arith.mulf %390, %392 : vector<2x256xf32>
    %c1_i32_138 = arith.constant 1 : i32
    %394 = tpu.dynamic_rotate %381 by %c1_i32_138 dim 1 : vector<2x256xf32>, i32 -> vector<2x256xf32>
    %395 = vector.extract_strided_slice %0 {offsets = [3, 0], sizes = [1, 256], strides = [1, 1]} : vector<9x256xf32> to vector<1x256xf32>
    %396 = vector.broadcast %395 : vector<1x256xf32> to vector<2x256xf32>
    %397 = arith.mulf %394, %396 : vector<2x256xf32>
    %c255_i32_139 = arith.constant 255 : i32
    %398 = tpu.dynamic_rotate %381 by %c255_i32_139 dim 1 : vector<2x256xf32>, i32 -> vector<2x256xf32>
    %399 = vector.extract_strided_slice %0 {offsets = [5, 0], sizes = [1, 256], strides = [1, 1]} : vector<9x256xf32> to vector<1x256xf32>
    %400 = vector.broadcast %399 : vector<1x256xf32> to vector<2x256xf32>
    %401 = arith.mulf %398, %400 : vector<2x256xf32>
    %c241_i32_140 = arith.constant 241 : i32
    %402 = tpu.dynamic_rotate %381 by %c241_i32_140 dim 1 : vector<2x256xf32>, i32 -> vector<2x256xf32>
    %403 = vector.extract_strided_slice %0 {offsets = [6, 0], sizes = [1, 256], strides = [1, 1]} : vector<9x256xf32> to vector<1x256xf32>
    %404 = vector.broadcast %403 : vector<1x256xf32> to vector<2x256xf32>
    %405 = arith.mulf %402, %404 : vector<2x256xf32>
    %c240_i32_141 = arith.constant 240 : i32
    %406 = tpu.dynamic_rotate %381 by %c240_i32_141 dim 1 : vector<2x256xf32>, i32 -> vector<2x256xf32>
    %407 = vector.extract_strided_slice %0 {offsets = [7, 0], sizes = [1, 256], strides = [1, 1]} : vector<9x256xf32> to vector<1x256xf32>
    %408 = vector.broadcast %407 : vector<1x256xf32> to vector<2x256xf32>
    %409 = arith.mulf %406, %408 : vector<2x256xf32>
    %c239_i32_142 = arith.constant 239 : i32
    %410 = tpu.dynamic_rotate %381 by %c239_i32_142 dim 1 : vector<2x256xf32>, i32 -> vector<2x256xf32>
    %411 = vector.extract_strided_slice %0 {offsets = [8, 0], sizes = [1, 256], strides = [1, 1]} : vector<9x256xf32> to vector<1x256xf32>
    %412 = vector.broadcast %411 : vector<1x256xf32> to vector<2x256xf32>
    %413 = arith.mulf %410, %412 : vector<2x256xf32>
    %414 = tpu.concatenate %385, %389, %393, %397, %381, %401, %405, %409, %413 in 0 : vector<2x256xf32>, vector<2x256xf32>, vector<2x256xf32>, vector<2x256xf32>, vector<2x256xf32>, vector<2x256xf32>, vector<2x256xf32>, vector<2x256xf32>, vector<2x256xf32> -> vector<18x256xf32>
    %c152 = arith.constant 152 : index
    %c0_143 = arith.constant 0 : index
    %415 = vector.load %arg9[%c152, %c0_143] : memref<264x128xf32, #tpu.memory_space<vmem>>, vector<18x1xf32>
    %c152_144 = arith.constant 152 : index
    %c127_145 = arith.constant 127 : index
    %416 = vector.load %arg9[%c152_144, %c127_145] : memref<264x128xf32, #tpu.memory_space<vmem>>, vector<1x1xf32>
    %417 = vector.broadcast %415 : vector<18x1xf32> to vector<18x256xf32>
    %418 = arith.mulf %414, %417 : vector<18x256xf32>
    %cst_146 = arith.constant dense<0.000000e+00> : vector<256xf32>
    %419 = vector.multi_reduction <add>, %418, %cst_146 [0] : vector<18x256xf32> to vector<256xf32>
    %420 = vector.shape_cast %419 : vector<256xf32> to vector<1x256xf32>
    %421 = vector.broadcast %416 : vector<1x1xf32> to vector<1x256xf32>
    %422 = arith.addf %420, %421 : vector<1x256xf32>
    %423 = vector.extract_strided_slice %0 {offsets = [7, 0], sizes = [1, 256], strides = [1, 1]} : vector<9x256xf32> to vector<1x256xf32>
    %c240_i32_147 = arith.constant 240 : i32
    %424 = tpu.dynamic_rotate %422 by %c240_i32_147 dim 1 : vector<1x256xf32>, i32 -> vector<1x256xf32>
    %425 = arith.subf %422, %424 : vector<1x256xf32>
    %426 = math.absf %425 : vector<1x256xf32>
    %427 = arith.mulf %423, %426 : vector<1x256xf32>
    %cst_148 = arith.constant 1.000000e+00 : f32
    %428 = vector.broadcast %cst_148 : f32 to vector<1x256xf32>
    %429 = arith.subf %428, %423 : vector<1x256xf32>
    %430 = arith.mulf %429, %422 : vector<1x256xf32>
    %431 = arith.addf %427, %430 : vector<1x256xf32>
    %432 = vector.extract_strided_slice %0 {offsets = [5, 0], sizes = [1, 256], strides = [1, 1]} : vector<9x256xf32> to vector<1x256xf32>
    %c255_i32_149 = arith.constant 255 : i32
    %433 = tpu.dynamic_rotate %431 by %c255_i32_149 dim 1 : vector<1x256xf32>, i32 -> vector<1x256xf32>
    %434 = arith.subf %431, %433 : vector<1x256xf32>
    %435 = math.absf %434 : vector<1x256xf32>
    %436 = arith.mulf %432, %435 : vector<1x256xf32>
    %cst_150 = arith.constant 1.000000e+00 : f32
    %437 = vector.broadcast %cst_150 : f32 to vector<1x256xf32>
    %438 = arith.subf %437, %432 : vector<1x256xf32>
    %439 = arith.mulf %438, %431 : vector<1x256xf32>
    %440 = arith.addf %436, %439 : vector<1x256xf32>
    %441 = arith.subf %422, %440 : vector<1x256xf32>
    %cst_151 = arith.constant 0.000000e+00 : f32
    %cst_152 = arith.constant 1.000000e+00 : f32
    %442 = vector.broadcast %cst_151 : f32 to vector<1x256xf32>
    %443 = arith.maximumf %442, %441 : vector<1x256xf32>
    %444 = vector.broadcast %cst_152 : f32 to vector<1x256xf32>
    %445 = arith.minimumf %444, %443 : vector<1x256xf32>
    %c0_153 = arith.constant 0 : index
    %c0_154 = arith.constant 0 : index
    %c0_155 = arith.constant 0 : index
    %446 = vector.load %arg11[%c0_153, %c0_154, %c0_155] : memref<1x1x256xf32, #tpu.memory_space<vmem>>, vector<1x1x256xf32>
    %447 = vector.shape_cast %446 : vector<1x1x256xf32> to vector<1x256xf32>
    %448 = vector.shape_cast %445 : vector<1x256xf32> to vector<1x1x256xf32>
    tpu.vector_store %arg11[%c0_153, %c0_154, %c0_155], %448 {strides = array<i32>} : memref<1x1x256xf32, #tpu.memory_space<vmem>>, vector<1x1x256xf32>,
    %c176 = arith.constant 176 : index
    %c0_156 = arith.constant 0 : index
    %449 = vector.load %arg9[%c176, %c0_156] : memref<264x128xf32, #tpu.memory_space<vmem>>, vector<4x4xf32>
    %c176_157 = arith.constant 176 : index
    %c127_158 = arith.constant 127 : index
    %450 = vector.load %arg9[%c176_157, %c127_158] : memref<264x128xf32, #tpu.memory_space<vmem>>, vector<4x1xf32>
    %cst_159 = arith.constant dense<0.000000e+00> : vector<4x256xf32>
    %451 = tpu.matmul %449, %29, %cst_159 {dimension_numbers = #tpu.dot_dimension_numbers<[1], [0], [0], [1], [0, 0, 1, 1], [], []>} : vector<4x4xf32>, vector<4x256xf32>, vector<4x256xf32> -> vector<4x256xf32>
    %452 = vector.broadcast %450 : vector<4x1xf32> to vector<4x256xf32>
    %453 = arith.addf %451, %452 : vector<4x256xf32>
    %c17_i32_160 = arith.constant 17 : i32
    %454 = tpu.dynamic_rotate %453 by %c17_i32_160 dim 1 : vector<4x256xf32>, i32 -> vector<4x256xf32>
    %455 = vector.extract_strided_slice %0 {offsets = [0, 0], sizes = [1, 256], strides = [1, 1]} : vector<9x256xf32> to vector<1x256xf32>
    %456 = vector.broadcast %455 : vector<1x256xf32> to vector<4x256xf32>
    %457 = arith.mulf %454, %456 : vector<4x256xf32>
    %c16_i32_161 = arith.constant 16 : i32
    %458 = tpu.dynamic_rotate %453 by %c16_i32_161 dim 1 : vector<4x256xf32>, i32 -> vector<4x256xf32>
    %459 = vector.extract_strided_slice %0 {offsets = [1, 0], sizes = [1, 256], strides = [1, 1]} : vector<9x256xf32> to vector<1x256xf32>
    %460 = vector.broadcast %459 : vector<1x256xf32> to vector<4x256xf32>
    %461 = arith.mulf %458, %460 : vector<4x256xf32>
    %c15_i32_162 = arith.constant 15 : i32
    %462 = tpu.dynamic_rotate %453 by %c15_i32_162 dim 1 : vector<4x256xf32>, i32 -> vector<4x256xf32>
    %463 = vector.extract_strided_slice %0 {offsets = [2, 0], sizes = [1, 256], strides = [1, 1]} : vector<9x256xf32> to vector<1x256xf32>
    %464 = vector.broadcast %463 : vector<1x256xf32> to vector<4x256xf32>
    %465 = arith.mulf %462, %464 : vector<4x256xf32>
    %c1_i32_163 = arith.constant 1 : i32
    %466 = tpu.dynamic_rotate %453 by %c1_i32_163 dim 1 : vector<4x256xf32>, i32 -> vector<4x256xf32>
    %467 = vector.extract_strided_slice %0 {offsets = [3, 0], sizes = [1, 256], strides = [1, 1]} : vector<9x256xf32> to vector<1x256xf32>
    %468 = vector.broadcast %467 : vector<1x256xf32> to vector<4x256xf32>
    %469 = arith.mulf %466, %468 : vector<4x256xf32>
    %c255_i32_164 = arith.constant 255 : i32
    %470 = tpu.dynamic_rotate %453 by %c255_i32_164 dim 1 : vector<4x256xf32>, i32 -> vector<4x256xf32>
    %471 = vector.extract_strided_slice %0 {offsets = [5, 0], sizes = [1, 256], strides = [1, 1]} : vector<9x256xf32> to vector<1x256xf32>
    %472 = vector.broadcast %471 : vector<1x256xf32> to vector<4x256xf32>
    %473 = arith.mulf %470, %472 : vector<4x256xf32>
    %c241_i32_165 = arith.constant 241 : i32
    %474 = tpu.dynamic_rotate %453 by %c241_i32_165 dim 1 : vector<4x256xf32>, i32 -> vector<4x256xf32>
    %475 = vector.extract_strided_slice %0 {offsets = [6, 0], sizes = [1, 256], strides = [1, 1]} : vector<9x256xf32> to vector<1x256xf32>
    %476 = vector.broadcast %475 : vector<1x256xf32> to vector<4x256xf32>
    %477 = arith.mulf %474, %476 : vector<4x256xf32>
    %c240_i32_166 = arith.constant 240 : i32
    %478 = tpu.dynamic_rotate %453 by %c240_i32_166 dim 1 : vector<4x256xf32>, i32 -> vector<4x256xf32>
    %479 = vector.extract_strided_slice %0 {offsets = [7, 0], sizes = [1, 256], strides = [1, 1]} : vector<9x256xf32> to vector<1x256xf32>
    %480 = vector.broadcast %479 : vector<1x256xf32> to vector<4x256xf32>
    %481 = arith.mulf %478, %480 : vector<4x256xf32>
    %c239_i32_167 = arith.constant 239 : i32
    %482 = tpu.dynamic_rotate %453 by %c239_i32_167 dim 1 : vector<4x256xf32>, i32 -> vector<4x256xf32>
    %483 = vector.extract_strided_slice %0 {offsets = [8, 0], sizes = [1, 256], strides = [1, 1]} : vector<9x256xf32> to vector<1x256xf32>
    %484 = vector.broadcast %483 : vector<1x256xf32> to vector<4x256xf32>
    %485 = arith.mulf %482, %484 : vector<4x256xf32>
    %486 = tpu.concatenate %457, %461, %465, %469, %453, %473, %477, %481, %485 in 0 : vector<4x256xf32>, vector<4x256xf32>, vector<4x256xf32>, vector<4x256xf32>, vector<4x256xf32>, vector<4x256xf32>, vector<4x256xf32>, vector<4x256xf32>, vector<4x256xf32> -> vector<36x256xf32>
    %c184 = arith.constant 184 : index
    %c0_168 = arith.constant 0 : index
    %487 = vector.load %arg9[%c184, %c0_168] : memref<264x128xf32, #tpu.memory_space<vmem>>, vector<4x36xf32>
    %c184_169 = arith.constant 184 : index
    %c127_170 = arith.constant 127 : index
    %488 = vector.load %arg9[%c184_169, %c127_170] : memref<264x128xf32, #tpu.memory_space<vmem>>, vector<4x1xf32>
    %cst_171 = arith.constant dense<0.000000e+00> : vector<4x256xf32>
    %489 = tpu.matmul %487, %486, %cst_171 {dimension_numbers = #tpu.dot_dimension_numbers<[1], [0], [0], [1], [0, 0, 1, 1], [], []>} : vector<4x36xf32>, vector<36x256xf32>, vector<4x256xf32> -> vector<4x256xf32>
    %490 = vector.broadcast %488 : vector<4x1xf32> to vector<4x256xf32>
    %491 = arith.addf %489, %490 : vector<4x256xf32>
    %c17_i32_172 = arith.constant 17 : i32
    %492 = tpu.dynamic_rotate %491 by %c17_i32_172 dim 1 : vector<4x256xf32>, i32 -> vector<4x256xf32>
    %493 = vector.extract_strided_slice %0 {offsets = [0, 0], sizes = [1, 256], strides = [1, 1]} : vector<9x256xf32> to vector<1x256xf32>
    %494 = vector.broadcast %493 : vector<1x256xf32> to vector<4x256xf32>
    %495 = arith.mulf %492, %494 : vector<4x256xf32>
    %c16_i32_173 = arith.constant 16 : i32
    %496 = tpu.dynamic_rotate %491 by %c16_i32_173 dim 1 : vector<4x256xf32>, i32 -> vector<4x256xf32>
    %497 = vector.extract_strided_slice %0 {offsets = [1, 0], sizes = [1, 256], strides = [1, 1]} : vector<9x256xf32> to vector<1x256xf32>
    %498 = vector.broadcast %497 : vector<1x256xf32> to vector<4x256xf32>
    %499 = arith.mulf %496, %498 : vector<4x256xf32>
    %c15_i32_174 = arith.constant 15 : i32
    %500 = tpu.dynamic_rotate %491 by %c15_i32_174 dim 1 : vector<4x256xf32>, i32 -> vector<4x256xf32>
    %501 = vector.extract_strided_slice %0 {offsets = [2, 0], sizes = [1, 256], strides = [1, 1]} : vector<9x256xf32> to vector<1x256xf32>
    %502 = vector.broadcast %501 : vector<1x256xf32> to vector<4x256xf32>
    %503 = arith.mulf %500, %502 : vector<4x256xf32>
    %c1_i32_175 = arith.constant 1 : i32
    %504 = tpu.dynamic_rotate %491 by %c1_i32_175 dim 1 : vector<4x256xf32>, i32 -> vector<4x256xf32>
    %505 = vector.extract_strided_slice %0 {offsets = [3, 0], sizes = [1, 256], strides = [1, 1]} : vector<9x256xf32> to vector<1x256xf32>
    %506 = vector.broadcast %505 : vector<1x256xf32> to vector<4x256xf32>
    %507 = arith.mulf %504, %506 : vector<4x256xf32>
    %c255_i32_176 = arith.constant 255 : i32
    %508 = tpu.dynamic_rotate %491 by %c255_i32_176 dim 1 : vector<4x256xf32>, i32 -> vector<4x256xf32>
    %509 = vector.extract_strided_slice %0 {offsets = [5, 0], sizes = [1, 256], strides = [1, 1]} : vector<9x256xf32> to vector<1x256xf32>
    %510 = vector.broadcast %509 : vector<1x256xf32> to vector<4x256xf32>
    %511 = arith.mulf %508, %510 : vector<4x256xf32>
    %c241_i32_177 = arith.constant 241 : i32
    %512 = tpu.dynamic_rotate %491 by %c241_i32_177 dim 1 : vector<4x256xf32>, i32 -> vector<4x256xf32>
    %513 = vector.extract_strided_slice %0 {offsets = [6, 0], sizes = [1, 256], strides = [1, 1]} : vector<9x256xf32> to vector<1x256xf32>
    %514 = vector.broadcast %513 : vector<1x256xf32> to vector<4x256xf32>
    %515 = arith.mulf %512, %514 : vector<4x256xf32>
    %c240_i32_178 = arith.constant 240 : i32
    %516 = tpu.dynamic_rotate %491 by %c240_i32_178 dim 1 : vector<4x256xf32>, i32 -> vector<4x256xf32>
    %517 = vector.extract_strided_slice %0 {offsets = [7, 0], sizes = [1, 256], strides = [1, 1]} : vector<9x256xf32> to vector<1x256xf32>
    %518 = vector.broadcast %517 : vector<1x256xf32> to vector<4x256xf32>
    %519 = arith.mulf %516, %518 : vector<4x256xf32>
    %c239_i32_179 = arith.constant 239 : i32
    %520 = tpu.dynamic_rotate %491 by %c239_i32_179 dim 1 : vector<4x256xf32>, i32 -> vector<4x256xf32>
    %521 = vector.extract_strided_slice %0 {offsets = [8, 0], sizes = [1, 256], strides = [1, 1]} : vector<9x256xf32> to vector<1x256xf32>
    %522 = vector.broadcast %521 : vector<1x256xf32> to vector<4x256xf32>
    %523 = arith.mulf %520, %522 : vector<4x256xf32>
    %524 = tpu.concatenate %495, %499, %503, %507, %491, %511, %515, %519, %523 in 0 : vector<4x256xf32>, vector<4x256xf32>, vector<4x256xf32>, vector<4x256xf32>, vector<4x256xf32>, vector<4x256xf32>, vector<4x256xf32>, vector<4x256xf32>, vector<4x256xf32> -> vector<36x256xf32>
    %c192 = arith.constant 192 : index
    %c0_180 = arith.constant 0 : index
    %525 = vector.load %arg9[%c192, %c0_180] : memref<264x128xf32, #tpu.memory_space<vmem>>, vector<4x36xf32>
    %c192_181 = arith.constant 192 : index
    %c127_182 = arith.constant 127 : index
    %526 = vector.load %arg9[%c192_181, %c127_182] : memref<264x128xf32, #tpu.memory_space<vmem>>, vector<4x1xf32>
    %cst_183 = arith.constant dense<0.000000e+00> : vector<4x256xf32>
    %527 = tpu.matmul %525, %524, %cst_183 {dimension_numbers = #tpu.dot_dimension_numbers<[1], [0], [0], [1], [0, 0, 1, 1], [], []>} : vector<4x36xf32>, vector<36x256xf32>, vector<4x256xf32> -> vector<4x256xf32>
    %528 = vector.broadcast %526 : vector<4x1xf32> to vector<4x256xf32>
    %529 = arith.addf %527, %528 : vector<4x256xf32>
    %cst_184 = arith.constant 0.000000e+00 : f32
    %530 = vector.broadcast %cst_184 : f32 to vector<4x256xf32>
    %531 = arith.maximumf %529, %530 : vector<4x256xf32>
    %c256 = arith.constant 256 : index
    %c0_185 = arith.constant 0 : index
    %532 = vector.load %arg9[%c256, %c0_185] : memref<264x128xf32, #tpu.memory_space<vmem>>, vector<4x1xf32>
    %c256_186 = arith.constant 256 : index
    %c1 = arith.constant 1 : index
    %533 = vector.load %arg9[%c256_186, %c1] : memref<264x128xf32, #tpu.memory_space<vmem>>, vector<4x1xf32>
    %534 = math.absf %29 : vector<4x256xf32>
    %535 = vector.broadcast %532 : vector<4x1xf32> to vector<4x256xf32>
    %536 = arith.mulf %534, %535 : vector<4x256xf32>
    %537 = vector.broadcast %533 : vector<4x1xf32> to vector<4x256xf32>
    %538 = arith.addf %536, %537 : vector<4x256xf32>
    %cst_187 = arith.constant 0.000000e+00 : f32
    %539 = vector.broadcast %cst_187 : f32 to vector<4x256xf32>
    %540 = arith.maximumf %538, %539 : vector<4x256xf32>
    %541 = arith.addf %531, %540 : vector<4x256xf32>
    %cst_188 = arith.constant 6.000000e+00 : f32
    %542 = vector.broadcast %cst_188 : f32 to vector<1x256xf32>
    %543 = arith.subf %542, %13 : vector<1x256xf32>
    %544 = arith.subf %543, %18 : vector<1x256xf32>
    %545 = arith.subf %544, %23 : vector<1x256xf32>
    %c0_189 = arith.constant 0 : index
    %c0_190 = arith.constant 0 : index
    %c0_191 = arith.constant 0 : index
    %546 = vector.load %arg5[%c0_189, %c0_190, %c0_191] : memref<1x1x256xf32, #tpu.memory_space<vmem>>, vector<1x1x256xf32>
    %547 = vector.shape_cast %546 : vector<1x1x256xf32> to vector<1x256xf32>
    %548 = arith.negf %547 : vector<1x256xf32>
    %549 = math.exp %548 : vector<1x256xf32>
    %cst_192 = arith.constant 1.000000e+00 : f32
    %550 = vector.broadcast %cst_192 : f32 to vector<1x256xf32>
    %551 = arith.addf %550, %549 : vector<1x256xf32>
    %552 = arith.divf %550, %551 : vector<1x256xf32>
    %553 = arith.subf %545, %552 : vector<1x256xf32>
    %c0_193 = arith.constant 0 : index
    %c0_194 = arith.constant 0 : index
    %c0_195 = arith.constant 0 : index
    %554 = vector.load %arg6[%c0_193, %c0_194, %c0_195] : memref<1x1x256xf32, #tpu.memory_space<vmem>>, vector<1x1x256xf32>
    %555 = vector.shape_cast %554 : vector<1x1x256xf32> to vector<1x256xf32>
    %556 = arith.negf %555 : vector<1x256xf32>
    %557 = math.exp %556 : vector<1x256xf32>
    %cst_196 = arith.constant 1.000000e+00 : f32
    %558 = vector.broadcast %cst_196 : f32 to vector<1x256xf32>
    %559 = arith.addf %558, %557 : vector<1x256xf32>
    %560 = arith.divf %558, %559 : vector<1x256xf32>
    %561 = arith.subf %553, %560 : vector<1x256xf32>
    %c0_197 = arith.constant 0 : index
    %c0_198 = arith.constant 0 : index
    %c0_199 = arith.constant 0 : index
    %562 = vector.load %arg7[%c0_197, %c0_198, %c0_199] : memref<1x1x256xf32, #tpu.memory_space<vmem>>, vector<1x1x256xf32>
    %563 = vector.shape_cast %562 : vector<1x1x256xf32> to vector<1x256xf32>
    %564 = arith.negf %563 : vector<1x256xf32>
    %565 = math.exp %564 : vector<1x256xf32>
    %cst_200 = arith.constant 1.000000e+00 : f32
    %566 = vector.broadcast %cst_200 : f32 to vector<1x256xf32>
    %567 = arith.addf %566, %565 : vector<1x256xf32>
    %568 = arith.divf %566, %567 : vector<1x256xf32>
    %569 = arith.subf %561, %568 : vector<1x256xf32>
    %570 = vector.broadcast %569 : vector<1x256xf32> to vector<4x256xf32>
    %571 = arith.mulf %570, %2 : vector<4x256xf32>
    %572 = tpu.concatenate %571, %541, %303 in 0 : vector<4x256xf32>, vector<4x256xf32>, vector<4x256xf32> -> vector<12x256xf32>
    %c17_i32_201 = arith.constant 17 : i32
    %573 = tpu.dynamic_rotate %572 by %c17_i32_201 dim 1 : vector<12x256xf32>, i32 -> vector<12x256xf32>
    %574 = vector.extract_strided_slice %0 {offsets = [0, 0], sizes = [1, 256], strides = [1, 1]} : vector<9x256xf32> to vector<1x256xf32>
    %575 = vector.broadcast %574 : vector<1x256xf32> to vector<12x256xf32>
    %576 = arith.mulf %573, %575 : vector<12x256xf32>
    %c16_i32_202 = arith.constant 16 : i32
    %577 = tpu.dynamic_rotate %572 by %c16_i32_202 dim 1 : vector<12x256xf32>, i32 -> vector<12x256xf32>
    %578 = vector.extract_strided_slice %0 {offsets = [1, 0], sizes = [1, 256], strides = [1, 1]} : vector<9x256xf32> to vector<1x256xf32>
    %579 = vector.broadcast %578 : vector<1x256xf32> to vector<12x256xf32>
    %580 = arith.mulf %577, %579 : vector<12x256xf32>
    %c15_i32_203 = arith.constant 15 : i32
    %581 = tpu.dynamic_rotate %572 by %c15_i32_203 dim 1 : vector<12x256xf32>, i32 -> vector<12x256xf32>
    %582 = vector.extract_strided_slice %0 {offsets = [2, 0], sizes = [1, 256], strides = [1, 1]} : vector<9x256xf32> to vector<1x256xf32>
    %583 = vector.broadcast %582 : vector<1x256xf32> to vector<12x256xf32>
    %584 = arith.mulf %581, %583 : vector<12x256xf32>
    %c1_i32_204 = arith.constant 1 : i32
    %585 = tpu.dynamic_rotate %572 by %c1_i32_204 dim 1 : vector<12x256xf32>, i32 -> vector<12x256xf32>
    %586 = vector.extract_strided_slice %0 {offsets = [3, 0], sizes = [1, 256], strides = [1, 1]} : vector<9x256xf32> to vector<1x256xf32>
    %587 = vector.broadcast %586 : vector<1x256xf32> to vector<12x256xf32>
    %588 = arith.mulf %585, %587 : vector<12x256xf32>
    %c255_i32_205 = arith.constant 255 : i32
    %589 = tpu.dynamic_rotate %572 by %c255_i32_205 dim 1 : vector<12x256xf32>, i32 -> vector<12x256xf32>
    %590 = vector.extract_strided_slice %0 {offsets = [5, 0], sizes = [1, 256], strides = [1, 1]} : vector<9x256xf32> to vector<1x256xf32>
    %591 = vector.broadcast %590 : vector<1x256xf32> to vector<12x256xf32>
    %592 = arith.mulf %589, %591 : vector<12x256xf32>
    %c241_i32_206 = arith.constant 241 : i32
    %593 = tpu.dynamic_rotate %572 by %c241_i32_206 dim 1 : vector<12x256xf32>, i32 -> vector<12x256xf32>
    %594 = vector.extract_strided_slice %0 {offsets = [6, 0], sizes = [1, 256], strides = [1, 1]} : vector<9x256xf32> to vector<1x256xf32>
    %595 = vector.broadcast %594 : vector<1x256xf32> to vector<12x256xf32>
    %596 = arith.mulf %593, %595 : vector<12x256xf32>
    %c240_i32_207 = arith.constant 240 : i32
    %597 = tpu.dynamic_rotate %572 by %c240_i32_207 dim 1 : vector<12x256xf32>, i32 -> vector<12x256xf32>
    %598 = vector.extract_strided_slice %0 {offsets = [7, 0], sizes = [1, 256], strides = [1, 1]} : vector<9x256xf32> to vector<1x256xf32>
    %599 = vector.broadcast %598 : vector<1x256xf32> to vector<12x256xf32>
    %600 = arith.mulf %597, %599 : vector<12x256xf32>
    %c239_i32_208 = arith.constant 239 : i32
    %601 = tpu.dynamic_rotate %572 by %c239_i32_208 dim 1 : vector<12x256xf32>, i32 -> vector<12x256xf32>
    %602 = vector.extract_strided_slice %0 {offsets = [8, 0], sizes = [1, 256], strides = [1, 1]} : vector<9x256xf32> to vector<1x256xf32>
    %603 = vector.broadcast %602 : vector<1x256xf32> to vector<12x256xf32>
    %604 = arith.mulf %601, %603 : vector<12x256xf32>
    %605 = tpu.concatenate %576, %580, %584, %588, %572, %592, %596, %600, %604 in 0 : vector<12x256xf32>, vector<12x256xf32>, vector<12x256xf32>, vector<12x256xf32>, vector<12x256xf32>, vector<12x256xf32>, vector<12x256xf32>, vector<12x256xf32>, vector<12x256xf32> -> vector<108x256xf32>
    %c200 = arith.constant 200 : index
    %c0_209 = arith.constant 0 : index
    %606 = vector.load %arg9[%c200, %c0_209] : memref<264x128xf32, #tpu.memory_space<vmem>>, vector<8x108xf32>
    %c200_210 = arith.constant 200 : index
    %c127_211 = arith.constant 127 : index
    %607 = vector.load %arg9[%c200_210, %c127_211] : memref<264x128xf32, #tpu.memory_space<vmem>>, vector<8x1xf32>
    %cst_212 = arith.constant dense<0.000000e+00> : vector<8x256xf32>
    %608 = tpu.matmul %606, %605, %cst_212 {dimension_numbers = #tpu.dot_dimension_numbers<[1], [0], [0], [1], [0, 0, 1, 1], [], []>} : vector<8x108xf32>, vector<108x256xf32>, vector<8x256xf32> -> vector<8x256xf32>
    %609 = vector.broadcast %607 : vector<8x1xf32> to vector<8x256xf32>
    %610 = arith.addf %608, %609 : vector<8x256xf32>
    %c17_i32_213 = arith.constant 17 : i32
    %611 = tpu.dynamic_rotate %610 by %c17_i32_213 dim 1 : vector<8x256xf32>, i32 -> vector<8x256xf32>
    %612 = vector.extract_strided_slice %0 {offsets = [0, 0], sizes = [1, 256], strides = [1, 1]} : vector<9x256xf32> to vector<1x256xf32>
    %613 = vector.broadcast %612 : vector<1x256xf32> to vector<8x256xf32>
    %614 = arith.mulf %611, %613 : vector<8x256xf32>
    %c16_i32_214 = arith.constant 16 : i32
    %615 = tpu.dynamic_rotate %610 by %c16_i32_214 dim 1 : vector<8x256xf32>, i32 -> vector<8x256xf32>
    %616 = vector.extract_strided_slice %0 {offsets = [1, 0], sizes = [1, 256], strides = [1, 1]} : vector<9x256xf32> to vector<1x256xf32>
    %617 = vector.broadcast %616 : vector<1x256xf32> to vector<8x256xf32>
    %618 = arith.mulf %615, %617 : vector<8x256xf32>
    %c15_i32_215 = arith.constant 15 : i32
    %619 = tpu.dynamic_rotate %610 by %c15_i32_215 dim 1 : vector<8x256xf32>, i32 -> vector<8x256xf32>
    %620 = vector.extract_strided_slice %0 {offsets = [2, 0], sizes = [1, 256], strides = [1, 1]} : vector<9x256xf32> to vector<1x256xf32>
    %621 = vector.broadcast %620 : vector<1x256xf32> to vector<8x256xf32>
    %622 = arith.mulf %619, %621 : vector<8x256xf32>
    %c1_i32_216 = arith.constant 1 : i32
    %623 = tpu.dynamic_rotate %610 by %c1_i32_216 dim 1 : vector<8x256xf32>, i32 -> vector<8x256xf32>
    %624 = vector.extract_strided_slice %0 {offsets = [3, 0], sizes = [1, 256], strides = [1, 1]} : vector<9x256xf32> to vector<1x256xf32>
    %625 = vector.broadcast %624 : vector<1x256xf32> to vector<8x256xf32>
    %626 = arith.mulf %623, %625 : vector<8x256xf32>
    %c255_i32_217 = arith.constant 255 : i32
    %627 = tpu.dynamic_rotate %610 by %c255_i32_217 dim 1 : vector<8x256xf32>, i32 -> vector<8x256xf32>
    %628 = vector.extract_strided_slice %0 {offsets = [5, 0], sizes = [1, 256], strides = [1, 1]} : vector<9x256xf32> to vector<1x256xf32>
    %629 = vector.broadcast %628 : vector<1x256xf32> to vector<8x256xf32>
    %630 = arith.mulf %627, %629 : vector<8x256xf32>
    %c241_i32_218 = arith.constant 241 : i32
    %631 = tpu.dynamic_rotate %610 by %c241_i32_218 dim 1 : vector<8x256xf32>, i32 -> vector<8x256xf32>
    %632 = vector.extract_strided_slice %0 {offsets = [6, 0], sizes = [1, 256], strides = [1, 1]} : vector<9x256xf32> to vector<1x256xf32>
    %633 = vector.broadcast %632 : vector<1x256xf32> to vector<8x256xf32>
    %634 = arith.mulf %631, %633 : vector<8x256xf32>
    %c240_i32_219 = arith.constant 240 : i32
    %635 = tpu.dynamic_rotate %610 by %c240_i32_219 dim 1 : vector<8x256xf32>, i32 -> vector<8x256xf32>
    %636 = vector.extract_strided_slice %0 {offsets = [7, 0], sizes = [1, 256], strides = [1, 1]} : vector<9x256xf32> to vector<1x256xf32>
    %637 = vector.broadcast %636 : vector<1x256xf32> to vector<8x256xf32>
    %638 = arith.mulf %635, %637 : vector<8x256xf32>
    %c239_i32_220 = arith.constant 239 : i32
    %639 = tpu.dynamic_rotate %610 by %c239_i32_220 dim 1 : vector<8x256xf32>, i32 -> vector<8x256xf32>
    %640 = vector.extract_strided_slice %0 {offsets = [8, 0], sizes = [1, 256], strides = [1, 1]} : vector<9x256xf32> to vector<1x256xf32>
    %641 = vector.broadcast %640 : vector<1x256xf32> to vector<8x256xf32>
    %642 = arith.mulf %639, %641 : vector<8x256xf32>
    %643 = tpu.concatenate %614, %618, %622, %626, %610, %630, %634, %638, %642 in 0 : vector<8x256xf32>, vector<8x256xf32>, vector<8x256xf32>, vector<8x256xf32>, vector<8x256xf32>, vector<8x256xf32>, vector<8x256xf32>, vector<8x256xf32>, vector<8x256xf32> -> vector<72x256xf32>
    %c208 = arith.constant 208 : index
    %c0_221 = arith.constant 0 : index
    %644 = vector.load %arg9[%c208, %c0_221] : memref<264x128xf32, #tpu.memory_space<vmem>>, vector<4x72xf32>
    %c208_222 = arith.constant 208 : index
    %c127_223 = arith.constant 127 : index
    %645 = vector.load %arg9[%c208_222, %c127_223] : memref<264x128xf32, #tpu.memory_space<vmem>>, vector<4x1xf32>
    %cst_224 = arith.constant dense<0.000000e+00> : vector<4x256xf32>
    %646 = tpu.matmul %644, %643, %cst_224 {dimension_numbers = #tpu.dot_dimension_numbers<[1], [0], [0], [1], [0, 0, 1, 1], [], []>} : vector<4x72xf32>, vector<72x256xf32>, vector<4x256xf32> -> vector<4x256xf32>
    %647 = vector.broadcast %645 : vector<4x1xf32> to vector<4x256xf32>
    %648 = arith.addf %646, %647 : vector<4x256xf32>
    %cst_225 = arith.constant 0.000000e+00 : f32
    %649 = vector.broadcast %cst_225 : f32 to vector<4x256xf32>
    %650 = arith.maximumf %648, %649 : vector<4x256xf32>
    %c17_i32_226 = arith.constant 17 : i32
    %651 = tpu.dynamic_rotate %650 by %c17_i32_226 dim 1 : vector<4x256xf32>, i32 -> vector<4x256xf32>
    %652 = vector.extract_strided_slice %0 {offsets = [0, 0], sizes = [1, 256], strides = [1, 1]} : vector<9x256xf32> to vector<1x256xf32>
    %653 = vector.broadcast %652 : vector<1x256xf32> to vector<4x256xf32>
    %654 = arith.mulf %651, %653 : vector<4x256xf32>
    %c16_i32_227 = arith.constant 16 : i32
    %655 = tpu.dynamic_rotate %650 by %c16_i32_227 dim 1 : vector<4x256xf32>, i32 -> vector<4x256xf32>
    %656 = vector.extract_strided_slice %0 {offsets = [1, 0], sizes = [1, 256], strides = [1, 1]} : vector<9x256xf32> to vector<1x256xf32>
    %657 = vector.broadcast %656 : vector<1x256xf32> to vector<4x256xf32>
    %658 = arith.mulf %655, %657 : vector<4x256xf32>
    %c15_i32_228 = arith.constant 15 : i32
    %659 = tpu.dynamic_rotate %650 by %c15_i32_228 dim 1 : vector<4x256xf32>, i32 -> vector<4x256xf32>
    %660 = vector.extract_strided_slice %0 {offsets = [2, 0], sizes = [1, 256], strides = [1, 1]} : vector<9x256xf32> to vector<1x256xf32>
    %661 = vector.broadcast %660 : vector<1x256xf32> to vector<4x256xf32>
    %662 = arith.mulf %659, %661 : vector<4x256xf32>
    %c1_i32_229 = arith.constant 1 : i32
    %663 = tpu.dynamic_rotate %650 by %c1_i32_229 dim 1 : vector<4x256xf32>, i32 -> vector<4x256xf32>
    %664 = vector.extract_strided_slice %0 {offsets = [3, 0], sizes = [1, 256], strides = [1, 1]} : vector<9x256xf32> to vector<1x256xf32>
    %665 = vector.broadcast %664 : vector<1x256xf32> to vector<4x256xf32>
    %666 = arith.mulf %663, %665 : vector<4x256xf32>
    %c255_i32_230 = arith.constant 255 : i32
    %667 = tpu.dynamic_rotate %650 by %c255_i32_230 dim 1 : vector<4x256xf32>, i32 -> vector<4x256xf32>
    %668 = vector.extract_strided_slice %0 {offsets = [5, 0], sizes = [1, 256], strides = [1, 1]} : vector<9x256xf32> to vector<1x256xf32>
    %669 = vector.broadcast %668 : vector<1x256xf32> to vector<4x256xf32>
    %670 = arith.mulf %667, %669 : vector<4x256xf32>
    %c241_i32_231 = arith.constant 241 : i32
    %671 = tpu.dynamic_rotate %650 by %c241_i32_231 dim 1 : vector<4x256xf32>, i32 -> vector<4x256xf32>
    %672 = vector.extract_strided_slice %0 {offsets = [6, 0], sizes = [1, 256], strides = [1, 1]} : vector<9x256xf32> to vector<1x256xf32>
    %673 = vector.broadcast %672 : vector<1x256xf32> to vector<4x256xf32>
    %674 = arith.mulf %671, %673 : vector<4x256xf32>
    %c240_i32_232 = arith.constant 240 : i32
    %675 = tpu.dynamic_rotate %650 by %c240_i32_232 dim 1 : vector<4x256xf32>, i32 -> vector<4x256xf32>
    %676 = vector.extract_strided_slice %0 {offsets = [7, 0], sizes = [1, 256], strides = [1, 1]} : vector<9x256xf32> to vector<1x256xf32>
    %677 = vector.broadcast %676 : vector<1x256xf32> to vector<4x256xf32>
    %678 = arith.mulf %675, %677 : vector<4x256xf32>
    %c239_i32_233 = arith.constant 239 : i32
    %679 = tpu.dynamic_rotate %650 by %c239_i32_233 dim 1 : vector<4x256xf32>, i32 -> vector<4x256xf32>
    %680 = vector.extract_strided_slice %0 {offsets = [8, 0], sizes = [1, 256], strides = [1, 1]} : vector<9x256xf32> to vector<1x256xf32>
    %681 = vector.broadcast %680 : vector<1x256xf32> to vector<4x256xf32>
    %682 = arith.mulf %679, %681 : vector<4x256xf32>
    %683 = tpu.concatenate %654, %658, %662, %666, %650, %670, %674, %678, %682 in 0 : vector<4x256xf32>, vector<4x256xf32>, vector<4x256xf32>, vector<4x256xf32>, vector<4x256xf32>, vector<4x256xf32>, vector<4x256xf32>, vector<4x256xf32>, vector<4x256xf32> -> vector<36x256xf32>
    %c216 = arith.constant 216 : index
    %c0_234 = arith.constant 0 : index
    %684 = vector.load %arg9[%c216, %c0_234] : memref<264x128xf32, #tpu.memory_space<vmem>>, vector<36x1xf32>
    %c216_235 = arith.constant 216 : index
    %c127_236 = arith.constant 127 : index
    %685 = vector.load %arg9[%c216_235, %c127_236] : memref<264x128xf32, #tpu.memory_space<vmem>>, vector<1x1xf32>
    %686 = vector.broadcast %684 : vector<36x1xf32> to vector<36x256xf32>
    %687 = arith.mulf %683, %686 : vector<36x256xf32>
    %cst_237 = arith.constant dense<0.000000e+00> : vector<256xf32>
    %688 = vector.multi_reduction <add>, %687, %cst_237 [0] : vector<36x256xf32> to vector<256xf32>
    %689 = vector.shape_cast %688 : vector<256xf32> to vector<1x256xf32>
    %690 = vector.broadcast %685 : vector<1x1xf32> to vector<1x256xf32>
    %691 = arith.addf %689, %690 : vector<1x256xf32>
    %692 = arith.addf %691, %4 : vector<1x256xf32>
    %693 = arith.addf %692, %6 : vector<1x256xf32>
    %694 = arith.addf %693, %8 : vector<1x256xf32>
    %c0_238 = arith.constant 0 : index
    %c0_239 = arith.constant 0 : index
    %c0_240 = arith.constant 0 : index
    %695 = vector.load %arg10[%c0_238, %c0_239, %c0_240] : memref<1x1x256xf32, #tpu.memory_space<vmem>>, vector<1x1x256xf32>
    %696 = vector.shape_cast %695 : vector<1x1x256xf32> to vector<1x256xf32>
    %697 = vector.shape_cast %694 : vector<1x256xf32> to vector<1x1x256xf32>
    tpu.vector_store %arg10[%c0_238, %c0_239, %c0_240], %697 {strides = array<i32>} : memref<1x1x256xf32, #tpu.memory_space<vmem>>, vector<1x1x256xf32>,
    return
  }
  func.func @transform_0(%arg0: i32) -> (i32, i32, i32) {
    %c0_i32 = arith.constant 0 : i32
    %c0_i32_0 = arith.constant 0 : i32
    %c0_i32_1 = arith.constant 0 : i32
    return %arg0, %c0_i32, %c0_i32_0 : i32, i32, i32
  }
  func.func @transform_1(%arg0: i32) -> (i32, i32, i32) {
    %c0_i32 = arith.constant 0 : i32
    %c0_i32_0 = arith.constant 0 : i32
    %c0_i32_1 = arith.constant 0 : i32
    return %arg0, %c0_i32, %c0_i32_0 : i32, i32, i32
  }
  func.func @transform_2(%arg0: i32) -> (i32, i32, i32) {
    %c0_i32 = arith.constant 0 : i32
    %c0_i32_0 = arith.constant 0 : i32
    %c0_i32_1 = arith.constant 0 : i32
    return %arg0, %c0_i32, %c0_i32_0 : i32, i32, i32
  }
  func.func @transform_3(%arg0: i32) -> (i32, i32, i32) {
    %c0_i32 = arith.constant 0 : i32
    %c0_i32_0 = arith.constant 0 : i32
    %c0_i32_1 = arith.constant 0 : i32
    return %arg0, %c0_i32, %c0_i32_0 : i32, i32, i32
  }
  func.func @transform_4(%arg0: i32) -> (i32, i32, i32) {
    %c0_i32 = arith.constant 0 : i32
    %c0_i32_0 = arith.constant 0 : i32
    %c0_i32_1 = arith.constant 0 : i32
    return %arg0, %c0_i32, %c0_i32_0 : i32, i32, i32
  }
  func.func @transform_5(%arg0: i32) -> (i32, i32, i32) {
    %c0_i32 = arith.constant 0 : i32
    %c0_i32_0 = arith.constant 0 : i32
    %c0_i32_1 = arith.constant 0 : i32
    return %arg0, %c0_i32, %c0_i32_0 : i32, i32, i32
  }
  func.func @transform_6(%arg0: i32) -> (i32, i32, i32) {
    %c0_i32 = arith.constant 0 : i32
    %c0_i32_0 = arith.constant 0 : i32
    %c0_i32_1 = arith.constant 0 : i32
    return %arg0, %c0_i32, %c0_i32_0 : i32, i32, i32
  }
  func.func @transform_7(%arg0: i32) -> (i32, i32) {
    %c0_i32 = arith.constant 0 : i32
    %c0_i32_0 = arith.constant 0 : i32
    %c0_i32_1 = arith.constant 0 : i32
    return %c0_i32, %c0_i32_0 : i32, i32
  }
  func.func @transform_8(%arg0: i32) -> (i32, i32) {
    %c0_i32 = arith.constant 0 : i32
    %c0_i32_0 = arith.constant 0 : i32
    %c0_i32_1 = arith.constant 0 : i32
    return %c0_i32, %c0_i32_0 : i32, i32
  }
  func.func @transform_9(%arg0: i32) -> (i32, i32, i32) {
    %c0_i32 = arith.constant 0 : i32
    %c0_i32_0 = arith.constant 0 : i32
    %c0_i32_1 = arith.constant 0 : i32
    return %arg0, %c0_i32, %c0_i32_0 : i32, i32, i32
  }
  func.func @transform_10(%arg0: i32) -> (i32, i32, i32) {
    %c0_i32 = arith.constant 0 : i32
    %c0_i32_0 = arith.constant 0 : i32
    %c0_i32_1 = arith.constant 0 : i32
    return %arg0, %c0_i32, %c0_i32_0 : i32, i32, i32
  }
}

</mosaic_0001>

<bundles_post_ra>
// kernel: module_2_3_forward.1
= control target key start
LH: loop header
LB: loop body
LE: loop exit
PB: predicated region body
PF: predicated region fallthrough
CT: control target
= control target key end

     0   :  { %s4336_s13 = smov 0   ;;  %s6253_s0 = inlined_call_operand.vmem [shape: f32[2,4,256], index: 0, kind: input, shape index: {}]   ;;  %s6254_s1 = inlined_call_operand.vmem [shape: f32[2,1,256], index: 1, kind: input, shape index: {}]   ;;  %s6255_s2 = inlined_call_operand.vmem [shape: f32[2,1,256], index: 2, kind: input, shape index: {}]   ;;  %s6256_s3 = inlined_call_operand.vmem [shape: f32[2,1,256], index: 3, kind: input, shape index: {}]   ;;  %s6257_s4 = inlined_call_operand.vmem [shape: f32[2,1,256], index: 4, kind: input, shape index: {}]   ;;  %s6258_s5 = inlined_call_operand.vmem [shape: f32[2,1,256], index: 5, kind: input, shape index: {}]   ;;  %s6259_s6 = inlined_call_operand.vmem [shape: f32[2,1,256], index: 6, kind: input, shape index: {}]   ;;  %s6260_s7 = inlined_call_operand.vmem [shape: f32[9,256], index: 7, kind: input, shape index: {}]   ;;  %s6261_s8 = inlined_call_operand.vmem [shape: f32[264,128], index: 8, kind: input, shape index: {}]   ;;  %s6262_s9 = inlined_call_operand.vmem [shape: f32[2,1,256], index: 9, kind: output, shape index: {0}]   ;;  %s6263_s10 = inlined_call_operand.vmem [shape: f32[2,1,256], index: 10, kind: output, shape index: {1}]  }
   0x1 LB: > { %s3970_s14 = sadd.s32 4294967295, %s4264_s13   ;;  %p3974_p0 = scmp.ge.s32.totalorder %s4264_s13, 1  ;;  %s4264_s13 = sphi %s4336_s13, %s21_s13  }
   0x2   : > { %p369_p1 = scmp.lt.s32.totalorder %s4264_s13, 3 }
   0x4   : > { %p370_p2 = pnand %p3974_p0, %p369_p1 }
   0x6   : > { %373 = sbr.rel (%p370_p2) target bundleno = 4939 (0x134b), region = 56 }
   0xd   : > { %p434_p3 = scmp.lt.s32.totalorder %s3970_s14, 1  ;;  %v6269_v0 = vmov 0.0   ;;  %v512_v1 = vld [vmem:[%s6261_s8] sm:$0xff]  ;;  %v6265_v2 = vmov 127   ;;  %v6264_v15 = vlaneseq  ;;  %vm523_vm0 = vcmask 1043456   ;;  %s4268_s11 = smov 16  }
   0xe   : > { %592 = vmatprep.mubr.f32.mxu0 %v6269_v0  ;;  %810 = vmatprep.mubr.f32.mxu1 %v6269_v0  ;;  %vm520_vm1 = vcmask 31744   ;;  %s4269_s12 = smov 17   ;;  %s4271_s15 = smov 1   ;;  %v4455_v36 = vld [vmem:[%s6261_s8 + $0x50] sm:$0xff]  ;;  %v4460_v37 = vld [vmem:[%s6261_s8 + $0x8] sm:$0xf] }
   0xf   : > { %s6333_s14 = smov (!%p434_p3, %s3970_s14), 1  ;;  %4194 = vset.pattern.permute.xlu0 %v6265_v2  ;;  %4195 = vset.pattern.permute.xlu1 %v6265_v2  ;;  %v4378_v16 = vshrl.u32 %v6264_v15, 7  ;;  %s4272_s16 = smov 127   ;;  %v4465_v40 = vand.u32 127, %v6264_v15  ;;  %v471_v43 = vld [vmem:[%s6260_s7] sm:$0xff]  ;;  %v472_v44 = vld [vmem:[%s6260_s7 + $0x8] sm:$0xff] }
  0x10   : > { %515 = vperm.xlu0 %4194, %v512_v1   ;;  %s4354_s17 = sshll.u32 %s6333_s14, 1  ;;  %s4036_s27 = sshll.u32 %s6333_s14, 3  ;;  %vm6274_vm10 = vcmask 588800   ;;  %vm1925_vm11 = vcmask 293888   ;;  %vm1204_vm12 = vcmask 1040384   ;;  %vm6275_vm13 = vcmask 1041408  }
  0x11   : > { %s4360_s20 = scalar_lea.vmem %s6254_s1, %s4354_s17  ;;  %s4366_s23 = scalar_lea.vmem %s6255_s2, %s4354_s17  ;;  %v4390_v22 = vsub.s32 0, %v4378_v16  ;;  %v4393_v23 = vsub.s32 1, %v4378_v16  ;;  %vm622_vm2 = vcmp.lt.s32.totalorder %v4465_v40, 16  ;;  %v661_v45 = vsub.s32 3, %v4378_v16 }
  0x12   : > { %s4372_s26 = scalar_lea.vmem %s6256_s3, %s4354_s17  ;;  %v476_v3 = vld [vmem:[%s4360_s20] sm:$0x3]  ;;  %s4398_s30 = scalar_lea.vmem %s6253_s0, %s4036_s27  ;;  %v644_v46 = vsub.s32 2, %v4378_v16  ;;  %v678_v51 = vsub.s32 5, %v4378_v16  ;;  %vm605_vm3 = vcmp.lt.s32.totalorder %v4465_v40, 17  ;;  %vm639_vm4 = vcmp.lt.s32.totalorder %v4465_v40, 15 }
  0x13   : > { %v477_v4 = vld [vmem:[%s4366_s23] sm:$0x3]  ;;  %v3985_v6 = vmul.f32 -1.442695, %v476_v3  ;;  %6296 = vst [vmem:[#allocation3_spill] sm:$0xff] %v4393_v23  ;;  %s4270_s14 = smov 15   ;;  %v4477_v47 = vrot.slane %v471_v43, %v4393_v23  ;;  %v4480_v48 = vrot.slane %v472_v44, %v4393_v23  ;;  %v4490_v54 = vrot.slane %v472_v44, %v661_v45  ;;  %s454_s22 = scalar_lea.vmem %s6257_s4, %s4354_s17 }
  0x14   : > { %v478_v5 = vld [vmem:[%s4372_s26] sm:$0x3]  ;;  %v3986_v7 = vmul.f32 -1.442695, %v477_v4  ;;  %s6293_s18 = smov 113   ;;  %s6291_s19 = smov 112   ;;  %v4493_v55 = vrot.slane %v472_v44, %v4390_v22  ;;  %v4496_v56 = vrot.slane %v471_v43, %v4390_v22  ;;  %v4499_v57 = vrot.slane %v472_v44, %v644_v46 }
  0x15   : > { %v3987_v8 = vmul.f32 -1.442695, %v478_v5  ;;  %4214 = vpow2.f32 %v3985_v6  ;;  %v475_v27 = vld [vmem:[%s4398_s30] sm:$0xff]  ;;  %s6289_s21 = smov 111   ;;  %vm656_vm5 = vcmp.lt.s32.totalorder %v4465_v40, 1  ;;  %vm673_vm6 = vcmp.lt.s32.totalorder %v4465_v40, 127  ;;  %s458_s27 = scalar_lea.vmem %s6258_s5, %s4354_s17 }
  0x16   : > { %4216 = vpow2.f32 %v3986_v7  ;;  %v4501_v59 = vrot.slane %v471_v43, %v661_v45  ;;  %v4503_v61 = vrot.slane %v472_v44, %v678_v51  ;;  %vm690_vm7 = vcmp.lt.s32.totalorder %v4465_v40, 113  ;;  %s466_s28 = scalar_lea.vmem %s6262_s9, %s4354_s17 }
  0x17   : > { %4218 = vpow2.f32 %v3987_v8  ;;  %vm707_vm8 = vcmp.lt.s32.totalorder %v4465_v40, 112  ;;  %vm724_vm9 = vcmp.lt.s32.totalorder %v4465_v40, 111  ;;  %vm1210_vm14 = vcmask 1042432  }
  0x18   : > { %vm1215_vm15 = vcmask 1044480  }
  0x1f   : > { %v4215_v9 = vpop.eup %4214 }
  0x20   : > { %v4217_v10 = vpop.eup %4216  ;;  %v482_v11 = vadd.f32 1.0, %v4215_v9 }
  0x21   : > { %v4219_v12 = vpop.eup %4218  ;;  %v488_v13 = vadd.f32 1.0, %v4217_v10  ;;  %v4520_v10 = vrot.slane %v471_v43, %v644_v46 }
  0x22   : > { %4220 = vrcp.f32 %v482_v11  ;;  %v494_v14 = vadd.f32 1.0, %v4219_v12 }
  0x23   : > { %4222 = vrcp.f32 %v488_v13 }
  0x24   : > { %4224 = vrcp.f32 %v494_v14 }
  0x2c   : > { %v4380_v17 = vpop.eup %4220 }
  0x2d   : > { %v4382_v18 = vpop.eup %4222  ;;  %v497_v19 = vadd.f32 1.0, %v4380_v17 }
  0x2e   : > { %v4385_v20 = vpop.eup %4224 }
  0x2f   : > { %6295 = vst [vmem:[#allocation2_spill] sm:$0xff] %v4385_v20  ;;  %v498_v21 = vadd.f32 %v4382_v18, %v497_v19 }
  0x31   : > { %v499_v24 = vadd.f32 %v4385_v20, %v498_v21 }
  0x33   : > { %v504_v25 = vrot.slane %v499_v24, %v4390_v22  ;;  %v508_v26 = vrot.slane %v499_v24, %v4393_v23 }
  0x35   : > { %v509_v28 = vcombine.low %v504_v25, %v508_v26  ;;  %v4526_v25 = vrot.slane %v471_v43, %v678_v51 }
  0x37   : > { %v4404_v29 = vmul.f32 %v509_v28, %v475_v27  ;;  %v695_v27 = vsub.s32 6, %v4378_v16 }
  0x39   : > { %v4408_v30 = vcombine.high %v4404_v29, %v4404_v29  ;;  %v4539_v45 = vrot.slane %v471_v43, %v695_v27 }
  0x3b   : > { %3988 = vmatprep.subr.msk.mxu0 %vm523_vm0, %v4408_v30 }
  0x3c   : > { %3989 = vmatpush1.msk.msra.mxu0 %vm523_vm0, %v4404_v29 }
  0x3d   : > { %3990 = vmatmul.mubr.msk.f32.vlgmr.msra.gmra.mrb[0].mxu0 %vm520_vm1, %v512_v1 }
  0x3e   : > { %895 = vmatprep.mubr.f32.mxu0 %v6269_v0 }
  0x8f   : > { %v516_v31 = vpop.permute.xlu0 %515 }
 0x110   : > { %v594_v32 = vpop.f32.mrb[0].mxu0 }
 0x111   : > { %v4416_v33 = vadd.f32 %v594_v32, %v516_v31  ;;  %v596_v34 = vpop.f32.mrb[1].mxu0 }
 0x112   : > { %v4422_v35 = vadd.f32 %v596_v34, %v516_v31  ;;  %v712_v34 = vsub.s32 7, %v4378_v16 }
 0x113   : > { %618 = vrot.lane.b32.xlu1 %v4416_v33, %s4268_s11  ;;  %599 = vrot.lane.b32.xlu0 %v4416_v33, %s4269_s12 }
 0x114   : > { %v4544_v51 = vrot.slane %v471_v43, %v712_v34 }
 0x117   : > { %635 = vrot.lane.b32.xlu1 %v4416_v33, %s4270_s14  ;;  %620 = vrot.lane.b32.xlu0 %v4422_v35, %s4268_s11 }
 0x11b   : > { %652 = vrot.lane.b32.xlu1 %v4416_v33, %s4271_s15  ;;  %637 = vrot.lane.b32.xlu0 %v4422_v35, %s4270_s14 }
 0x11f   : > { %601 = vrot.lane.b32.xlu1 %v4422_v35, %s4269_s12  ;;  %654 = vrot.lane.b32.xlu0 %v4422_v35, %s4271_s15 }
 0x123   : > { %669 = vrot.lane.b32.xlu1 %v4416_v33, %s4272_s16  ;;  %671 = vrot.lane.b32.xlu0 %v4422_v35, %s4272_s16 }
 0x127   : > { %686 = vrot.lane.b32.xlu1 %v4416_v33, %s6293_s18  ;;  %688 = vrot.lane.b32.xlu0 %v4422_v35, %s6293_s18 }
 0x12b   : > { %703 = vrot.lane.b32.xlu1 %v4416_v33, %s6291_s19  ;;  %705 = vrot.lane.b32.xlu0 %v4422_v35, %s6291_s19 }
 0x12f   : > { %720 = vrot.lane.b32.xlu1 %v4416_v33, %s6289_s21  ;;  %722 = vrot.lane.b32.xlu0 %v4422_v35, %s6289_s21 }
 0x133   : > { %1289 = vperm.xlu0 %4194, %v4455_v36   ;;  %740 = vperm.xlu1 %4195, %v4460_v37  }
 0x185   : > { %v619_v38 = vpop.permute.xlu1 %618  ;;  %v600_v39 = vpop.permute.xlu0 %599 }
 0x189   : > { %v636_v41 = vpop.permute.xlu1 %635  ;;  %v621_v42 = vpop.permute.xlu0 %620 }
 0x18a   : > { %v624_v52 = vsel %vm622_vm2, %v621_v42, %v619_v38  ;;  %v623_v53 = vsel %vm622_vm2, %v619_v38, %v621_v42 }
 0x18b   : > { %v634_v62 = vmul.f32 %v4480_v48, %v623_v53  ;;  %v633_v63 = vmul.f32 %v4477_v47, %v624_v52  ;;  %v4546_v52 = vrot.slane %v472_v44, %v712_v34  ;;  %v4551_v53 = vld [vmem:[%s6260_s7 + $0x18] ss:$0 sm:$0xff] }
 0x18d   : > { %v653_v49 = vpop.permute.xlu1 %652  ;;  %v638_v50 = vpop.permute.xlu0 %637 }
 0x18e   : > { %v640_v1 = vsel %vm639_vm4, %v636_v41, %v638_v50  ;;  %v641_v11 = vsel %vm639_vm4, %v638_v50, %v636_v41 }
 0x18f   : > { %v651_v12 = vmul.f32 %v4499_v57, %v640_v1  ;;  %v650_v38 = vmul.f32 %v4520_v10, %v641_v11 }
 0x191   : > { %v602_v58 = vpop.permute.xlu1 %601  ;;  %v655_v60 = vpop.permute.xlu0 %654 }
 0x192   : > { %v607_v3 = vsel %vm605_vm3, %v602_v58, %v600_v39  ;;  %v657_v4 = vsel %vm656_vm5, %v653_v49, %v655_v60  ;;  %v606_v5 = vsel %vm605_vm3, %v600_v39, %v602_v58  ;;  %v658_v6 = vsel %vm656_vm5, %v655_v60, %v653_v49 }
 0x193   : > { %v668_v7 = vmul.f32 %v4490_v54, %v657_v4  ;;  %v617_v8 = vmul.f32 %v4493_v55, %v606_v5  ;;  %v616_v9 = vmul.f32 %v4496_v56, %v607_v3  ;;  %v667_v24 = vmul.f32 %v4501_v59, %v658_v6  ;;  %v4570_v6 = vld [vmem:[%s6260_s7 + $0x10] ss:$0 sm:$0xff] }
 0x194   : > { %v4541_v49 = vrot.slane %v472_v44, %v695_v27 }
 0x195   : > { %v670_v13 = vpop.permute.xlu1 %669  ;;  %v672_v14 = vpop.permute.xlu0 %671  ;;  %v4037_v19 = vpack.c.bf16 %v634_v62, %v617_v8  ;;  %v4039_v21 = vpack.c.bf16 %v633_v63, %v616_v9  ;;  %v4041_v32 = vpack.c.bf16 %v668_v7, %v651_v12  ;;  %v4043_v46 = vpack.c.bf16 %v667_v24, %v650_v38 }
 0x196   : > { %v675_v26 = vsel %vm673_vm6, %v672_v14, %v670_v13  ;;  %v674_v28 = vsel %vm673_vm6, %v670_v13, %v672_v14 }
 0x197   : > { %v685_v31 = vmul.f32 %v4503_v61, %v675_v26  ;;  %4038 = vmatprep.subr.bf16.mxu1 %v4037_v19  ;;  %v684_v42 = vmul.f32 %v4526_v25, %v674_v28  ;;  %v4584_v28 = vld [vmem:[%s6261_s8 + $0x10] sm:$0xf] }
 0x198   : > { %4040 = vmatpush1.bf16.msra.mxu1 %v4039_v21 }
 0x199   : > { %v687_v39 = vpop.permute.xlu1 %686  ;;  %4042 = vmatprep.subr.bf16.mxu1 %v4041_v32  ;;  %v689_v41 = vpop.permute.xlu0 %688  ;;  %v4045_v50 = vpack.c.bf16 %v685_v31, %v4422_v35  ;;  %v4047_v63 = vpack.c.bf16 %v684_v42, %v4416_v33  ;;  %v4646_v42 = vld [vmem:[%s6261_s8 + $0x60] sm:$0xf] }
 0x19a   : > { %v691_v58 = vsel %vm690_vm7, %v687_v39, %v689_v41  ;;  %v692_v60 = vsel %vm690_vm7, %v689_v41, %v687_v39 }
 0x19b   : > { %v701_v1 = vmul.f32 %v4539_v45, %v691_v58  ;;  %v702_v3 = vmul.f32 %v4541_v49, %v692_v60 }
 0x19c   : > { %4044 = vmatpush1.bf16.msra.mxu1 %v4043_v46  ;;  %v4653_v46 = vld [vmem:[%s6261_s8 + $0x68] sm:$0xff] }
 0x19d   : > { %v704_v62 = vpop.permute.xlu1 %703  ;;  %4046 = vmatprep.subr.bf16.mxu1 %v4045_v50  ;;  %v706_v35 = vpop.permute.xlu0 %705 }
 0x19e   : > { %v708_v43 = vsel %vm707_vm8, %v704_v62, %v706_v35  ;;  %v709_v44 = vsel %vm707_vm8, %v706_v35, %v704_v62 }
 0x19f   : > { %v718_v4 = vmul.f32 %v4544_v51, %v708_v43  ;;  %v719_v5 = vmul.f32 %v4546_v52, %v709_v44 }
 0x1a0   : > { %4048 = vmatpush1.bf16.msra.mxu1 %v4047_v63 }
 0x1a1   : > { %v721_v7 = vpop.permute.xlu1 %720  ;;  %v723_v8 = vpop.permute.xlu0 %722  ;;  %v4049_v9 = vpack.c.bf16 %v719_v5, %v702_v3  ;;  %v4051_v11 = vpack.c.bf16 %v718_v4, %v701_v1 }
 0x1a2   : > { %v726_v33 = vsel %vm724_vm9, %v723_v8, %v721_v7  ;;  %v725_v12 = vsel %vm724_vm9, %v721_v7, %v723_v8 }
 0x1a3   : > { %4050 = vmatprep.subr.bf16.mxu1 %v4049_v9  ;;  %v736_v13 = vmul.f32 %v4551_v53, %v726_v33  ;;  %v735_v14 = vmul.f32 %v4570_v6, %v725_v12 }
 0x1a4   : > { %4052 = vmatpush1.bf16.msra.mxu1 %v4051_v11 }
 0x1a5   : > { %762 = vmatprep.subr.mxu1 %v736_v13 }
 0x1a8   : > { %763 = vmatpush1.msra.mxu1 %v735_v14 }
 0x1a9   : > { %3991 = vmatmul.mubr.msk.f32.vlgmr.msra.gmra.mrb[0].mxu1 %vm6274_vm10, %v4460_v37 }
 0x1aa   : > { %1673 = vmatprep.mubr.f32.mxu1 %v6269_v0 }
 0x1b2   : > { %v741_v19 = vpop.permute.xlu1 %740  ;;  %v1290_v32 = vpop.permute.xlu0 %1289 }
 0x27c   : > { %v812_v21 = vpop.f32.mrb[0].mxu1 }
 0x27d   : > { %v814_v24 = vpop.f32.mrb[1].mxu1  ;;  %v813_v27 = vadd.f32 %v812_v21, %v741_v19 }
 0x27e   : > { %v815_v26 = vadd.f32 %v814_v24, %v741_v19 }
 0x280   : > { %3992 = vmatprep.subr.msk.mxu0 %vm523_vm0, %v815_v26 }
 0x281   : > { %3993 = vmatpush1.msk.msra.mxu0 %vm523_vm0, %v813_v27 }
 0x282   : > { %3994 = vmatmul.mubr.msk.f32.vlgmr.msra.gmra.mrb[2].mxu0 %vm520_vm1, %v4584_v28  ;;  %3997 = vmatprep.subr.msk.mxu0 %vm523_vm0, %v4408_v30 }
 0x283   : > { %3998 = vmatpush1.msk.msra.mxu0 %vm523_vm0, %v4404_v29  ;;  %1358 = vmatprep.mubr.f32.mxu0 %v6269_v0 }
 0x286   : > { %3999 = vmatmul.mubr.msk.f32.vlgmr.msra.gmra.mrb[4].mxu0 %vm520_vm1, %v4455_v36  ;;  %v4641_v36 = vld [vmem:[%s6261_s8 + $0x58] sm:$0xf] }
 0x287   : > { %1501 = vmatprep.mubr.f32.mxu0 %v6269_v0 }
 0x355   : > { %v4598_v37 = vpop.f32.mrb[2].mxu0 }
 0x356   : > { %v4600_v31 = vpop.f32.mrb[3].mxu0 }
 0x359   : > { %v1360_v34 = vpop.f32.mrb[4].mxu0 }
 0x35a   : > { %v4602_v38 = vadd.f32 %v1360_v34, %v1290_v32  ;;  %v1362_v39 = vpop.f32.mrb[5].mxu0 }
 0x35b   : > { %v4604_v41 = vadd.f32 %v1362_v39, %v1290_v32 }
 0x35c   : > { %1365 = vrot.lane.b32.xlu1 %v4602_v38, %s4269_s12 }
 0x35d   : > { %1367 = vrot.lane.b32.xlu0 %v4604_v41, %s4269_s12 }
 0x360   : > { %1373 = vrot.lane.b32.xlu1 %v4602_v38, %s4268_s11 }
 0x361   : > { %1375 = vrot.lane.b32.xlu0 %v4604_v41, %s4268_s11 }
 0x364   : > { %1381 = vrot.lane.b32.xlu1 %v4602_v38, %s4270_s14 }
 0x365   : > { %1383 = vrot.lane.b32.xlu0 %v4604_v41, %s4270_s14 }
 0x368   : > { %1389 = vrot.lane.b32.xlu1 %v4602_v38, %s4271_s15 }
 0x369   : > { %1391 = vrot.lane.b32.xlu0 %v4604_v41, %s4271_s15 }
 0x36c   : > { %1397 = vrot.lane.b32.xlu1 %v4602_v38, %s4272_s16 }
 0x36d   : > { %1399 = vrot.lane.b32.xlu0 %v4604_v41, %s4272_s16 }
 0x370   : > { %1405 = vrot.lane.b32.xlu1 %v4602_v38, %s6293_s18 }
 0x371   : > { %1407 = vrot.lane.b32.xlu0 %v4604_v41, %s6293_s18 }
 0x374   : > { %1413 = vrot.lane.b32.xlu1 %v4602_v38, %s6291_s19 }
 0x375   : > { %1415 = vrot.lane.b32.xlu0 %v4604_v41, %s6291_s19 }
 0x378   : > { %1421 = vrot.lane.b32.xlu1 %v4602_v38, %s6289_s21 }
 0x379   : > { %1423 = vrot.lane.b32.xlu0 %v4604_v41, %s6289_s21 }
 0x37c   : > { %1432 = vperm.xlu1 %4195, %v4641_v36  }
 0x37d   : > { %1511 = vperm.xlu0 %4194, %v4646_v42  }
 0x380   : > { %1598 = vperm.xlu1 %4195, %v4653_v46  }
 0x3ce   : > { %v1366_v50 = vpop.permute.xlu1 %1365 }
 0x3cf   : > { %v1368_v58 = vpop.permute.xlu0 %1367 }
 0x3d0   : > { %v1369_v60 = vsel %vm605_vm3, %v1366_v50, %v1368_v58  ;;  %v1370_v62 = vsel %vm605_vm3, %v1368_v58, %v1366_v50 }
 0x3d1   : > { %v1371_v1 = vmul.f32 %v1370_v62, %v4496_v56  ;;  %v1372_v3 = vmul.f32 %v1369_v60, %v4493_v55 }
 0x3d2   : > { %v1374_v35 = vpop.permute.xlu1 %1373 }
 0x3d3   : > { %v1376_v43 = vpop.permute.xlu0 %1375 }
 0x3d4   : > { %v1377_v44 = vsel %vm622_vm2, %v1374_v35, %v1376_v43  ;;  %v1378_v63 = vsel %vm622_vm2, %v1376_v43, %v1374_v35 }
 0x3d5   : > { %v1379_v4 = vmul.f32 %v1378_v63, %v4477_v47  ;;  %v1380_v5 = vmul.f32 %v1377_v44, %v4480_v48 }
 0x3d6   : > { %v1382_v7 = vpop.permute.xlu1 %1381 }
 0x3d7   : > { %v4055_v8 = vpack.c.bf16 %v1379_v4, %v1371_v1  ;;  %v1384_v9 = vpop.permute.xlu0 %1383  ;;  %v4053_v11 = vpack.c.bf16 %v1380_v5, %v1372_v3 }
 0x3d8   : > { %v1385_v33 = vsel %vm639_vm4, %v1382_v7, %v1384_v9  ;;  %v1386_v12 = vsel %vm639_vm4, %v1384_v9, %v1382_v7 }
 0x3d9   : > { %4054 = vmatprep.subr.bf16.mxu0 %v4053_v11  ;;  %v1387_v24 = vmul.f32 %v1386_v12, %v4520_v10  ;;  %v1388_v26 = vmul.f32 %v1385_v33, %v4499_v57 }
 0x3da   : > { %4056 = vmatpush1.bf16.msra.mxu0 %v4055_v8  ;;  %v1390_v13 = vpop.permute.xlu1 %1389 }
 0x3db   : > { %v1392_v14 = vpop.permute.xlu0 %1391 }
 0x3dc   : > { %v1393_v19 = vsel %vm656_vm5, %v1390_v13, %v1392_v14  ;;  %v1394_v21 = vsel %vm656_vm5, %v1392_v14, %v1390_v13 }
 0x3dd   : > { %v1395_v27 = vmul.f32 %v1394_v21, %v4501_v59  ;;  %v1396_v32 = vmul.f32 %v1393_v19, %v4490_v54 }
 0x3de   : > { %v1398_v34 = vpop.permute.xlu1 %1397 }
 0x3df   : > { %v4059_v39 = vpack.c.bf16 %v1395_v27, %v1387_v24  ;;  %v1400_v50 = vpop.permute.xlu0 %1399  ;;  %v4057_v58 = vpack.c.bf16 %v1396_v32, %v1388_v26 }
 0x3e0   : > { %v1401_v60 = vsel %vm673_vm6, %v1398_v34, %v1400_v50  ;;  %v1402_v62 = vsel %vm673_vm6, %v1400_v50, %v1398_v34 }
 0x3e1   : > { %v1403_v35 = vmul.f32 %v1401_v60, %v4526_v25  ;;  %v1404_v43 = vmul.f32 %v1402_v62, %v4503_v61  ;;  %4058 = vmatprep.subr.bf16.mxu0 %v4057_v58 }
 0x3e2   : > { %4060 = vmatpush1.bf16.msra.mxu0 %v4059_v39  ;;  %v1406_v44 = vpop.permute.xlu1 %1405 }
 0x3e3   : > { %v4063_v63 = vpack.c.bf16 %v1403_v35, %v4602_v38  ;;  %v1408_v1 = vpop.permute.xlu0 %1407  ;;  %v4061_v3 = vpack.c.bf16 %v1404_v43, %v4604_v41 }
 0x3e4   : > { %v1409_v4 = vsel %vm690_vm7, %v1406_v44, %v1408_v1  ;;  %v1410_v5 = vsel %vm690_vm7, %v1408_v1, %v1406_v44 }
 0x3e5   : > { %4062 = vmatprep.subr.bf16.mxu0 %v4061_v3  ;;  %v1411_v38 = vmul.f32 %v1409_v4, %v4539_v45  ;;  %v1412_v41 = vmul.f32 %v1410_v5, %v4541_v49 }
 0x3e6   : > { %4064 = vmatpush1.bf16.msra.mxu0 %v4063_v63  ;;  %v1414_v7 = vpop.permute.xlu1 %1413 }
 0x3e7   : > { %v1416_v8 = vpop.permute.xlu0 %1415 }
 0x3e8   : > { %v1417_v9 = vsel %vm707_vm8, %v1414_v7, %v1416_v8  ;;  %v1418_v11 = vsel %vm707_vm8, %v1416_v8, %v1414_v7 }
 0x3e9   : > { %v1419_v33 = vmul.f32 %v1417_v9, %v4544_v51  ;;  %v1420_v12 = vmul.f32 %v1418_v11, %v4546_v52 }
 0x3ea   : > { %v1422_v13 = vpop.permute.xlu1 %1421 }
 0x3eb   : > { %v4067_v14 = vpack.c.bf16 %v1419_v33, %v1411_v38  ;;  %v1424_v19 = vpop.permute.xlu0 %1423  ;;  %v4065_v21 = vpack.c.bf16 %v1420_v12, %v1412_v41 }
 0x3ec   : > { %v1426_v24 = vsel %vm724_vm9, %v1424_v19, %v1422_v13  ;;  %v1425_v26 = vsel %vm724_vm9, %v1422_v13, %v1424_v19 }
 0x3ed   : > { %4066 = vmatprep.subr.bf16.mxu0 %v4065_v21  ;;  %v1428_v27 = vmul.f32 %v4551_v53, %v1426_v24  ;;  %v1427_v32 = vmul.f32 %v4570_v6, %v1425_v26 }
 0x3ee   : > { %4068 = vmatpush1.bf16.msra.mxu0 %v4067_v14 }
 0x3ef   : > { %1453 = vmatprep.subr.mxu0 %v1428_v27 }
 0x3f2   : > { %1454 = vmatpush1.msra.mxu0 %v1427_v32 }
 0x3f3   : > { %4000 = vmatmul.mubr.msk.f32.vlgmr.msra.gmra.mrb[6].mxu0 %vm6274_vm10, %v4641_v36 }
 0x3f4   : > { %1586 = vmatprep.mubr.f32.mxu0 %v6269_v0 }
 0x3fb   : > { %v1433_v39 = vpop.permute.xlu1 %1432 }
 0x3fc   : > { %v1512_v62 = vpop.permute.xlu0 %1511 }
 0x3ff   : > { %v1599_v3 = vpop.permute.xlu1 %1598 }
 0x4c6   : > { %v1503_v34 = vpop.f32.mrb[6].mxu0 }
 0x4c7   : > { %v1505_v50 = vpop.f32.mrb[7].mxu0  ;;  %v1504_v60 = vadd.f32 %v1503_v34, %v1433_v39 }
 0x4c8   : > { %v1506_v58 = vadd.f32 %v1505_v50, %v1433_v39 }
 0x4ca   : > { %4001 = vmatprep.subr.msk.mxu0 %vm523_vm0, %v1506_v58 }
 0x4cb   : > { %4002 = vmatpush1.msk.msra.mxu0 %vm523_vm0, %v1504_v60 }
 0x4cc   : > { %4003 = vmatmul.mubr.msk.f32.vlgmr.msra.gmra.mrb[8].mxu0 %vm520_vm1, %v4646_v42 }
 0x4cd   : > { %1998 = vmatprep.mubr.f32.mxu0 %v6269_v0 }
 0x59f   : > { %v1588_v35 = vpop.f32.mrb[8].mxu0 }
 0x5a0   : > { %v1589_v43 = vadd.f32 %v1588_v35, %v1512_v62  ;;  %v1590_v36 = vpop.f32.mrb[9].mxu0 }
 0x5a1   : > { %v1591_v44 = vadd.f32 %v1590_v36, %v1512_v62 }
 0x5a2   : > { %v1593_v1 = vmax.f32 %v1589_v43, 0.0 }
 0x5a3   : > { %v1594_v63 = vmax.f32 %v1591_v44, 0.0 }
 0x5a5   : > { %4004 = vmatprep.subr.msk.mxu1 %vm523_vm0, %v1594_v63 }
 0x5a6   : > { %4005 = vmatpush1.msk.msra.mxu1 %vm523_vm0, %v1593_v1 }
 0x5a7   : > { %4006 = vmatmul.mubr.msk.f32.vlgmr.msra.gmra.mrb[2].mxu1 %vm520_vm1, %v4653_v46  ;;  %v4748_v46 = vld [vmem:[%s6261_s8 + $0x70] sm:$0xf] }
 0x5a8   : > { %1816 = vmatprep.mubr.f32.mxu1 %v6269_v0 }
 0x67a   : > { %v1675_v42 = vpop.f32.mrb[2].mxu1 }
 0x67b   : > { %v4719_v4 = vadd.f32 %v1675_v42, %v1599_v3  ;;  %v1677_v5 = vpop.f32.mrb[3].mxu1 }
 0x67c   : > { %v1678_v7 = vadd.f32 %v1677_v5, %v1599_v3 }
 0x67d   : > { %1680 = vrot.lane.b32.xlu0 %v4719_v4, %s4269_s12 }
 0x67e   : > { %1682 = vrot.lane.b32.xlu1 %v1678_v7, %s4269_s12 }
 0x681   : > { %1688 = vrot.lane.b32.xlu0 %v4719_v4, %s4268_s11 }
 0x682   : > { %1690 = vrot.lane.b32.xlu1 %v1678_v7, %s4268_s11 }
 0x685   : > { %1696 = vrot.lane.b32.xlu0 %v4719_v4, %s4270_s14 }
 0x686   : > { %1698 = vrot.lane.b32.xlu1 %v1678_v7, %s4270_s14 }
 0x689   : > { %1704 = vrot.lane.b32.xlu0 %v4719_v4, %s4271_s15 }
 0x68a   : > { %1706 = vrot.lane.b32.xlu1 %v1678_v7, %s4271_s15 }
 0x68d   : > { %1712 = vrot.lane.b32.xlu0 %v4719_v4, %s4272_s16 }
 0x68e   : > { %1714 = vrot.lane.b32.xlu1 %v1678_v7, %s4272_s16 }
 0x691   : > { %1720 = vrot.lane.b32.xlu0 %v4719_v4, %s6293_s18 }
 0x692   : > { %1722 = vrot.lane.b32.xlu1 %v1678_v7, %s6293_s18 }
 0x695   : > { %1728 = vrot.lane.b32.xlu0 %v4719_v4, %s6291_s19 }
 0x696   : > { %1730 = vrot.lane.b32.xlu1 %v1678_v7, %s6291_s19 }
 0x699   : > { %1736 = vrot.lane.b32.xlu0 %v4719_v4, %s6289_s21 }
 0x69a   : > { %1738 = vrot.lane.b32.xlu1 %v1678_v7, %s6289_s21 }
 0x69d   : > { %1747 = vperm.xlu0 %4194, %v4748_v46  }
 0x6ef   : > { %v1681_v8 = vpop.permute.xlu0 %1680 }
 0x6f0   : > { %v1683_v9 = vpop.permute.xlu1 %1682 }
 0x6f1   : > { %v1684_v11 = vsel %vm605_vm3, %v1681_v8, %v1683_v9  ;;  %v1685_v38 = vsel %vm605_vm3, %v1683_v9, %v1681_v8 }
 0x6f2   : > { %v1686_v14 = vmul.f32 %v1685_v38, %v4496_v56  ;;  %v1687_v19 = vmul.f32 %v1684_v11, %v4493_v55 }
 0x6f3   : > { %v1689_v41 = vpop.permute.xlu0 %1688 }
 0x6f4   : > { %v1691_v33 = vpop.permute.xlu1 %1690 }
 0x6f5   : > { %v1692_v12 = vsel %vm622_vm2, %v1689_v41, %v1691_v33  ;;  %v1693_v13 = vsel %vm622_vm2, %v1691_v33, %v1689_v41 }
 0x6f6   : > { %v1694_v21 = vmul.f32 %v1693_v13, %v4477_v47  ;;  %v1695_v24 = vmul.f32 %v1692_v12, %v4480_v48 }
 0x6f7   : > { %v1697_v26 = vpop.permute.xlu0 %1696 }
 0x6f8   : > { %v4071_v27 = vpack.c.bf16 %v1694_v21, %v1686_v14  ;;  %v1699_v32 = vpop.permute.xlu1 %1698  ;;  %v4069_v34 = vpack.c.bf16 %v1695_v24, %v1687_v19 }
 0x6f9   : > { %v1700_v39 = vsel %vm639_vm4, %v1697_v26, %v1699_v32  ;;  %v1701_v50 = vsel %vm639_vm4, %v1699_v32, %v1697_v26 }
 0x6fa   : > { %4070 = vmatprep.subr.bf16.mxu1 %v4069_v34  ;;  %v1702_v43 = vmul.f32 %v1701_v50, %v4520_v10  ;;  %v1703_v36 = vmul.f32 %v1700_v39, %v4499_v57 }
 0x6fb   : > { %4072 = vmatpush1.bf16.msra.mxu1 %v4071_v27  ;;  %v1705_v58 = vpop.permute.xlu0 %1704 }
 0x6fc   : > { %v1707_v60 = vpop.permute.xlu1 %1706 }
 0x6fd   : > { %v1708_v62 = vsel %vm656_vm5, %v1705_v58, %v1707_v60  ;;  %v1709_v35 = vsel %vm656_vm5, %v1707_v60, %v1705_v58 }
 0x6fe   : > { %v1710_v44 = vmul.f32 %v1709_v35, %v4501_v59  ;;  %v1711_v63 = vmul.f32 %v1708_v62, %v4490_v54 }
 0x6ff   : > { %v1713_v1 = vpop.permute.xlu0 %1712 }
 0x700   : > { %v4075_v3 = vpack.c.bf16 %v1710_v44, %v1702_v43  ;;  %v1715_v42 = vpop.permute.xlu1 %1714  ;;  %v4073_v5 = vpack.c.bf16 %v1711_v63, %v1703_v36 }
 0x701   : > { %v1716_v8 = vsel %vm673_vm6, %v1713_v1, %v1715_v42  ;;  %v1717_v9 = vsel %vm673_vm6, %v1715_v42, %v1713_v1 }
 0x702   : > { %v1718_v11 = vmul.f32 %v1716_v8, %v4526_v25  ;;  %v1719_v38 = vmul.f32 %v1717_v9, %v4503_v61  ;;  %4074 = vmatprep.subr.bf16.mxu1 %v4073_v5  ;;  %v1000_v5 = vld [vmem:[%s6261_s8 + $0x18] sm:$0xff]  ;;  %v1001_v8 = vld [vmem:[%s6261_s8 + $0x20] sm:$0xff] }
 0x703   : > { %4076 = vmatpush1.bf16.msra.mxu1 %v4075_v3  ;;  %v1721_v41 = vpop.permute.xlu0 %1720 }
 0x704   : > { %v4079_v33 = vpack.c.bf16 %v1718_v11, %v4719_v4  ;;  %v1723_v12 = vpop.permute.xlu1 %1722  ;;  %v4077_v13 = vpack.c.bf16 %v1719_v38, %v1678_v7 }
 0x705   : > { %v1724_v14 = vsel %vm690_vm7, %v1721_v41, %v1723_v12  ;;  %v1725_v19 = vsel %vm690_vm7, %v1723_v12, %v1721_v41 }
 0x706   : > { %4078 = vmatprep.subr.bf16.mxu1 %v4077_v13  ;;  %v1726_v4 = vmul.f32 %v1724_v14, %v4539_v45  ;;  %v1727_v7 = vmul.f32 %v1725_v19, %v4541_v49 }
 0x707   : > { %4080 = vmatpush1.bf16.msra.mxu1 %v4079_v33  ;;  %v1729_v21 = vpop.permute.xlu0 %1728 }
 0x708   : > { %v1731_v24 = vpop.permute.xlu1 %1730 }
 0x709   : > { %v1732_v26 = vsel %vm707_vm8, %v1729_v21, %v1731_v24  ;;  %v1733_v27 = vsel %vm707_vm8, %v1731_v24, %v1729_v21 }
 0x70a   : > { %v1734_v32 = vmul.f32 %v1732_v26, %v4544_v51  ;;  %v1735_v34 = vmul.f32 %v1733_v27, %v4546_v52 }
 0x70b   : > { %v1737_v39 = vpop.permute.xlu0 %1736 }
 0x70c   : > { %v4083_v50 = vpack.c.bf16 %v1734_v32, %v1726_v4  ;;  %v1739_v58 = vpop.permute.xlu1 %1738  ;;  %v4081_v60 = vpack.c.bf16 %v1735_v34, %v1727_v7 }
 0x70d   : > { %v1741_v62 = vsel %vm724_vm9, %v1739_v58, %v1737_v39  ;;  %v1740_v35 = vsel %vm724_vm9, %v1737_v39, %v1739_v58 }
 0x70e   : > { %4082 = vmatprep.subr.bf16.mxu1 %v4081_v60  ;;  %v1743_v43 = vmul.f32 %v4551_v53, %v1741_v62  ;;  %v1742_v36 = vmul.f32 %v4570_v6, %v1740_v35 }
 0x70f   : > { %4084 = vmatpush1.bf16.msra.mxu1 %v4083_v50 }
 0x710   : > { %1768 = vmatprep.subr.mxu1 %v1743_v43 }
 0x713   : > { %1769 = vmatpush1.msra.mxu1 %v1742_v36 }
 0x714   : > { %4007 = vmatmul.mubr.msk.f32.vlgmr.msra.gmra.mrb[4].mxu1 %vm6274_vm10, %v4748_v46  ;;  %v6267_v46 = vmov 0   ;;  %vm1218_vm10 = vcmask 1045504  }
 0x715   : > { %2452 = vmatprep.mubr.f32.mxu1 %v6269_v0  ;;  %4196 = vset.pattern.permute.xlu0 %v6267_v46 }
 0x71c   : > { %v1748_v44 = vpop.permute.xlu0 %1747 }
 0x7e7   : > { %v1818_v63 = vpop.f32.mrb[4].mxu1 }
 0x7e8   : > { %v4803_v1 = vadd.f32 %v1818_v63, %v1748_v44  ;;  %v1820_v3 = vpop.f32.mrb[5].mxu1 }
 0x7e9   : > { %v4805_v42 = vadd.f32 %v1820_v3, %v1748_v44 }
 0x7ea   : > { %1831 = vrot.lane.b32.xlu1 %v4803_v1, %s4268_s11 }
 0x7eb   : > { %1833 = vrot.lane.b32.xlu0 %v4805_v42, %s4268_s11 }
 0x7ee   : > { %1847 = vrot.lane.b32.xlu1 %v4803_v1, %s4271_s15 }
 0x7ef   : > { %1849 = vrot.lane.b32.xlu0 %v4805_v42, %s4271_s15 }
 0x7f2   : > { %1823 = vrot.lane.b32.xlu1 %v4803_v1, %s4269_s12 }
 0x7f3   : > { %1825 = vrot.lane.b32.xlu0 %v4805_v42, %s4269_s12 }
 0x7f6   : > { %1839 = vrot.lane.b32.xlu1 %v4803_v1, %s4270_s14 }
 0x7f7   : > { %1841 = vrot.lane.b32.xlu0 %v4805_v42, %s4270_s14 }
 0x7fa   : > { %1855 = vrot.lane.b32.xlu1 %v4803_v1, %s4272_s16 }
 0x7fb   : > { %1857 = vrot.lane.b32.xlu0 %v4805_v42, %s4272_s16 }
 0x7fe   : > { %1871 = vrot.lane.b32.xlu1 %v4803_v1, %s6291_s19 }
 0x7ff   : > { %1873 = vrot.lane.b32.xlu0 %v4805_v42, %s6291_s19 }
 0x802   : > { %1863 = vrot.lane.b32.xlu1 %v4803_v1, %s6293_s18 }
 0x803   : > { %1865 = vrot.lane.b32.xlu0 %v4805_v42, %s6293_s18 }
 0x806   : > { %1879 = vrot.lane.b32.xlu1 %v4803_v1, %s6289_s21 }
 0x807   : > { %1881 = vrot.lane.b32.xlu0 %v4805_v42, %s6289_s21 }
 0x80a   : > { %820 = vperm.xlu1 %4195, %v4584_v28  }
 0x80b   : > { %1008 = vperm.xlu0 %4196, %v1000_v5  }
 0x80e   : > { %4197 = vset.pattern.permute.xlu1 %v6267_v46 }
 0x80f   : > { %1013 = vperm.xlu1 %4197, %v1001_v8  }
 0x85c   : > { %v1832_v9 = vpop.permute.xlu1 %1831 }
 0x85d   : > { %v1834_v11 = vpop.permute.xlu0 %1833 }
 0x85e   : > { %v1835_v33 = vsel %vm622_vm2, %v1832_v9, %v1834_v11  ;;  %v1836_v12 = vsel %vm622_vm2, %v1834_v11, %v1832_v9 }
 0x85f   : > { %v1837_v21 = vmul.f32 %v1836_v12, %v4477_v47  ;;  %v1838_v24 = vmul.f32 %v1835_v33, %v4480_v48 }
 0x860   : > { %v1848_v38 = vpop.permute.xlu1 %1847 }
 0x861   : > { %v1850_v41 = vpop.permute.xlu0 %1849  ;;  %v1889_v58 = vrot.slane %v1837_v21, 4  ;;  %v1890_v60 = vrot.slane %v1838_v24, 4 }
 0x862   : > { %v1851_v28 = vsel %vm656_vm5, %v1848_v38, %v1850_v41  ;;  %v1852_v13 = vsel %vm656_vm5, %v1850_v41, %v1848_v38 }
 0x863   : > { %v1853_v4 = vmul.f32 %v1852_v13, %v4501_v59  ;;  %v1854_v7 = vmul.f32 %v1851_v28, %v4490_v54 }
 0x864   : > { %v1824_v14 = vpop.permute.xlu1 %1823 }
 0x865   : > { %v1826_v19 = vpop.permute.xlu0 %1825  ;;  %v1895_v43 = vrot.slane %v1853_v4, 4  ;;  %v1896_v36 = vrot.slane %v1854_v7, 4 }
 0x866   : > { %v1827_v26 = vsel %vm605_vm3, %v1824_v14, %v1826_v19  ;;  %v1828_v27 = vsel %vm605_vm3, %v1826_v19, %v1824_v14 }
 0x867   : > { %v1829_v34 = vmul.f32 %v1828_v27, %v4496_v56  ;;  %v1830_v39 = vmul.f32 %v1827_v26, %v4493_v55 }
 0x868   : > { %v1840_v32 = vpop.permute.xlu1 %1839 }
 0x869   : > { %v1842_v50 = vpop.permute.xlu0 %1841  ;;  %v1912_v8 = vsel %vm523_vm0, %v1830_v39, %v1890_v60  ;;  %v1911_v11 = vsel %vm523_vm0, %v1829_v34, %v1889_v58 }
 0x86a   : > { %v1843_v62 = vsel %vm639_vm4, %v1840_v32, %v1842_v50  ;;  %v1844_v35 = vsel %vm639_vm4, %v1842_v50, %v1840_v32 }
 0x86b   : > { %v1845_v44 = vmul.f32 %v1844_v35, %v4520_v10  ;;  %v1846_v63 = vmul.f32 %v1843_v62, %v4499_v57 }
 0x86c   : > { %v1856_v3 = vpop.permute.xlu1 %1855 }
 0x86d   : > { %v1858_v5 = vpop.permute.xlu0 %1857  ;;  %v1914_v9 = vsel %vm523_vm0, %v1846_v63, %v1896_v36  ;;  %v1913_v38 = vsel %vm523_vm0, %v1845_v44, %v1895_v43 }
 0x86e   : > { %v1859_v41 = vsel %vm673_vm6, %v1856_v3, %v1858_v5  ;;  %v1860_v33 = vsel %vm673_vm6, %v1858_v5, %v1856_v3  ;;  %v4085_v12 = vpack.c.bf16 %v1914_v9, %v1912_v8  ;;  %v4087_v28 = vpack.c.bf16 %v1913_v38, %v1911_v11 }
 0x86f   : > { %v1861_v14 = vmul.f32 %v1859_v41, %v4526_v25  ;;  %v1862_v19 = vmul.f32 %v1860_v33, %v4503_v61 }
 0x870   : > { %4086 = vmatprep.subr.bf16.mxu0 %v4085_v12  ;;  %v1872_v13 = vpop.permute.xlu1 %1871 }
 0x871   : > { %v1874_v21 = vpop.permute.xlu0 %1873  ;;  %4088 = vmatpush1.bf16.msra.mxu0 %v4087_v28  ;;  %v1901_v32 = vrot.slane %v1861_v14, 4  ;;  %v1902_v34 = vrot.slane %v1862_v19, 4  ;;  %v1004_v19 = vld [vmem:[%s6261_s8 + $0x38] sm:$0xf] }
 0x872   : > { %v1875_v24 = vsel %vm707_vm8, %v1872_v13, %v1874_v21  ;;  %v1876_v26 = vsel %vm707_vm8, %v1874_v21, %v1872_v13  ;;  %v1005_v21 = vld [vmem:[%s6261_s8 + $0x18] sm:$0x1] }
 0x873   : > { %v1877_v27 = vmul.f32 %v1875_v24, %v4544_v51  ;;  %v1878_v4 = vmul.f32 %v1876_v26, %v4546_v52  ;;  %v1916_v63 = vsel %vm523_vm0, %v4805_v42, %v1902_v34  ;;  %v1915_v5 = vsel %vm523_vm0, %v4803_v1, %v1901_v32  ;;  %v4964_v24 = vld [vmem:[%s6261_s8 + $0x78] sm:$0xf] }
 0x874   : > { %v1864_v7 = vpop.permute.xlu1 %1863 }
 0x875   : > { %v1866_v39 = vpop.permute.xlu0 %1865  ;;  %v1907_v60 = vrot.slane %v1877_v27, 4  ;;  %v1908_v62 = vrot.slane %v1878_v4, 4 }
 0x876   : > { %v1867_v50 = vsel %vm690_vm7, %v1864_v7, %v1866_v39  ;;  %v1868_v58 = vsel %vm690_vm7, %v1866_v39, %v1864_v7 }
 0x877   : > { %v1869_v35 = vmul.f32 %v1867_v50, %v4539_v45  ;;  %v1870_v43 = vmul.f32 %v1868_v58, %v4541_v49 }
 0x878   : > { %v1880_v36 = vpop.permute.xlu1 %1879 }
 0x879   : > { %v1882_v44 = vpop.permute.xlu0 %1881  ;;  %v1918_v3 = vsel %vm523_vm0, %v1870_v43, %v1908_v62  ;;  %v1917_v8 = vsel %vm523_vm0, %v1869_v35, %v1907_v60 }
 0x87a   : > { %v1884_v9 = vsel %vm724_vm9, %v1882_v44, %v1880_v36  ;;  %v4089_v11 = vpack.c.bf16 %v1918_v3, %v1916_v63  ;;  %v4091_v38 = vpack.c.bf16 %v1917_v8, %v1915_v5  ;;  %v1883_v33 = vsel %vm724_vm9, %v1880_v36, %v1882_v44 }
 0x87b   : > { %v1886_v41 = vmul.f32 %v4551_v53, %v1884_v9  ;;  %v1885_v42 = vmul.f32 %v4570_v6, %v1883_v33 }
 0x87c   : > { %4090 = vmatprep.subr.bf16.mxu0 %v4089_v11 }
 0x87d   : > { %4092 = vmatpush1.bf16.msra.mxu0 %v4091_v38 }
 0x87e   : > { %4008 = vmatprep.subr.msk.mxu0 %vm523_vm0, %v1886_v41 }
 0x881   : > { %4009 = vmatpush1.msk.msra.mxu0 %vm523_vm0, %v1885_v42 }
 0x882   : > { %4010 = vmatmul.mubr.msk.f32.vlgmr.msra.gmra.mrb[10].mxu0 %vm1925_vm11, %v4964_v24 }
 0x883   : > { %2088 = vmatprep.mubr.f32.mxu0 %v6269_v0 }
 0x889   : > { %v821_v1 = vpop.permute.xlu1 %820 }
 0x88a   : > { %v898_v12 = vadd.f32 %v4598_v37, %v821_v1  ;;  %v900_v28 = vadd.f32 %v4600_v31, %v821_v1  ;;  %v1002_v37 = vld [vmem:[%s6261_s8 + $0x28] sm:$0xff]  ;;  %v1003_v31 = vld [vmem:[%s6261_s8 + $0x30] sm:$0xff]  ;;  %v1009_v26 = vpop.permute.xlu0 %1008 }
 0x88c   : > { %v4910_v13 = vmax.f32 %v898_v12, 0.0  ;;  %v4912_v14 = vmax.f32 %v900_v28, 0.0 }
 0x88e   : > { %914 = vrot.lane.b32.xlu0 %v4912_v14, %s4268_s11  ;;  %912 = vrot.lane.b32.xlu1 %v4910_v13, %s4268_s11  ;;  %v1014_v27 = vpop.permute.xlu1 %1013 }
 0x892   : > { %930 = vrot.lane.b32.xlu0 %v4912_v14, %s4271_s15  ;;  %928 = vrot.lane.b32.xlu1 %v4910_v13, %s4271_s15 }
 0x896   : > { %904 = vrot.lane.b32.xlu0 %v4910_v13, %s4269_s12  ;;  %1018 = vperm.xlu1 %4197, %v1002_v37  }
 0x89a   : > { %920 = vrot.lane.b32.xlu0 %v4910_v13, %s4270_s14  ;;  %906 = vrot.lane.b32.xlu1 %v4912_v14, %s4269_s12 }
 0x89e   : > { %936 = vrot.lane.b32.xlu0 %v4910_v13, %s4272_s16  ;;  %922 = vrot.lane.b32.xlu1 %v4912_v14, %s4270_s14 }
 0x8a2   : > { %1023 = vperm.xlu0 %4196, %v1003_v31   ;;  %938 = vrot.lane.b32.xlu1 %v4912_v14, %s4272_s16 }
 0x8a6   : > { %954 = vrot.lane.b32.xlu0 %v4912_v14, %s6291_s19  ;;  %952 = vrot.lane.b32.xlu1 %v4910_v13, %s6291_s19 }
 0x8a7   : > { %4198 = vset.pattern.permute.xlu0 %v6265_v2 }
 0x8aa   : > { %944 = vrot.lane.b32.xlu0 %v4910_v13, %s6293_s18  ;;  %1028 = vperm.xlu1 %4197, %v1004_v19  }
 0x8ae   : > { %960 = vrot.lane.b32.xlu0 %v4910_v13, %s6289_s21  ;;  %946 = vrot.lane.b32.xlu1 %v4912_v14, %s6293_s18 }
 0x8af   : > { %4200 = vset.pattern.permute.xlu1 %v6265_v2 }
 0x8b2   : > { %962 = vrot.lane.b32.xlu1 %v4912_v14, %s6289_s21  ;;  %1065 = vperm.xlu0 %4198, %v1005_v21  }
 0x8b6   : > { %4199 = vset.pattern.permute.xlu0 %v6267_v46 }
 0x900   : > { %v915_v4 = vpop.permute.xlu0 %914  ;;  %v913_v7 = vpop.permute.xlu1 %912 }
 0x901   : > { %v916_v3 = vsel %vm622_vm2, %v913_v7, %v915_v4  ;;  %v917_v5 = vsel %vm622_vm2, %v915_v4, %v913_v7 }
 0x902   : > { %v918_v12 = vmul.f32 %v917_v5, %v4477_v47  ;;  %v919_v28 = vmul.f32 %v916_v3, %v4480_v48 }
 0x904   : > { %v931_v32 = vpop.permute.xlu0 %930  ;;  %v929_v34 = vpop.permute.xlu1 %928 }
 0x905   : > { %v932_v43 = vsel %vm656_vm5, %v929_v34, %v931_v32  ;;  %v933_v36 = vsel %vm656_vm5, %v931_v32, %v929_v34 }
 0x906   : > { %v934_v41 = vmul.f32 %v933_v36, %v4501_v59  ;;  %v935_v33 = vmul.f32 %v932_v43, %v4490_v54  ;;  %v971_v43 = vrot.slane %v919_v28, 4 }
 0x908   : > { %v905_v39 = vpop.permute.xlu0 %904 }
 0x90c   : > { %v921_v58 = vpop.permute.xlu0 %920 }
 0x910   : > { %v937_v62 = vpop.permute.xlu0 %936 }
 0x915   : > { %v1019_v50 = vpop.permute.xlu1 %1018 }
 0x919   : > { %v907_v60 = vpop.permute.xlu1 %906 }
 0x91a   : > { %v908_v42 = vsel %vm605_vm3, %v905_v39, %v907_v60  ;;  %v909_v1 = vsel %vm605_vm3, %v907_v60, %v905_v39  ;;  %v977_v39 = vrot.slane %v935_v33, 4 }
 0x91b   : > { %v910_v32 = vmul.f32 %v909_v1, %v4496_v56  ;;  %v911_v34 = vmul.f32 %v908_v42, %v4493_v55 }
 0x91d   : > { %v923_v35 = vpop.permute.xlu1 %922 }
 0x91e   : > { %v924_v11 = vsel %vm639_vm4, %v921_v58, %v923_v35  ;;  %v925_v38 = vsel %vm639_vm4, %v923_v35, %v921_v58  ;;  %v976_v58 = vrot.slane %v934_v41, 4  ;;  %v970_v35 = vrot.slane %v918_v12, 4 }
 0x91f   : > { %v926_v4 = vmul.f32 %v925_v38, %v4520_v10  ;;  %v927_v7 = vmul.f32 %v924_v11, %v4499_v57  ;;  %v993_v11 = vsel %vm523_vm0, %v911_v34, %v971_v43 }
 0x921   : > { %v1024_v44 = vpop.permute.xlu0 %1023  ;;  %v939_v63 = vpop.permute.xlu1 %938  ;;  %v994_v5 = vsel %vm523_vm0, %v926_v4, %v976_v58 }
 0x922   : > { %v940_v8 = vsel %vm673_vm6, %v937_v62, %v939_v63  ;;  %v941_v9 = vsel %vm673_vm6, %v939_v63, %v937_v62  ;;  %v1033_v42 = vmul.f32 %v1014_v27, %v994_v5 }
 0x923   : > { %v942_v37 = vmul.f32 %v940_v8, %v4526_v25  ;;  %v943_v31 = vmul.f32 %v941_v9, %v4503_v61  ;;  %v995_v8 = vsel %vm523_vm0, %v927_v7, %v977_v39  ;;  %v992_v9 = vsel %vm523_vm0, %v910_v32, %v970_v35 }
 0x924   : > { %v1034_v1 = vmul.f32 %v1014_v27, %v995_v8 }
 0x925   : > { %v955_v19 = vpop.permute.xlu0 %954  ;;  %v953_v21 = vpop.permute.xlu1 %952  ;;  %v982_v36 = vrot.slane %v942_v37, 4  ;;  %v983_v63 = vrot.slane %v943_v31, 4  ;;  %v1031_v31 = vmul.f32 %v1009_v26, %v992_v9 }
 0x926   : > { %v956_v60 = vsel %vm707_vm8, %v953_v21, %v955_v19  ;;  %v957_v62 = vsel %vm707_vm8, %v955_v19, %v953_v21  ;;  %v1032_v19 = vmul.f32 %v1009_v26, %v993_v11 }
 0x927   : > { %v958_v38 = vmul.f32 %v956_v60, %v4544_v51  ;;  %v959_v41 = vmul.f32 %v957_v62, %v4546_v52  ;;  %v996_v12 = vsel %vm523_vm0, %v4910_v13, %v982_v36  ;;  %v997_v28 = vsel %vm523_vm0, %v4912_v14, %v983_v63 }
 0x928   : > { %v1035_v58 = vmul.f32 %v1019_v50, %v996_v12  ;;  %v1036_v39 = vmul.f32 %v1019_v50, %v997_v28  ;;  %v1041_v60 = vadd.f32 %v1033_v42, %v1031_v31  ;;  %v1052_v62 = vadd.f32 %v1034_v1, %v1032_v19 }
 0x929   : > { %v1029_v3 = vpop.permute.xlu1 %1028  ;;  %v945_v33 = vpop.permute.xlu0 %944  ;;  %v988_v7 = vrot.slane %v958_v38, 4  ;;  %v989_v32 = vrot.slane %v959_v41, 4 }
 0x92a   : > { %v1042_v38 = vadd.f32 %v1041_v60, %v1035_v58  ;;  %v1053_v41 = vadd.f32 %v1052_v62, %v1036_v39 }
 0x92d   : > { %v947_v37 = vpop.permute.xlu1 %946  ;;  %v961_v35 = vpop.permute.xlu0 %960 }
 0x92e   : > { %v948_v21 = vsel %vm690_vm7, %v945_v33, %v947_v37  ;;  %v949_v4 = vsel %vm690_vm7, %v947_v37, %v945_v33 }
 0x92f   : > { %v950_v34 = vmul.f32 %v948_v21, %v4539_v45  ;;  %v951_v27 = vmul.f32 %v949_v4, %v4541_v49 }
 0x931   : > { %v998_v43 = vsel %vm523_vm0, %v950_v34, %v988_v7  ;;  %v999_v26 = vsel %vm523_vm0, %v951_v27, %v989_v32  ;;  %v963_v36 = vpop.permute.xlu1 %962  ;;  %v1066_v60 = vpop.permute.xlu0 %1065 }
 0x932   : > { %v1037_v63 = vmul.f32 %v1024_v44, %v998_v43  ;;  %v1038_v5 = vmul.f32 %v1024_v44, %v999_v26  ;;  %v964_v8 = vsel %vm724_vm9, %v961_v35, %v963_v36  ;;  %v965_v9 = vsel %vm724_vm9, %v963_v36, %v961_v35 }
 0x933   : > { %v966_v11 = vmul.f32 %v4570_v6, %v964_v8  ;;  %v967_v50 = vmul.f32 %v4551_v53, %v965_v9  ;;  %v1224_v8 = vld [vmem:[%s6261_s8 + $0x40] sm:$0xff] }
 0x934   : > { %v1043_v1 = vadd.f32 %v1042_v38, %v1037_v63  ;;  %v1054_v12 = vadd.f32 %v1053_v41, %v1038_v5  ;;  %v1225_v5 = vld [vmem:[%s6261_s8 + $0x48] sm:$0x1]  ;;  %v1226_v9 = vld [vmem:[%s6261_s8 + $0x40] sm:$0x1] }
 0x935   : > { %v1039_v33 = vmul.f32 %v1029_v3, %v966_v11  ;;  %v1040_v42 = vmul.f32 %v1029_v3, %v967_v50  ;;  %v5079_v11 = vld [vmem:[%s6261_s8 + $0x80] sm:$0xf] }
 0x937   : > { %v1044_v28 = vsel %vm523_vm0, %v1039_v33, 0.0  ;;  %v1055_v44 = vsel %vm523_vm0, %v1040_v42, 0.0 }
 0x938   : > { %v1045_v37 = vadd.f32 %v1044_v28, %v1043_v1  ;;  %v1056_v31 = vadd.f32 %v1055_v44, %v1054_v12 }
 0x93a   : > { %v1046_v19 = vrot.slane %v1045_v37, 4  ;;  %v1057_v21 = vrot.slane %v1056_v31, 4 }
 0x93c   : > { %v1047_v4 = vadd.f32 %v1046_v19, %v1045_v37  ;;  %v1058_v7 = vadd.f32 %v1057_v21, %v1056_v31  ;;  %v5089_v31 = vld [vmem:[%s6260_s7] sm:$0xff]  ;;  %v5095_v21 = vld [vmem:[%s6260_s7 + $0x8] sm:$0xff] }
 0x93d   : > { %v1088_v19 = vrot.slane %v5089_v31, 1 }
 0x93e   : > { %v1048_v32 = vrot.slane %v1047_v4, 2  ;;  %v1059_v34 = vrot.slane %v1058_v7, 2 }
 0x940   : > { %v1049_v27 = vadd.f32 %v1048_v32, %v1047_v4  ;;  %v1060_v35 = vadd.f32 %v1059_v34, %v1058_v7  ;;  %v1089_v4 = vrot.slane %v5095_v21, 1  ;;  %v1100_v34 = vrot.slane %v5089_v31, 2 }
 0x942   : > { %v1050_v58 = vrot.slane %v1049_v27, 1  ;;  %v1061_v39 = vrot.slane %v1060_v35, 1 }
 0x944   : > { %v1051_v3 = vadd.f32 %v1050_v58, %v1049_v27  ;;  %v1062_v62 = vadd.f32 %v1061_v39, %v1060_v35  ;;  %v1112_v27 = vrot.slane %v5089_v31, 3  ;;  %v1113_v35 = vrot.slane %v5095_v21, 3 }
 0x946   : > { %v1068_v43 = vadd.f32 %v1066_v60, %v1051_v3  ;;  %v1069_v26 = vadd.f32 %v1066_v60, %v1062_v62 }
 0x948   : > { %v5029_v36 = vmax.f32 %v1068_v43, 0.0  ;;  %v5035_v63 = vmax.f32 %v1069_v26, 0.0  ;;  %v1101_v26 = vrot.slane %v5095_v21, 2 }
 0x94a   : > { %1094 = vrot.lane.b32.xlu0 %v5029_v36, %s4270_s14  ;;  %1080 = vrot.lane.b32.xlu1 %v5029_v36, %s4268_s11 }
 0x94e   : > { %1072 = vrot.lane.b32.xlu0 %v5029_v36, %s4269_s12  ;;  %1082 = vrot.lane.b32.xlu1 %v5035_v63, %s4268_s11 }
 0x952   : > { %1106 = vrot.lane.b32.xlu0 %v5029_v36, %s4271_s15  ;;  %1096 = vrot.lane.b32.xlu1 %v5035_v63, %s4270_s14 }
 0x955   : > { %v5082_v50 = vpop.f32.mrb[10].mxu0 }
 0x956   : > { %1118 = vrot.lane.b32.xlu0 %v5029_v36, %s4272_s16  ;;  %1074 = vrot.lane.b32.xlu1 %v5035_v63, %s4269_s12  ;;  %v5084_v38 = vpop.f32.mrb[11].mxu0 }
 0x95a   : > { %1234 = vperm.xlu0 %4199, %v1225_v5   ;;  %1108 = vrot.lane.b32.xlu1 %v5035_v63, %s4271_s15 }
 0x95e   : > { %1229 = vperm.xlu0 %4199, %v1224_v8   ;;  %1120 = vrot.lane.b32.xlu1 %v5035_v63, %s4272_s16 }
 0x962   : > { %1144 = vrot.lane.b32.xlu0 %v5035_v63, %s6291_s19  ;;  %1130 = vrot.lane.b32.xlu1 %v5029_v36, %s6293_s18 }
 0x963   : > { %4201 = vset.pattern.permute.xlu0 %v6265_v2 }
 0x966   : > { %1156 = vrot.lane.b32.xlu0 %v5035_v63, %s6289_s21  ;;  %1132 = vrot.lane.b32.xlu1 %v5035_v63, %s6293_s18 }
 0x96a   : > { %1142 = vrot.lane.b32.xlu1 %v5029_v36, %s6291_s19  ;;  %1922 = vperm.xlu0 %4201, %v4964_v24  }
 0x96e   : > { %1154 = vrot.lane.b32.xlu1 %v5029_v36, %s6289_s21 }
 0x972   : > { %1259 = vperm.xlu1 %4200, %v1226_v9  }
 0x976   : > { %2018 = vperm.xlu1 %4200, %v5079_v11  }
 0x9bc   : > { %v1081_v24 = vpop.permute.xlu1 %1080  ;;  %v1095_v33 = vpop.permute.xlu0 %1094 }
 0x9c0   : > { %v1083_v41 = vpop.permute.xlu1 %1082  ;;  %v1073_v12 = vpop.permute.xlu0 %1072 }
 0x9c1   : > { %v1084_v7 = vsel %vm622_vm2, %v1081_v24, %v1083_v41  ;;  %v1085_v32 = vsel %vm622_vm2, %v1083_v41, %v1081_v24  ;;  %v1124_v41 = vrot.slane %v5089_v31, 5 }
 0x9c2   : > { %v1092_v39 = vmul.f32 %v1088_v19, %v1085_v32  ;;  %v1093_v60 = vmul.f32 %v1089_v4, %v1084_v7  ;;  %v1125_v19 = vrot.slane %v5095_v21, 5  ;;  %v1136_v4 = vrot.slane %v5089_v31, 6 }
 0x9c3   : > { %v1137_v7 = vrot.slane %v5095_v21, 6 }
 0x9c4   : > { %v1097_v42 = vpop.permute.xlu1 %1096  ;;  %v1107_v44 = vpop.permute.xlu0 %1106 }
 0x9c5   : > { %v1098_v9 = vsel %vm639_vm4, %v1095_v33, %v1097_v42  ;;  %v1099_v24 = vsel %vm639_vm4, %v1097_v42, %v1095_v33 }
 0x9c6   : > { %v1104_v0 = vmul.f32 %v1100_v34, %v1099_v24  ;;  %v1105_v33 = vmul.f32 %v1101_v26, %v1098_v9  ;;  %v1183_v24 = vrot.slane %v5035_v63, 4 }
 0x9c8   : > { %v1075_v1 = vpop.permute.xlu1 %1074  ;;  %v1119_v3 = vpop.permute.xlu0 %1118  ;;  %v1171_v9 = vrot.slane %v1105_v33, 6 }
 0x9c9   : > { %v1076_v62 = vsel %vm605_vm3, %v1073_v12, %v1075_v1  ;;  %v1077_v43 = vsel %vm605_vm3, %v1075_v1, %v1073_v12 }
 0x9ca   : > { %v1078_v1 = vmul.f32 %v5089_v31, %v1077_v43  ;;  %v1079_v12 = vmul.f32 %v5095_v21, %v1076_v62 }
 0x9cc   : > { %v1109_v28 = vpop.permute.xlu1 %1108 }
 0x9cd   : > { %v1110_v5 = vsel %vm656_vm5, %v1107_v44, %v1109_v28  ;;  %v1111_v8 = vsel %vm656_vm5, %v1109_v28, %v1107_v44  ;;  %v1164_v28 = vrot.slane %v1092_v39, 7  ;;  %v1165_v44 = vrot.slane %v1093_v60, 7 }
 0x9ce   : > { %v1116_v15 = vmul.f32 %v1112_v27, %v1111_v8  ;;  %v1117_v2 = vmul.f32 %v1113_v35, %v1110_v5  ;;  %v1170_v8 = vrot.slane %v1104_v0, 6 }
 0x9cf   : > { %v1205_v39 = vsel %vm1204_vm12, %v1078_v1, %v1164_v28  ;;  %v1206_v27 = vsel %vm1204_vm12, %v1079_v12, %v1165_v44 }
 0x9d0   : > { %v1121_v37 = vpop.permute.xlu1 %1120  ;;  %v1176_v34 = vrot.slane %v1116_v15, 5  ;;  %v1177_v35 = vrot.slane %v1117_v2, 5  ;;  %v1208_v1 = vsel %vm6275_vm13, %v1205_v39, %v1170_v8  ;;  %v1209_v12 = vsel %vm6275_vm13, %v1206_v27, %v1171_v9  ;;  %v4248_v9 = vld [vmem:[%s6260_s7 + $0x10] sm:$0x1] }
 0x9d1   : > { %v1122_v42 = vsel %vm673_vm6, %v1119_v3, %v1121_v37  ;;  %v1123_v43 = vsel %vm673_vm6, %v1121_v37, %v1119_v3  ;;  %v1182_v2 = vrot.slane %v5029_v36, 4  ;;  %vm1221_vm13 = vcmask 1046528  }
 0x9d2   : > { %v1128_v60 = vmul.f32 %v1124_v41, %v1122_v42  ;;  %v1129_v26 = vmul.f32 %v1125_v19, %v1123_v43  ;;  %v1211_v15 = vsel %vm1210_vm14, %v1208_v1, %v1176_v34  ;;  %v1212_v0 = vsel %vm1210_vm14, %v1209_v12, %v1177_v35 }
 0x9d3   : > { %v1214_v36 = vsel %vm523_vm0, %v1212_v0, %v1183_v24  ;;  %v1213_v44 = vsel %vm523_vm0, %v1211_v15, %v1182_v2  ;;  %vm6322_vm14 = vcmask 588800  }
 0x9d4   : > { %v1131_v58 = vpop.permute.xlu1 %1130  ;;  %v1188_v41 = vrot.slane %v1128_v60, 3 }
 0x9d6   : > { %v1216_v33 = vsel %vm1215_vm15, %v1213_v44, %v1188_v41 }
 0x9d8   : > { %v1133_v32 = vpop.permute.xlu1 %1132 }
 0x9d9   : > { %v1235_v46 = vpop.permute.xlu0 %1234  ;;  %v1134_v62 = vsel %vm690_vm7, %v1131_v58, %v1133_v32  ;;  %v1135_v23 = vsel %vm690_vm7, %v1133_v32, %v1131_v58  ;;  %v1148_v58 = vrot.slane %v5089_v31, 7  ;;  %v1149_v32 = vrot.slane %v5095_v21, 7 }
 0x9da   : > { %v1140_v37 = vmul.f32 %v1136_v4, %v1134_v62  ;;  %v1141_v3 = vmul.f32 %v1137_v7, %v1135_v23  ;;  %v1189_v23 = vrot.slane %v1129_v26, 3 }
 0x9dc   : > { %v1143_v20 = vpop.permute.xlu1 %1142  ;;  %v1194_v63 = vrot.slane %v1140_v37, 2  ;;  %v1195_v4 = vrot.slane %v1141_v3, 2  ;;  %v1217_v42 = vsel %vm1215_vm15, %v1214_v36, %v1189_v23  ;;  %v4249_v3 = vld [vmem:[%s6260_s7 + $0x18] sm:$0x1]  ;;  %vm6325_vm15 = vcmask 1041408  }
 0x9dd   : > { %v1230_v5 = vpop.permute.xlu0 %1229 }
 0x9de   : > { %v1219_v34 = vsel %vm1218_vm10, %v1216_v33, %v1194_v63 }
 0x9e0   : > { %v1155_v43 = vpop.permute.xlu1 %1154 }
 0x9e1   : > { %v1145_v19 = vpop.permute.xlu0 %1144 }
 0x9e2   : > { %v1146_v31 = vsel %vm707_vm8, %v1143_v20, %v1145_v19  ;;  %v1147_v21 = vsel %vm707_vm8, %v1145_v19, %v1143_v20  ;;  %v1220_v20 = vsel %vm1218_vm10, %v1217_v42, %v1195_v4 }
 0x9e3   : > { %v1152_v7 = vmul.f32 %v1148_v58, %v1146_v31  ;;  %v1153_v28 = vmul.f32 %v1149_v32, %v1147_v21 }
 0x9e5   : > { %v1200_v62 = vrot.slane %v1152_v7, 1  ;;  %v1201_v39 = vrot.slane %v1153_v28, 1  ;;  %v1157_v27 = vpop.permute.xlu0 %1156 }
 0x9e6   : > { %v1158_v35 = vsel %vm724_vm9, %v1155_v43, %v1157_v27  ;;  %v1159_v60 = vsel %vm724_vm9, %v1157_v27, %v1155_v43 }
 0x9e7   : > { %v1222_v26 = vsel %vm1221_vm13, %v1219_v34, %v1200_v62  ;;  %v1223_v8 = vsel %vm1221_vm13, %v1220_v20, %v1201_v39  ;;  %v1160_v37 = vmul.f32 %v4248_v9, %v1158_v35  ;;  %v1161_v24 = vmul.f32 %v4249_v3, %v1159_v60 }
 0x9e8   : > { %v1237_v1 = vmul.f32 %v1230_v5, %v1222_v26  ;;  %v1238_v12 = vmul.f32 %v1230_v5, %v1223_v8  ;;  %vm3371_vm13 = vcmask 883712  }
 0x9e9   : > { %v1239_v58 = vmul.f32 %v1235_v46, %v1160_v37  ;;  %v1240_v32 = vmul.f32 %v1235_v46, %v1161_v24  ;;  %v1923_v60 = vpop.permute.xlu0 %1922 }
 0x9ea   : > { %v2001_v26 = vadd.f32 %v5082_v50, %v1923_v60  ;;  %v2003_v8 = vadd.f32 %v5084_v38, %v1923_v60  ;;  %v6297_v38 = vmov 0.0  }
 0x9eb   : > { %v1241_v2 = vsel %vm1204_vm12, %v1239_v58, 0.0  ;;  %v1249_v15 = vsel %vm1204_vm12, %v1240_v32, 0.0  ;;  %vm2021_vm12 = vcmask 64512  }
 0x9ec   : > { %v1242_v0 = vadd.f32 %v1241_v2, %v1237_v1  ;;  %v1250_v41 = vadd.f32 %v1249_v15, %v1238_v12  ;;  %v2005_v9 = vmax.f32 %v2001_v26, 0.0  ;;  %v2006_v37 = vmax.f32 %v2003_v8, 0.0 }
 0x9ee   : > { %v1251_v23 = vrot.slane %v1250_v41, 4  ;;  %v1243_v19 = vrot.slane %v1242_v0, 4  ;;  %v2009_v58 = vrot.slane %v2005_v9, 4  ;;  %v2010_v1 = vrot.slane %v2006_v37, 4 }
 0x9f0   : > { %v1252_v63 = vadd.f32 %v1251_v23, %v1250_v41  ;;  %v1244_v4 = vadd.f32 %v1243_v19, %v1242_v0 }
 0x9f1   : > { %v1260_v42 = vpop.permute.xlu1 %1259 }
 0x9f2   : > { %v1253_v31 = vrot.slane %v1252_v63, 2  ;;  %v1245_v21 = vrot.slane %v1244_v4, 2 }
 0x9f4   : > { %v1254_v7 = vadd.f32 %v1253_v31, %v1252_v63  ;;  %v1246_v28 = vadd.f32 %v1245_v21, %v1244_v4  ;;  %v6298_v21 = vmov 0  }
 0x9f5   : > { %v2019_v41 = vpop.permute.xlu1 %2018 }
 0x9f6   : > { %v1255_v36 = vrot.slane %v1254_v7, 1  ;;  %v1247_v44 = vrot.slane %v1246_v28, 1 }
 0x9f8   : > { %v1256_v33 = vadd.f32 %v1255_v36, %v1254_v7  ;;  %v1248_v46 = vadd.f32 %v1247_v44, %v1246_v28 }
 0x9fa   : > { %v1262_v5 = vadd.f32 %v1260_v42, %v1248_v46  ;;  %v1263_v43 = vadd.f32 %v1260_v42, %v1256_v33 }
 0x9fc   : > { %v3995_v62 = vmul.f32 -1.442695, %v1262_v5  ;;  %v3996_v39 = vmul.f32 -1.442695, %v1263_v43 }
 0x9fe   : > { %4226 = vpow2.f32 %v3995_v62 }
 0x9ff   : > { %4228 = vpow2.f32 %v3996_v39 }
 0xa08   : > { %v4227_v27 = vpop.eup %4226 }
 0xa09   : > { %v4229_v34 = vpop.eup %4228  ;;  %v1270_v20 = vadd.f32 1.0, %v4227_v27 }
 0xa0a   : > { %v1271_v35 = vadd.f32 1.0, %v4229_v34 }
 0xa0b   : > { %4230 = vrcp.f32 %v1270_v20 }
 0xa0c   : > { %4232 = vrcp.f32 %v1271_v35 }
 0xa15   : > { %v4231_v3 = vpop.eup %4230 }
 0xa16   : > { %v4233_v24 = vpop.eup %4232  ;;  %v1279_v32 = vrot.slane %v4231_v3, %v4390_v22 }
 0xa17   : > { %v1283_v12 = vrot.slane %v4233_v24, %v4390_v22 }
 0xa18   : > { %v1284_v2 = vmul.f32 %v1279_v32, %v4910_v13 }
 0xa19   : > { %v1285_v15 = vmul.f32 %v1283_v12, %v4912_v14  ;;  %v5213_v14 = vld [vmem:[%s6261_s8 + $0x88] sm:$0xf] }
 0xa1a   : > { %v2013_v0 = vsel %vm523_vm0, %v1284_v2, %v2009_v58 }
 0xa1b   : > { %v2014_v50 = vsel %vm523_vm0, %v1285_v15, %v2010_v1 }
 0xa1c   : > { %2024 = vmatprep.subr.mxu0 %v2014_v50 }
 0xa1d   : > { %2025 = vmatpush1.msra.mxu0 %v2013_v0 }
 0xa1e   : > { %4011 = vmatmul.mubr.msk.f32.vlgmr.msra.gmra.mrb[12].mxu0 %vm2021_vm12, %v5079_v11  ;;  %v5218_v11 = vld [vmem:[%s6261_s8 + $0xb0] sm:$0xf]  ;;  %vm6326_vm12 = vmmov %vm6325_vm15 }
 0xa1f   : > { %2271 = vmatprep.mubr.f32.mxu0 %v6297_v38 }
 0xaf1   : > { %v2090_v23 = vpop.f32.mrb[12].mxu0 }
 0xaf2   : > { %v2091_v19 = vadd.f32 %v2090_v23, %v2019_v41  ;;  %v2092_v63 = vpop.f32.mrb[13].mxu0 }
 0xaf3   : > { %v2093_v4 = vadd.f32 %v2092_v63, %v2019_v41 }
 0xaf4   : > { %v5174_v31 = vmax.f32 %v2091_v19, 0.0 }
 0xaf5   : > { %v5176_v13 = vmax.f32 %v2093_v4, 0.0 }
 0xaf6   : > { %2105 = vrot.lane.b32.xlu1 %v5174_v31, %s4268_s11 }
 0xaf7   : > { %2107 = vrot.lane.b32.xlu0 %v5176_v13, %s4268_s11 }
 0xafa   : > { %2121 = vrot.lane.b32.xlu1 %v5174_v31, %s4271_s15 }
 0xafb   : > { %2123 = vrot.lane.b32.xlu0 %v5176_v13, %s4271_s15 }
 0xafe   : > { %2097 = vrot.lane.b32.xlu1 %v5174_v31, %s4269_s12 }
 0xaff   : > { %2099 = vrot.lane.b32.xlu0 %v5176_v13, %s4269_s12 }
 0xb02   : > { %2113 = vrot.lane.b32.xlu1 %v5174_v31, %s4270_s14 }
 0xb03   : > { %2115 = vrot.lane.b32.xlu0 %v5176_v13, %s4270_s14 }
 0xb06   : > { %2129 = vrot.lane.b32.xlu1 %v5174_v31, %s4272_s16 }
 0xb07   : > { %2131 = vrot.lane.b32.xlu0 %v5176_v13, %s4272_s16 }
 0xb0a   : > { %2145 = vrot.lane.b32.xlu1 %v5174_v31, %s6291_s19 }
 0xb0b   : > { %2147 = vrot.lane.b32.xlu0 %v5176_v13, %s6291_s19 }
 0xb0e   : > { %2137 = vrot.lane.b32.xlu1 %v5174_v31, %s6293_s18 }
 0xb0f   : > { %2139 = vrot.lane.b32.xlu0 %v5176_v13, %s6293_s18 }
 0xb12   : > { %2153 = vrot.lane.b32.xlu1 %v5174_v31, %s6289_s21 }
 0xb13   : > { %2155 = vrot.lane.b32.xlu0 %v5176_v13, %s6289_s21 }
 0xb16   : > { %2196 = vperm.xlu1 %4200, %v5213_v14  }
 0xb17   : > { %2729 = vperm.xlu0 %4201, %v5218_v11  }
 0xb1b   : > { %4202 = vset.pattern.permute.xlu0 %v6298_v21 }
 0xb68   : > { %v2106_v7 = vpop.permute.xlu1 %2105 }
 0xb69   : > { %v2108_v28 = vpop.permute.xlu0 %2107 }
 0xb6a   : > { %v2109_v33 = vsel %vm622_vm2, %v2106_v7, %v2108_v28  ;;  %v2110_v46 = vsel %vm622_vm2, %v2108_v28, %v2106_v7 }
 0xb6b   : > { %v5232_v39 = vmul.f32 %v2110_v46, %v4477_v47  ;;  %v5235_v27 = vmul.f32 %v2109_v33, %v4480_v48 }
 0xb6c   : > { %v2122_v36 = vpop.permute.xlu1 %2121 }
 0xb6d   : > { %v2124_v44 = vpop.permute.xlu0 %2123  ;;  %v6283_v3 = vrot.slane %v5232_v39, 4  ;;  %v6282_v24 = vrot.slane %v5235_v27, 4 }
 0xb6e   : > { %v2125_v42 = vsel %vm656_vm5, %v2122_v36, %v2124_v44  ;;  %v2126_v5 = vsel %vm656_vm5, %v2124_v44, %v2122_v36 }
 0xb6f   : > { %v5242_v35 = vmul.f32 %v2126_v5, %v4501_v59  ;;  %v5245_v60 = vmul.f32 %v2125_v42, %v4490_v54 }
 0xb70   : > { %v2098_v43 = vpop.permute.xlu1 %2097 }
 0xb71   : > { %v2100_v62 = vpop.permute.xlu0 %2099  ;;  %v6281_v1 = vrot.slane %v5242_v35, 4  ;;  %v6280_v12 = vrot.slane %v5245_v60, 4 }
 0xb72   : > { %v2101_v34 = vsel %vm605_vm3, %v2098_v43, %v2100_v62  ;;  %v2102_v20 = vsel %vm605_vm3, %v2100_v62, %v2098_v43 }
 0xb73   : > { %v5248_v8 = vmul.f32 %v2102_v20, %v4496_v56  ;;  %v5251_v9 = vmul.f32 %v2101_v34, %v4493_v55 }
 0xb74   : > { %v2114_v26 = vpop.permute.xlu1 %2113 }
 0xb75   : > { %v2116_v37 = vpop.permute.xlu0 %2115  ;;  %v2186_v41 = vsel %vm523_vm0, %v5251_v9, %v6282_v24  ;;  %v2185_v19 = vsel %vm523_vm0, %v5248_v8, %v6283_v3 }
 0xb76   : > { %v2117_v58 = vsel %vm639_vm4, %v2114_v26, %v2116_v37  ;;  %v2118_v32 = vsel %vm639_vm4, %v2116_v37, %v2114_v26 }
 0xb77   : > { %v5262_v2 = vmul.f32 %v2118_v32, %v4520_v10  ;;  %v5265_v15 = vmul.f32 %v2117_v58, %v4499_v57 }
 0xb78   : > { %v2130_v0 = vpop.permute.xlu1 %2129 }
 0xb79   : > { %v2132_v50 = vpop.permute.xlu0 %2131  ;;  %v2188_v23 = vsel %vm523_vm0, %v5265_v15, %v6280_v12  ;;  %v2187_v63 = vsel %vm523_vm0, %v5262_v2, %v6281_v1 }
 0xb7a   : > { %v2133_v4 = vsel %vm673_vm6, %v2130_v0, %v2132_v50  ;;  %v2134_v7 = vsel %vm673_vm6, %v2132_v50, %v2130_v0  ;;  %v4093_v28 = vpack.c.bf16 %v2188_v23, %v2186_v41  ;;  %v4095_v36 = vpack.c.bf16 %v2187_v63, %v2185_v19 }
 0xb7b   : > { %v5288_v33 = vmul.f32 %v2133_v4, %v4526_v25  ;;  %v5291_v46 = vmul.f32 %v2134_v7, %v4503_v61 }
 0xb7c   : > { %4094 = vmatprep.subr.bf16.mxu0 %v4093_v28  ;;  %v2146_v44 = vpop.permute.xlu1 %2145 }
 0xb7d   : > { %v2148_v42 = vpop.permute.xlu0 %2147  ;;  %4096 = vmatpush1.bf16.msra.mxu0 %v4095_v36  ;;  %v6278_v26 = vrot.slane %v5288_v33, 4  ;;  %v6279_v37 = vrot.slane %v5291_v46, 4 }
 0xb7e   : > { %v2149_v5 = vsel %vm707_vm8, %v2146_v44, %v2148_v42  ;;  %v2150_v43 = vsel %vm707_vm8, %v2148_v42, %v2146_v44 }
 0xb7f   : > { %v5298_v62 = vmul.f32 %v2149_v5, %v4544_v51  ;;  %v5301_v34 = vmul.f32 %v2150_v43, %v4546_v52  ;;  %v2190_v7 = vsel %vm523_vm0, %v5176_v13, %v6279_v37  ;;  %v2189_v36 = vsel %vm523_vm0, %v5174_v31, %v6278_v26 }
 0xb80   : > { %v2138_v20 = vpop.permute.xlu1 %2137 }
 0xb81   : > { %6299 = vst [vmem:[#allocation4_spill] sm:$0xff] %v5301_v34  ;;  %v2140_v58 = vpop.permute.xlu0 %2139  ;;  %v6277_v50 = vrot.slane %v5298_v62, 4  ;;  %v6276_v41 = vrot.slane %v5301_v34, 4 }
 0xb82   : > { %v2141_v32 = vsel %vm690_vm7, %v2138_v20, %v2140_v58  ;;  %v2142_v0 = vsel %vm690_vm7, %v2140_v58, %v2138_v20 }
 0xb83   : > { %v5312_v23 = vmul.f32 %v2141_v32, %v4539_v45  ;;  %v5315_v19 = vmul.f32 %v2142_v0, %v4541_v49 }
 0xb84   : > { %v2154_v63 = vpop.permute.xlu1 %2153 }
 0xb85   : > { %6300 = vst [vmem:[#allocation5_spill] sm:$0xff] %v5315_v19  ;;  %v2156_v4 = vpop.permute.xlu0 %2155  ;;  %v2192_v28 = vsel %vm523_vm0, %v5315_v19, %v6276_v41  ;;  %v2191_v44 = vsel %vm523_vm0, %v5312_v23, %v6277_v50 }
 0xb86   : > { %v2158_v42 = vsel %vm724_vm9, %v2156_v4, %v2154_v63  ;;  %v4097_v5 = vpack.c.bf16 %v2192_v28, %v2190_v7  ;;  %v4099_v43 = vpack.c.bf16 %v2191_v44, %v2189_v36  ;;  %v2157_v58 = vsel %vm724_vm9, %v2154_v63, %v2156_v4 }
 0xb87   : > { %v5336_v20 = vmul.f32 %v4551_v53, %v2158_v42  ;;  %v5343_v32 = vmul.f32 %v4570_v6, %v2157_v58  ;;  %v5432_v42 = vld [vmem:[%s6261_s8 + $0xb8] sm:$0xf] }
 0xb88   : > { %4098 = vmatprep.subr.bf16.mxu0 %v4097_v5 }
 0xb89   : > { %6301 = vst [vmem:[#allocation6_spill] sm:$0xff] %v5336_v20  ;;  %4100 = vmatpush1.bf16.msra.mxu0 %v4099_v43  ;;  %6302 = vst [vmem:[#allocation7_spill] sm:$0xff] %v5343_v32 }
 0xb8a   : > { %4012 = vmatprep.subr.msk.mxu0 %vm523_vm0, %v5336_v20 }
 0xb8d   : > { %4013 = vmatpush1.msk.msra.mxu0 %vm523_vm0, %v5343_v32 }
 0xb8e   : > { %4014 = vmatmul.mubr.msk.f32.vlgmr.msra.gmra.mrb[14].mxu0 %vm1925_vm11, %v5213_v14  ;;  %4018 = vmatprep.subr.msk.mxu0 %vm523_vm0, %v4408_v30 }
 0xb8f   : > { %4019 = vmatpush1.msk.msra.mxu0 %vm523_vm0, %v4404_v29  ;;  %2798 = vmatprep.mubr.f32.mxu0 %v6297_v38 }
 0xb92   : > { %4020 = vmatmul.mubr.msk.f32.vlgmr.msra.gmra.mrb[16].mxu0 %vm520_vm1, %v5218_v11  ;;  %vm4279_vm1 = vmmov 1  }
 0xb93   : > { %3160 = vmatprep.mubr.f32.mxu0 %v6297_v38 }
 0xb95   : > { %v2197_v0 = vpop.permute.xlu1 %2196 }
 0xb96   : > { %v2730_v11 = vpop.permute.xlu0 %2729 }
 0xc61   : > { %v2273_v63 = vpop.f32.mrb[14].mxu0 }
 0xc62   : > { %v5357_v4 = vadd.f32 %v2273_v63, %v2197_v0  ;;  %v2275_v7 = vpop.f32.mrb[15].mxu0 }
 0xc63   : > { %v5359_v28 = vadd.f32 %v2275_v7, %v2197_v0 }
 0xc64   : > { %2286 = vrot.lane.b32.xlu1 %v5357_v4, %s4268_s11 }
 0xc65   : > { %v2800_v30 = vpop.f32.mrb[16].mxu0  ;;  %2288 = vrot.lane.b32.xlu0 %v5359_v28, %s4268_s11 }
 0xc66   : > { %v2802_v14 = vpop.f32.mrb[17].mxu0  ;;  %v5393_v36 = vadd.f32 %v2800_v30, %v2730_v11 }
 0xc67   : > { %v5395_v44 = vadd.f32 %v2802_v14, %v2730_v11 }
 0xc68   : > { %2302 = vrot.lane.b32.xlu1 %v5357_v4, %s4271_s15 }
 0xc69   : > { %2304 = vrot.lane.b32.xlu0 %v5359_v28, %s4271_s15 }
 0xc6c   : > { %2278 = vrot.lane.b32.xlu1 %v5357_v4, %s4269_s12 }
 0xc6d   : > { %2280 = vrot.lane.b32.xlu0 %v5359_v28, %s4269_s12 }
 0xc70   : > { %2294 = vrot.lane.b32.xlu1 %v5357_v4, %s4270_s14 }
 0xc71   : > { %2296 = vrot.lane.b32.xlu0 %v5359_v28, %s4270_s14 }
 0xc74   : > { %2310 = vrot.lane.b32.xlu1 %v5357_v4, %s4272_s16 }
 0xc75   : > { %2312 = vrot.lane.b32.xlu0 %v5359_v28, %s4272_s16 }
 0xc78   : > { %2326 = vrot.lane.b32.xlu1 %v5357_v4, %s6291_s19 }
 0xc79   : > { %2328 = vrot.lane.b32.xlu0 %v5359_v28, %s6291_s19 }
 0xc7c   : > { %2318 = vrot.lane.b32.xlu1 %v5357_v4, %s6293_s18 }
 0xc7d   : > { %2320 = vrot.lane.b32.xlu0 %v5359_v28, %s6293_s18 }
 0xc80   : > { %2334 = vrot.lane.b32.xlu1 %v5357_v4, %s6289_s21 }
 0xc81   : > { %2336 = vrot.lane.b32.xlu0 %v5359_v28, %s6289_s21 }
 0xc84   : > { %2813 = vrot.lane.b32.xlu1 %v5393_v36, %s4268_s11 }
 0xc85   : > { %2815 = vrot.lane.b32.xlu0 %v5395_v44, %s4268_s11 }
 0xc88   : > { %2829 = vrot.lane.b32.xlu1 %v5393_v36, %s4271_s15 }
 0xc89   : > { %2831 = vrot.lane.b32.xlu0 %v5395_v44, %s4271_s15 }
 0xc8c   : > { %2805 = vrot.lane.b32.xlu1 %v5393_v36, %s4269_s12 }
 0xc8d   : > { %2807 = vrot.lane.b32.xlu0 %v5395_v44, %s4269_s12 }
 0xc90   : > { %2821 = vrot.lane.b32.xlu1 %v5393_v36, %s4270_s14 }
 0xc91   : > { %2823 = vrot.lane.b32.xlu0 %v5395_v44, %s4270_s14 }
 0xc94   : > { %2837 = vrot.lane.b32.xlu1 %v5393_v36, %s4272_s16 }
 0xc95   : > { %2839 = vrot.lane.b32.xlu0 %v5395_v44, %s4272_s16 }
 0xc98   : > { %2853 = vrot.lane.b32.xlu1 %v5393_v36, %s6291_s19 }
 0xc99   : > { %2855 = vrot.lane.b32.xlu0 %v5395_v44, %s6291_s19 }
 0xc9c   : > { %2845 = vrot.lane.b32.xlu1 %v5393_v36, %s6293_s18 }
 0xc9d   : > { %2847 = vrot.lane.b32.xlu0 %v5395_v44, %s6293_s18 }
 0xca0   : > { %2861 = vrot.lane.b32.xlu1 %v5393_v36, %s6289_s21 }
 0xca1   : > { %2863 = vrot.lane.b32.xlu0 %v5395_v44, %s6289_s21 }
 0xca4   : > { %2904 = vperm.xlu1 %4200, %v5432_v42  }
 0xcd6   : > { %v2287_v5 = vpop.permute.xlu1 %2286 }
 0xcd7   : > { %v2289_v43 = vpop.permute.xlu0 %2288 }
 0xcd8   : > { %v2290_v63 = vsel %vm622_vm2, %v2287_v5, %v2289_v43  ;;  %v2291_v7 = vsel %vm622_vm2, %v2289_v43, %v2287_v5 }
 0xcd9   : > { %v2292_v50 = vmul.f32 %v2291_v7, %v4477_v47  ;;  %v2293_v26 = vmul.f32 %v2290_v63, %v4480_v48 }
 0xcda   : > { %v2303_v58 = vpop.permute.xlu1 %2302 }
 0xcdb   : > { %v2305_v0 = vpop.permute.xlu0 %2304  ;;  %v2344_v3 = vrot.slane %v2292_v50, 4  ;;  %v2345_v7 = vrot.slane %v2293_v26, 4 }
 0xcdc   : > { %v2306_v30 = vsel %vm656_vm5, %v2303_v58, %v2305_v0  ;;  %v2307_v14 = vsel %vm656_vm5, %v2305_v0, %v2303_v58 }
 0xcdd   : > { %v2308_v5 = vmul.f32 %v2307_v14, %v4501_v59  ;;  %v2309_v43 = vmul.f32 %v2306_v30, %v4490_v54 }
 0xcde   : > { %v2279_v11 = vpop.permute.xlu1 %2278 }
 0xcdf   : > { %v2281_v41 = vpop.permute.xlu0 %2280  ;;  %v2350_v20 = vrot.slane %v2308_v5, 4 }
 0xce0   : > { %v2282_v37 = vsel %vm605_vm3, %v2279_v11, %v2281_v41  ;;  %v2283_v12 = vsel %vm605_vm3, %v2281_v41, %v2279_v11  ;;  %v2351_v41 = vrot.slane %v2309_v43, 4 }
 0xce1   : > { %v2284_v24 = vmul.f32 %v2283_v12, %v4496_v56  ;;  %v2285_v58 = vmul.f32 %v2282_v37, %v4493_v55 }
 0xce2   : > { %v2295_v1 = vpop.permute.xlu1 %2294 }
 0xce3   : > { %v2297_v0 = vpop.permute.xlu0 %2296  ;;  %v2367_v12 = vsel %vm523_vm0, %v2285_v58, %v2345_v7  ;;  %v2366_v26 = vsel %vm523_vm0, %v2284_v24, %v2344_v3 }
 0xce4   : > { %v2298_v63 = vsel %vm639_vm4, %v2295_v1, %v2297_v0  ;;  %v2299_v32 = vsel %vm639_vm4, %v2297_v0, %v2295_v1 }
 0xce5   : > { %v2300_v14 = vmul.f32 %v2299_v32, %v4520_v10  ;;  %v2301_v30 = vmul.f32 %v2298_v63, %v4499_v57 }
 0xce6   : > { %v2311_v11 = vpop.permute.xlu1 %2310 }
 0xce7   : > { %v2313_v19 = vpop.permute.xlu0 %2312  ;;  %v2369_v37 = vsel %vm523_vm0, %v2301_v30, %v2351_v41  ;;  %v2368_v50 = vsel %vm523_vm0, %v2300_v14, %v2350_v20 }
 0xce8   : > { %v2314_v34 = vsel %vm673_vm6, %v2311_v11, %v2313_v19  ;;  %v2315_v1 = vsel %vm673_vm6, %v2313_v19, %v2311_v11  ;;  %v4101_v5 = vpack.c.bf16 %v2369_v37, %v2367_v12  ;;  %v4103_v32 = vpack.c.bf16 %v2368_v50, %v2366_v26 }
 0xce9   : > { %v2316_v0 = vmul.f32 %v2314_v34, %v4526_v25  ;;  %v2317_v58 = vmul.f32 %v2315_v1, %v4503_v61 }
 0xcea   : > { %4102 = vmatprep.subr.bf16.mxu1 %v4101_v5  ;;  %v2327_v43 = vpop.permute.xlu1 %2326 }
 0xceb   : > { %v2329_v7 = vpop.permute.xlu0 %2328  ;;  %4104 = vmatpush1.bf16.msra.mxu1 %v4103_v32  ;;  %v2356_v41 = vrot.slane %v2316_v0, 4  ;;  %v2357_v14 = vrot.slane %v2317_v58, 4 }
 0xcec   : > { %v2330_v3 = vsel %vm707_vm8, %v2327_v43, %v2329_v7  ;;  %v2331_v24 = vsel %vm707_vm8, %v2329_v7, %v2327_v43 }
 0xced   : > { %v2332_v20 = vmul.f32 %v2330_v3, %v4544_v51  ;;  %v2333_v19 = vmul.f32 %v2331_v24, %v4546_v52  ;;  %v2371_v32 = vsel %vm523_vm0, %v5359_v28, %v2357_v14  ;;  %v2370_v0 = vsel %vm523_vm0, %v5357_v4, %v2356_v41  ;;  %v5497_v41 = vld [vmem:[%s6261_s8 + $0x90] sm:$0x3] }
 0xcee   : > { %v2319_v63 = vpop.permute.xlu1 %2318 }
 0xcef   : > { %v2321_v30 = vpop.permute.xlu0 %2320  ;;  %v2362_v12 = vrot.slane %v2332_v20, 4  ;;  %v2363_v37 = vrot.slane %v2333_v19, 4 }
 0xcf0   : > { %v2322_v34 = vsel %vm690_vm7, %v2319_v63, %v2321_v30  ;;  %v2323_v11 = vsel %vm690_vm7, %v2321_v30, %v2319_v63 }
 0xcf1   : > { %v2324_v26 = vmul.f32 %v2322_v34, %v4539_v45  ;;  %v2325_v50 = vmul.f32 %v2323_v11, %v4541_v49 }
 0xcf2   : > { %v2335_v1 = vpop.permute.xlu1 %2334 }
 0xcf3   : > { %v2337_v5 = vpop.permute.xlu0 %2336  ;;  %v2373_v43 = vsel %vm523_vm0, %v2325_v50, %v2363_v37  ;;  %v2372_v58 = vsel %vm523_vm0, %v2324_v26, %v2362_v12 }
 0xcf4   : > { %v2339_v7 = vsel %vm724_vm9, %v2337_v5, %v2335_v1  ;;  %v4105_v3 = vpack.c.bf16 %v2373_v43, %v2371_v32  ;;  %v4107_v24 = vpack.c.bf16 %v2372_v58, %v2370_v0  ;;  %v2338_v19 = vsel %vm724_vm9, %v2335_v1, %v2337_v5 }
 0xcf5   : > { %v2341_v20 = vmul.f32 %v4551_v53, %v2339_v7  ;;  %v2340_v4 = vmul.f32 %v4570_v6, %v2338_v19 }
 0xcf6   : > { %4106 = vmatprep.subr.bf16.mxu1 %v4105_v3  ;;  %v2814_v63 = vpop.permute.xlu1 %2813 }
 0xcf7   : > { %v2816_v28 = vpop.permute.xlu0 %2815  ;;  %4108 = vmatpush1.bf16.msra.mxu1 %v4107_v24 }
 0xcf8   : > { %4015 = vmatprep.subr.msk.mxu1 %vm523_vm0, %v2341_v20  ;;  %v2817_v34 = vsel %vm622_vm2, %v2814_v63, %v2816_v28  ;;  %v2818_v11 = vsel %vm622_vm2, %v2816_v28, %v2814_v63 }
 0xcf9   : > { %v2819_v1 = vmul.f32 %v2818_v11, %v4477_v47  ;;  %v2820_v5 = vmul.f32 %v2817_v34, %v4480_v48 }
 0xcfa   : > { %v2830_v14 = vpop.permute.xlu1 %2829 }
 0xcfb   : > { %v2832_v30 = vpop.permute.xlu0 %2831  ;;  %4016 = vmatpush1.msk.msra.mxu1 %vm523_vm0, %v2340_v4  ;;  %v2871_v19 = vrot.slane %v2819_v1, 4  ;;  %v2872_v63 = vrot.slane %v2820_v5, 4 }
 0xcfc   : > { %4017 = vmatmul.mubr.msk.f32.vlgmr.msra.gmra.mrb[6].mxu1 %vm1925_vm11, %v5497_v41  ;;  %v2833_v12 = vsel %vm656_vm5, %v2830_v14, %v2832_v30  ;;  %v2834_v37 = vsel %vm656_vm5, %v2832_v30, %v2830_v14 }
 0xcfd   : > { %2979 = vmatprep.mubr.f32.mxu1 %v6297_v38  ;;  %v2835_v0 = vmul.f32 %v2834_v37, %v4501_v59  ;;  %v2836_v58 = vmul.f32 %v2833_v12, %v4490_v54 }
 0xcfe   : > { %v2806_v26 = vpop.permute.xlu1 %2805 }
 0xcff   : > { %v2808_v50 = vpop.permute.xlu0 %2807  ;;  %v2877_v14 = vrot.slane %v2835_v0, 4  ;;  %v2878_v30 = vrot.slane %v2836_v58, 4 }
 0xd00   : > { %v2809_v32 = vsel %vm605_vm3, %v2806_v26, %v2808_v50  ;;  %v2810_v43 = vsel %vm605_vm3, %v2808_v50, %v2806_v26 }
 0xd01   : > { %v2811_v3 = vmul.f32 %v2810_v43, %v4496_v56  ;;  %v2812_v24 = vmul.f32 %v2809_v32, %v4493_v55 }
 0xd02   : > { %v2822_v7 = vpop.permute.xlu1 %2821 }
 0xd03   : > { %v2824_v20 = vpop.permute.xlu0 %2823  ;;  %v2894_v26 = vsel %vm523_vm0, %v2812_v24, %v2872_v63  ;;  %v2893_v1 = vsel %vm523_vm0, %v2811_v3, %v2871_v19 }
 0xd04   : > { %v2825_v28 = vsel %vm639_vm4, %v2822_v7, %v2824_v20  ;;  %v2826_v4 = vsel %vm639_vm4, %v2824_v20, %v2822_v7 }
 0xd05   : > { %v2827_v34 = vmul.f32 %v2826_v4, %v4520_v10  ;;  %v2828_v11 = vmul.f32 %v2825_v28, %v4499_v57 }
 0xd06   : > { %v2838_v12 = vpop.permute.xlu1 %2837 }
 0xd07   : > { %v2840_v37 = vpop.permute.xlu0 %2839  ;;  %v2896_v50 = vsel %vm523_vm0, %v2828_v11, %v2878_v30  ;;  %v2895_v5 = vsel %vm523_vm0, %v2827_v34, %v2877_v14 }
 0xd08   : > { %v2841_v32 = vsel %vm673_vm6, %v2838_v12, %v2840_v37  ;;  %v2842_v43 = vsel %vm673_vm6, %v2840_v37, %v2838_v12  ;;  %v4109_v0 = vpack.c.bf16 %v2896_v50, %v2894_v26  ;;  %v4111_v58 = vpack.c.bf16 %v2895_v5, %v2893_v1 }
 0xd09   : > { %v2843_v20 = vmul.f32 %v2841_v32, %v4526_v25  ;;  %v2844_v24 = vmul.f32 %v2842_v43, %v4503_v61 }
 0xd0a   : > { %4110 = vmatprep.subr.bf16.mxu1 %v4109_v0  ;;  %v2854_v7 = vpop.permute.xlu1 %2853 }
 0xd0b   : > { %v2856_v63 = vpop.permute.xlu0 %2855  ;;  %4112 = vmatpush1.bf16.msra.mxu1 %v4111_v58  ;;  %v2883_v30 = vrot.slane %v2843_v20, 4  ;;  %v2884_v34 = vrot.slane %v2844_v24, 4 }
 0xd0c   : > { %v2857_v3 = vsel %vm707_vm8, %v2854_v7, %v2856_v63  ;;  %v2858_v19 = vsel %vm707_vm8, %v2856_v63, %v2854_v7 }
 0xd0d   : > { %v2859_v28 = vmul.f32 %v2857_v3, %v4544_v51  ;;  %v2860_v4 = vmul.f32 %v2858_v19, %v4546_v52  ;;  %v2898_v0 = vsel %vm523_vm0, %v5395_v44, %v2884_v34  ;;  %v2897_v7 = vsel %vm523_vm0, %v5393_v36, %v2883_v30 }
 0xd0e   : > { %v2846_v14 = vpop.permute.xlu1 %2845 }
 0xd0f   : > { %v2848_v11 = vpop.permute.xlu0 %2847  ;;  %v2889_v26 = vrot.slane %v2859_v28, 4  ;;  %v2890_v50 = vrot.slane %v2860_v4, 4 }
 0xd10   : > { %v2849_v12 = vsel %vm690_vm7, %v2846_v14, %v2848_v11  ;;  %v2850_v37 = vsel %vm690_vm7, %v2848_v11, %v2846_v14 }
 0xd11   : > { %v2851_v1 = vmul.f32 %v2849_v12, %v4539_v45  ;;  %v2852_v5 = vmul.f32 %v2850_v37, %v4541_v49  ;;  %v3169_v37 = vld [vmem:[%s6261_s8 + $0x100] sm:$0xf] }
 0xd12   : > { %v2862_v32 = vpop.permute.xlu1 %2861 }
 0xd13   : > { %v2864_v43 = vpop.permute.xlu0 %2863  ;;  %v2900_v58 = vsel %vm523_vm0, %v2852_v5, %v2890_v50  ;;  %v2899_v20 = vsel %vm523_vm0, %v2851_v1, %v2889_v26  ;;  %v6304_v26 = vmov 127   ;;  %v5613_v50 = vld [vmem:[%s6261_s8 + $0xc0] sm:$0xf] }
 0xd14   : > { %v2866_v24 = vsel %vm724_vm9, %v2864_v43, %v2862_v32  ;;  %v4113_v63 = vpack.c.bf16 %v2900_v58, %v2898_v0  ;;  %v4115_v3 = vpack.c.bf16 %v2899_v20, %v2897_v7  ;;  %v2865_v28 = vsel %vm724_vm9, %v2862_v32, %v2864_v43 }
 0xd15   : > { %v2868_v19 = vmul.f32 %v4551_v53, %v2866_v24  ;;  %v2867_v44 = vmul.f32 %v4570_v6, %v2865_v28 }
 0xd16   : > { %4114 = vmatprep.subr.bf16.mxu1 %v4113_v63 }
 0xd17   : > { %4116 = vmatpush1.bf16.msra.mxu1 %v4115_v3 }
 0xd18   : > { %4021 = vmatprep.subr.msk.mxu1 %vm523_vm0, %v2868_v19 }
 0xd1b   : > { %4022 = vmatpush1.msk.msra.mxu1 %vm523_vm0, %v2867_v44 }
 0xd1c   : > { %4023 = vmatmul.mubr.msk.f32.vlgmr.msra.gmra.mrb[8].mxu1 %vm1925_vm11, %v5432_v42  ;;  %v4277_v42 = vmov 1  }
 0xd1d   : > { %3438 = vmatprep.mubr.f32.mxu1 %v6297_v38  ;;  %4203 = vset.pattern.permute.xlu1 %v4277_v42 }
 0xd23   : > { %v2905_v14 = vpop.permute.xlu1 %2904 }
 0xdcf   : > { %v5566_v36 = vpop.f32.mrb[6].mxu1 }
 0xdd0   : > { %v5568_v4 = vpop.f32.mrb[7].mxu1 }
 0xdd1   : > { %6303 = vst [vmem:[#allocation8_spill] sm:$0xff] %v5568_v4 }
 0xdef   : > { %v2981_v30 = vpop.f32.mrb[8].mxu1 }
 0xdf0   : > { %v5570_v34 = vadd.f32 %v2981_v30, %v2905_v14  ;;  %v2983_v11 = vpop.f32.mrb[9].mxu1 }
 0xdf1   : > { %v5572_v12 = vadd.f32 %v2983_v11, %v2905_v14 }
 0xdf2   : > { %2994 = vrot.lane.b32.xlu0 %v5570_v34, %s4268_s11 }
 0xdf3   : > { %2996 = vrot.lane.b32.xlu1 %v5572_v12, %s4268_s11 }
 0xdf6   : > { %3010 = vrot.lane.b32.xlu0 %v5570_v34, %s4271_s15 }
 0xdf7   : > { %3012 = vrot.lane.b32.xlu1 %v5572_v12, %s4271_s15 }
 0xdfa   : > { %2986 = vrot.lane.b32.xlu0 %v5570_v34, %s4269_s12 }
 0xdfb   : > { %2988 = vrot.lane.b32.xlu1 %v5572_v12, %s4269_s12 }
 0xdfe   : > { %3002 = vrot.lane.b32.xlu0 %v5570_v34, %s4270_s14 }
 0xdff   : > { %3004 = vrot.lane.b32.xlu1 %v5572_v12, %s4270_s14 }
 0xe02   : > { %3018 = vrot.lane.b32.xlu0 %v5570_v34, %s4272_s16 }
 0xe03   : > { %3020 = vrot.lane.b32.xlu1 %v5572_v12, %s4272_s16 }
 0xe06   : > { %3034 = vrot.lane.b32.xlu0 %v5570_v34, %s6291_s19 }
 0xe07   : > { %3036 = vrot.lane.b32.xlu1 %v5572_v12, %s6291_s19  ;;  %s6309_s19 = smov 111  }
 0xe0a   : > { %3026 = vrot.lane.b32.xlu0 %v5570_v34, %s6293_s18 }
 0xe0b   : > { %3028 = vrot.lane.b32.xlu1 %v5572_v12, %s6293_s18  ;;  %s462_s18 = scalar_lea.vmem %s6259_s6, %s4354_s17 }
 0xe0e   : > { %3042 = vrot.lane.b32.xlu0 %v5570_v34, %s6289_s21 }
 0xe0f   : > { %3044 = vrot.lane.b32.xlu1 %v5572_v12, %s6289_s21 }
 0xe12   : > { %3173 = vperm.xlu0 %4202, %v3169_v37  }
 0xe13   : > { %3185 = vperm.xlu1 %4203, %v3169_v37  }
 0xe16   : > { %4205 = vset.pattern.permute.xlu0 %v6304_v26 }
 0xe17   : > { %4204 = vset.pattern.permute.xlu1 %v6304_v26 }
 0xe18   : > { %3085 = vperm.xlu1 %4204, %v5613_v50  }
 0xe1c   : > { %4206 = vset.pattern.permute.xlu1 %v6298_v21 }
 0xe64   : > { %v2995_v1 = vpop.permute.xlu0 %2994 }
 0xe65   : > { %v2997_v5 = vpop.permute.xlu1 %2996 }
 0xe66   : > { %v2998_v0 = vsel %vm622_vm2, %v2995_v1, %v2997_v5  ;;  %v2999_v58 = vsel %vm622_vm2, %v2997_v5, %v2995_v1 }
 0xe67   : > { %v3000_v3 = vmul.f32 %v2999_v58, %v4477_v47  ;;  %v3001_v19 = vmul.f32 %v2998_v0, %v4480_v48 }
 0xe68   : > { %v3011_v32 = vpop.permute.xlu0 %3010 }
 0xe69   : > { %v3013_v43 = vpop.permute.xlu1 %3012  ;;  %v3052_v5 = vrot.slane %v3000_v3, 4 }
 0xe6a   : > { %v3014_v7 = vsel %vm656_vm5, %v3011_v32, %v3013_v43  ;;  %v3015_v20 = vsel %vm656_vm5, %v3013_v43, %v3011_v32  ;;  %v3053_v32 = vrot.slane %v3001_v19, 4 }
 0xe6b   : > { %v3016_v14 = vmul.f32 %v3015_v20, %v4501_v59  ;;  %v3017_v30 = vmul.f32 %v3014_v7, %v4490_v54 }
 0xe6c   : > { %v2987_v24 = vpop.permute.xlu0 %2986 }
 0xe6d   : > { %v2989_v63 = vpop.permute.xlu1 %2988  ;;  %v3058_v58 = vrot.slane %v3016_v14, 4 }
 0xe6e   : > { %v2990_v28 = vsel %vm605_vm3, %v2987_v24, %v2989_v63  ;;  %v2991_v44 = vsel %vm605_vm3, %v2989_v63, %v2987_v24  ;;  %v3059_v24 = vrot.slane %v3017_v30, 4 }
 0xe6f   : > { %v2992_v42 = vmul.f32 %v2991_v44, %v4496_v56  ;;  %v2993_v37 = vmul.f32 %v2990_v28, %v4493_v55 }
 0xe70   : > { %v3003_v11 = vpop.permute.xlu0 %3002 }
 0xe71   : > { %v3005_v1 = vpop.permute.xlu1 %3004  ;;  %v3075_v28 = vsel %vm523_vm0, %v2993_v37, %v3053_v32  ;;  %v3074_v19 = vsel %vm523_vm0, %v2992_v42, %v3052_v5 }
 0xe72   : > { %v3006_v43 = vsel %vm639_vm4, %v3003_v11, %v3005_v1  ;;  %v3007_v0 = vsel %vm639_vm4, %v3005_v1, %v3003_v11 }
 0xe73   : > { %v3008_v20 = vmul.f32 %v3007_v0, %v4520_v10  ;;  %v3009_v7 = vmul.f32 %v3006_v43, %v4499_v57 }
 0xe74   : > { %v3019_v63 = vpop.permute.xlu0 %3018 }
 0xe75   : > { %v3076_v44 = vsel %vm523_vm0, %v3008_v20, %v3058_v58  ;;  %v3021_v26 = vpop.permute.xlu1 %3020  ;;  %v3077_v3 = vsel %vm523_vm0, %v3009_v7, %v3059_v24 }
 0xe76   : > { %v3022_v4 = vsel %vm673_vm6, %v3019_v63, %v3021_v26  ;;  %v3023_v14 = vsel %vm673_vm6, %v3021_v26, %v3019_v63  ;;  %v4117_v30 = vpack.c.bf16 %v3077_v3, %v3075_v28  ;;  %v4119_v11 = vpack.c.bf16 %v3076_v44, %v3074_v19 }
 0xe77   : > { %v3024_v43 = vmul.f32 %v3022_v4, %v4526_v25  ;;  %v3025_v0 = vmul.f32 %v3023_v14, %v4503_v61 }
 0xe78   : > { %4118 = vmatprep.subr.bf16.mxu0 %v4117_v30  ;;  %v3035_v1 = vpop.permute.xlu0 %3034 }
 0xe79   : > { %v3037_v58 = vpop.permute.xlu1 %3036  ;;  %4120 = vmatpush1.bf16.msra.mxu0 %v4119_v11  ;;  %v3064_v24 = vrot.slane %v3024_v43, 4  ;;  %v3065_v20 = vrot.slane %v3025_v0, 4 }
 0xe7a   : > { %v3038_v37 = vsel %vm707_vm8, %v3035_v1, %v3037_v58  ;;  %v3039_v42 = vsel %vm707_vm8, %v3037_v58, %v3035_v1 }
 0xe7b   : > { %v3040_v5 = vmul.f32 %v3038_v37, %v4544_v51  ;;  %v3041_v26 = vmul.f32 %v3039_v42, %v4546_v52  ;;  %v3078_v30 = vsel %vm523_vm0, %v5570_v34, %v3064_v24  ;;  %v3079_v43 = vsel %vm523_vm0, %v5572_v12, %v3065_v20  ;;  %v3213_v24 = vld [vmem:[%s458_s27] sm:$0x3] }
 0xe7c   : > { %v3027_v32 = vpop.permute.xlu0 %3026  ;;  %v4028_v20 = vmul.f32 -1.442695, %v3213_v24 }
 0xe7d   : > { %v3029_v7 = vpop.permute.xlu1 %3028  ;;  %v3070_v44 = vrot.slane %v3040_v5, 4  ;;  %v3071_v28 = vrot.slane %v3041_v26, 4  ;;  %v3205_v26 = vld [vmem:[%s454_s22] sm:$0x3] }
 0xe7e   : > { %v3030_v4 = vsel %vm690_vm7, %v3027_v32, %v3029_v7  ;;  %v3031_v63 = vsel %vm690_vm7, %v3029_v7, %v3027_v32  ;;  %v4027_v32 = vmul.f32 -1.442695, %v3205_v26 }
 0xe7f   : > { %v3032_v3 = vmul.f32 %v3030_v4, %v4539_v45  ;;  %v3033_v19 = vmul.f32 %v3031_v63, %v4541_v49 }
 0xe80   : > { %v3043_v14 = vpop.permute.xlu0 %3042  ;;  %4234 = vpow2.f32 %v4027_v32 }
 0xe81   : > { %v3080_v11 = vsel %vm523_vm0, %v3032_v3, %v3070_v44  ;;  %v3045_v1 = vpop.permute.xlu1 %3044  ;;  %v3081_v0 = vsel %vm523_vm0, %v3033_v19, %v3071_v28  ;;  %4236 = vpow2.f32 %v4028_v20  ;;  %v4278_v44 = vmov 839922192  }
 0xe82   : > { %v3047_v58 = vsel %vm724_vm9, %v3045_v1, %v3043_v14  ;;  %v4121_v37 = vpack.c.bf16 %v3081_v0, %v3079_v43  ;;  %v4123_v42 = vpack.c.bf16 %v3080_v11, %v3078_v30  ;;  %v3046_v34 = vsel %vm724_vm9, %v3043_v14, %v3045_v1 }
 0xe83   : > { %v3049_v5 = vmul.f32 %v4551_v53, %v3047_v58  ;;  %v3048_v12 = vmul.f32 %v4570_v6, %v3046_v34  ;;  %v3176_v28 = vunpack.c.l.s4 %v4278_v44  ;;  %v3202_v14 = vsub.f32 6.0, %v4380_v17  ;;  %v6305_v58 = vld [vmem:[#allocation2_spill] sm:$0xff] }
 0xe84   : > { %4122 = vmatprep.subr.bf16.mxu0 %v4121_v37 }
 0xe85   : > { %4124 = vmatpush1.bf16.msra.mxu0 %v4123_v42  ;;  %v3177_v30 = vunpack.c.0.s8 %v3176_v28  ;;  %v3203_v1 = vsub.f32 %v3202_v14, %v4382_v18  ;;  %v6306_v14 = vld [vmem:[#allocation3_spill] sm:$0xff] }
 0xe86   : > { %4024 = vmatprep.subr.msk.mxu0 %vm523_vm0, %v3049_v5  ;;  %v3170_v5 = vand.u32 2147483647, %v4404_v29 }
 0xe87   : > { %v3180_v43 = vsub.s32 %v3177_v30, %v4378_v16  ;;  %v3204_v37 = vsub.f32 %v3203_v1, %v6305_v58 }
 0xe89   : > { %4025 = vmatpush1.msk.msra.mxu0 %vm523_vm0, %v3048_v12 }
 0xe8a   : > { %4026 = vmatmul.mubr.msk.f32.vlgmr.msra.gmra.mrb[18].mxu0 %vm1925_vm11, %v5613_v50  ;;  %v3221_v50 = vld [vmem:[%s462_s18] sm:$0x3]  ;;  %v4235_v7 = vpop.eup %4234  ;;  %s6308_s18 = smov 112   ;;  %vm4150_vm11 = vmpackc.low %vm523_vm0, %vm4279_vm1 }
 0xe8b   : > { %3581 = vmatprep.mubr.f32.mxu0 %v6297_v38  ;;  %v4029_v38 = vmul.f32 -1.442695, %v3221_v50  ;;  %v3209_v4 = vadd.f32 1.0, %v4235_v7  ;;  %v4237_v63 = vpop.eup %4236  ;;  %vm6327_vm1 = vmmov %vm6326_vm12 }
 0xe8c   : > { %v3217_v3 = vadd.f32 1.0, %v4237_v63 }
 0xe8d   : > { %4238 = vpow2.f32 %v4029_v38 }
 0xe8e   : > { %4240 = vrcp.f32 %v3209_v4 }
 0xe8f   : > { %4242 = vrcp.f32 %v3217_v3 }
 0xe91   : > { %v3174_v0 = vpop.permute.xlu0 %3173 }
 0xe92   : > { %v3181_v34 = vrot.slane %v3174_v0, %v3180_v43  ;;  %v3186_v12 = vpop.permute.xlu1 %3185 }
 0xe93   : > { %v3193_v24 = vrot.slane %v3186_v12, %v3180_v43 }
 0xe94   : > { %v3183_v17 = vmul.f32 %v3181_v34, %v3170_v5 }
 0xe96   : > { %v3195_v38 = vadd.f32 %v3193_v24, %v3183_v17  ;;  %v5742_v17 = vld [vmem:[%s6261_s8 + $0xc8] sm:$0xff] }
 0xe97   : > { %v4239_v19 = vpop.eup %4238  ;;  %v3086_v4 = vpop.permute.xlu1 %3085 }
 0xe98   : > { %v3225_v11 = vadd.f32 1.0, %v4239_v19  ;;  %v4241_v42 = vpop.eup %4240  ;;  %v3196_v7 = vmax.f32 %v3195_v38, 0.0 }
 0xe99   : > { %v3212_v26 = vsub.f32 %v3204_v37, %v4241_v42  ;;  %v4243_v32 = vpop.eup %4242 }
 0xe9a   : > { %4244 = vrcp.f32 %v3225_v11  ;;  %v3198_v29 = vcombine.high %v3196_v7, %v3196_v7  ;;  %v4250_v11 = vld [vmem:[%s4398_s30] sm:$0xff]  ;;  %s6307_s30 = smov 113  }
 0xe9b   : > { %v3220_v20 = vsub.f32 %v3212_v26, %v4243_v32  ;;  %v3241_v1 = vcombine.high %v4250_v11, %v4250_v11 }
 0xea4   : > { %v4245_v50 = vpop.eup %4244 }
 0xea5   : > { %v3228_v18 = vsub.f32 %v3220_v20, %v4245_v50 }
 0xea7   : > { %v3233_v28 = vrot.slane %v3228_v18, %v4390_v22  ;;  %v3237_v30 = vrot.slane %v3228_v18, %v6306_v14 }
 0xea9   : > { %v3243_v37 = vmul.f32 %v4250_v11, %v3233_v28  ;;  %v3244_v5 = vmul.f32 %v3241_v1, %v3237_v30 }
 0xf5d   : > { %v3162_v63 = vpop.f32.mrb[18].mxu0 }
 0xf5e   : > { %v3163_v44 = vadd.f32 %v3162_v63, %v3086_v4  ;;  %v3164_v3 = vpop.f32.mrb[19].mxu0 }
 0xf5f   : > { %v3165_v19 = vadd.f32 %v3164_v3, %v3086_v4 }
 0xf60   : > { %v3167_v0 = vmax.f32 %v3163_v44, 0.0 }
 0xf61   : > { %v3168_v58 = vmax.f32 %v3165_v19, 0.0 }
 0xf62   : > { %v3200_v43 = vadd.f32 %v3196_v7, %v3167_v0 }
 0xf63   : > { %v3201_v42 = vadd.f32 %v3198_v29, %v3168_v58 }
 0xf64   : > { %v3247_v34 = vrot.slane %v3200_v43, 4 }
 0xf65   : > { %v3248_v12 = vrot.slane %v3201_v42, 4 }
 0xf66   : > { %v5702_v26 = vsel %vm523_vm0, %v3243_v37, %v3247_v34 }
 0xf67   : > { %v5705_v32 = vsel %vm523_vm0, %v3244_v5, %v3248_v12  ;;  %3261 = vrot.lane.b32.xlu0 %v5702_v26, %s4268_s11  ;;  %v6310_v12 = vrot.slane %v5232_v39, 4 }
 0xf68   : > { %3263 = vrot.lane.b32.xlu1 %v5705_v32, %s4268_s11 }
 0xf6b   : > { %3253 = vrot.lane.b32.xlu0 %v5702_v26, %s4269_s12 }
 0xf6c   : > { %3255 = vrot.lane.b32.xlu1 %v5705_v32, %s4269_s12 }
 0xf6f   : > { %3269 = vrot.lane.b32.xlu0 %v5702_v26, %s4270_s14 }
 0xf70   : > { %3271 = vrot.lane.b32.xlu1 %v5705_v32, %s4270_s14 }
 0xf73   : > { %3277 = vrot.lane.b32.xlu0 %v5702_v26, %s4271_s15 }
 0xf74   : > { %3279 = vrot.lane.b32.xlu1 %v5705_v32, %s4271_s15 }
 0xf77   : > { %3285 = vrot.lane.b32.xlu0 %v5702_v26, %s4272_s16 }
 0xf78   : > { %3287 = vrot.lane.b32.xlu1 %v5705_v32, %s4272_s16 }
 0xf7b   : > { %3293 = vrot.lane.b32.xlu0 %v5702_v26, %s6307_s30 }
 0xf7c   : > { %3295 = vrot.lane.b32.xlu1 %v5705_v32, %s6307_s30 }
 0xf7f   : > { %3301 = vrot.lane.b32.xlu0 %v5702_v26, %s6308_s18 }
 0xf80   : > { %3303 = vrot.lane.b32.xlu1 %v5705_v32, %s6308_s18 }
 0xf83   : > { %3309 = vrot.lane.b32.xlu0 %v5702_v26, %s6309_s19 }
 0xf84   : > { %3311 = vrot.lane.b32.xlu1 %v5705_v32, %s6309_s19 }
 0xf87   : > { %3368 = vperm.xlu0 %4205, %v5742_v17  }
 0xfd9   : > { %v3262_v24 = vpop.permute.xlu0 %3261 }
 0xfda   : > { %v3264_v20 = vpop.permute.xlu1 %3263 }
 0xfdb   : > { %v3265_v50 = vsel %vm622_vm2, %v3262_v24, %v3264_v20  ;;  %v3266_v38 = vsel %vm622_vm2, %v3264_v20, %v3262_v24 }
 0xfdc   : > { %v3267_v18 = vmul.f32 %v3266_v38, %v4477_v47  ;;  %v3268_v7 = vmul.f32 %v3265_v50, %v4480_v48 }
 0xfdd   : > { %v3254_v4 = vpop.permute.xlu0 %3253 }
 0xfde   : > { %v3319_v63 = vrot.slane %v3267_v18, 4  ;;  %v3320_v44 = vrot.slane %v3268_v7, 4  ;;  %v3256_v28 = vpop.permute.xlu1 %3255 }
 0xfdf   : > { %v3257_v3 = vsel %vm605_vm3, %v3254_v4, %v3256_v28  ;;  %v3258_v19 = vsel %vm605_vm3, %v3256_v28, %v3254_v4 }
 0xfe0   : > { %v3357_v29 = vsel %vm523_vm0, %v5248_v8, %v3319_v63  ;;  %v3259_v30 = vmul.f32 %v3258_v19, %v4496_v56  ;;  %v3260_v11 = vmul.f32 %v3257_v3, %v4493_v55  ;;  %v3358_v0 = vsel %vm523_vm0, %v5251_v9, %v3320_v44 }
 0xfe1   : > { %v3270_v1 = vpop.permute.xlu0 %3269  ;;  %v3321_v24 = vsel %vm523_vm0, %v3319_v63, %v6310_v12  ;;  %v6311_v9 = vrot.slane %v5235_v27, 4 }
 0xfe2   : > { %v4127_v58 = vpack.c.bf16 %v3357_v29, %v3259_v30  ;;  %v3272_v43 = vpop.permute.xlu1 %3271  ;;  %v4125_v37 = vpack.c.bf16 %v3358_v0, %v3260_v11  ;;  %v6312_v11 = vrot.slane %v5242_v35, 4 }
 0xfe3   : > { %v3273_v42 = vsel %vm639_vm4, %v3270_v1, %v3272_v43  ;;  %v3274_v5 = vsel %vm639_vm4, %v3272_v43, %v3270_v1  ;;  %v3322_v50 = vsel %vm523_vm0, %v3320_v44, %v6311_v9 }
 0xfe4   : > { %v3275_v34 = vmul.f32 %v3274_v5, %v4520_v10  ;;  %v3276_v8 = vmul.f32 %v3273_v42, %v4499_v57  ;;  %4126 = vmatprep.subr.bf16.mxu1 %v4125_v37  ;;  %v6313_v42 = vrot.slane %v5245_v60, 4 }
 0xfe5   : > { %v3278_v20 = vpop.permute.xlu0 %3277  ;;  %4128 = vmatpush1.bf16.msra.mxu1 %v4127_v58 }
 0xfe6   : > { %v4131_v38 = vpack.c.bf16 %v3275_v34, %v3321_v24  ;;  %v3280_v18 = vpop.permute.xlu1 %3279  ;;  %v4129_v7 = vpack.c.bf16 %v3276_v8, %v3322_v50 }
 0xfe7   : > { %v3281_v4 = vsel %vm656_vm5, %v3278_v20, %v3280_v18  ;;  %v3282_v28 = vsel %vm656_vm5, %v3280_v18, %v3278_v20 }
 0xfe8   : > { %v3283_v3 = vmul.f32 %v3282_v28, %v4501_v59  ;;  %v3284_v39 = vmul.f32 %v3281_v4, %v4490_v54  ;;  %4130 = vmatprep.subr.bf16.mxu1 %v4129_v7  ;;  %v6314_v7 = vrot.slane %v5291_v46, 4 }
 0xfe9   : > { %v3286_v63 = vpop.permute.xlu0 %3285  ;;  %4132 = vmatpush1.bf16.msra.mxu1 %v4131_v38 }
 0xfea   : > { %v3329_v19 = vrot.slane %v3283_v3, 4  ;;  %v3330_v27 = vrot.slane %v3284_v39, 4  ;;  %v3288_v29 = vpop.permute.xlu1 %3287 }
 0xfeb   : > { %v3289_v44 = vsel %vm673_vm6, %v3286_v63, %v3288_v29  ;;  %v3290_v30 = vsel %vm673_vm6, %v3288_v29, %v3286_v63 }
 0xfec   : > { %v3331_v1 = vsel %vm523_vm0, %v3329_v19, %v6312_v11  ;;  %v3359_v0 = vsel %vm523_vm0, %v5262_v2, %v3329_v19  ;;  %v3291_v58 = vmul.f32 %v3289_v44, %v4526_v25  ;;  %v3292_v43 = vmul.f32 %v3290_v30, %v4503_v61 }
 0xfed   : > { %v3294_v37 = vpop.permute.xlu0 %3293  ;;  %v3332_v5 = vsel %vm523_vm0, %v3330_v27, %v6313_v42  ;;  %v3360_v34 = vsel %vm523_vm0, %v5265_v15, %v3330_v27  ;;  %v4135_v8 = vpack.c.bf16 %v3331_v1, %v3359_v0  ;;  %v6316_v0 = vrot.slane %v5298_v62, 4  ;;  %v6317_v42 = vld [vmem:[#allocation4_spill] sm:$0xff]  ;;  %v6320_v62 = vld [vmem:[#allocation6_spill] sm:$0xff] }
 0xfee   : > { %v3339_v12 = vrot.slane %v3291_v58, 4  ;;  %v3340_v35 = vrot.slane %v3292_v43, 4  ;;  %v3296_v24 = vpop.permute.xlu1 %3295  ;;  %v4133_v20 = vpack.c.bf16 %v3332_v5, %v3360_v34  ;;  %v6318_v5 = vrot.slane %v6317_v42, 4 }
 0xfef   : > { %v3298_v2 = vsel %vm690_vm7, %v3296_v24, %v3294_v37  ;;  %v3297_v50 = vsel %vm690_vm7, %v3294_v37, %v3296_v24 }
 0xff0   : > { %v3361_v9 = vsel %vm523_vm0, %v5174_v31, %v3339_v12  ;;  %v3300_v60 = vmul.f32 %v3298_v2, %v4541_v49  ;;  %4134 = vmatprep.subr.bf16.mxu1 %v4133_v20  ;;  %v3362_v15 = vsel %vm523_vm0, %v5176_v13, %v3340_v35  ;;  %v3342_v4 = vsel %vm523_vm0, %v3340_v35, %v6314_v7 }
 0xff1   : > { %4136 = vmatpush1.bf16.msra.mxu1 %v4135_v8  ;;  %v3302_v38 = vpop.permute.xlu0 %3301  ;;  %v4139_v18 = vpack.c.bf16 %v3361_v9, %v5702_v26  ;;  %v4137_v31 = vpack.c.bf16 %v3362_v15, %v5705_v32  ;;  %v3299_v39 = vmul.f32 %v3297_v50, %v4539_v45  ;;  %v6315_v13 = vrot.slane %v5288_v33, 4  ;;  %v6319_v8 = vld [vmem:[#allocation5_spill] sm:$0xff] }
 0xff2   : > { %v3304_v28 = vpop.permute.xlu1 %3303  ;;  %v4141_v3 = vpack.c.bf16 %v3300_v60, %v3342_v4 }
 0xff3   : > { %v3305_v63 = vsel %vm707_vm8, %v3302_v38, %v3304_v28  ;;  %v3306_v19 = vsel %vm707_vm8, %v3304_v28, %v3302_v38  ;;  %v3341_v26 = vsel %vm523_vm0, %v3339_v12, %v6315_v13  ;;  %4138 = vmatprep.subr.bf16.mxu1 %v4137_v31 }
 0xff4   : > { %v3307_v46 = vmul.f32 %v3305_v63, %v4544_v51  ;;  %v3308_v27 = vmul.f32 %v3306_v19, %v4546_v52  ;;  %v4143_v11 = vpack.c.bf16 %v3299_v39, %v3341_v26 }
 0xff5   : > { %4140 = vmatpush1.bf16.msra.mxu1 %v4139_v18  ;;  %v3310_v32 = vpop.permute.xlu0 %3309 }
 0xff6   : > { %v3349_v29 = vrot.slane %v3307_v46, 4  ;;  %v3350_v44 = vrot.slane %v3308_v27, 4  ;;  %4142 = vmatprep.subr.bf16.mxu1 %v4141_v3  ;;  %v3312_v30 = vpop.permute.xlu1 %3311 }
 0xff7   : > { %v3314_v1 = vsel %vm724_vm9, %v3312_v30, %v3310_v32  ;;  %v3313_v43 = vsel %vm724_vm9, %v3310_v32, %v3312_v30 }
 0xff8   : > { %v3351_v33 = vsel %vm523_vm0, %v3349_v29, %v6316_v0  ;;  %v3363_v58 = vsel %vm523_vm0, %v5312_v23, %v3349_v29  ;;  %v3316_v37 = vmul.f32 %v4551_v53, %v3314_v1  ;;  %v3352_v34 = vsel %vm523_vm0, %v3350_v44, %v6318_v5  ;;  %v6321_v23 = vld [vmem:[#allocation7_spill] sm:$0xff] }
 0xff9   : > { %4144 = vmatpush1.bf16.msra.mxu1 %v4143_v11  ;;  %v3364_v12 = vsel %vm523_vm0, %v6319_v8, %v3350_v44  ;;  %v4147_v35 = vpack.c.bf16 %v3351_v33, %v3363_v58  ;;  %v3315_v2 = vmul.f32 %v4570_v6, %v3313_v43 }
 0xffa   : > { %v4149_v24 = vpack.c.bf16 %v6320_v62, %v3316_v37  ;;  %v4145_v20 = vpack.c.bf16 %v3352_v34, %v3364_v12 }
 0xffb   : > { %v4152_v9 = vpack.c.bf16 %v6321_v23, %v3315_v2 }
 0xffc   : > { %4146 = vmatprep.subr.bf16.mxu1 %v4145_v20 }
 0xffd   : > { %4148 = vmatpush1.bf16.msra.mxu1 %v4147_v35 }
 0xffe   : > { %4151 = vmatprep.subr.msk.bf16.mxu1 %vm4150_vm11, %v4149_v24 }
0x1001   : > { %4154 = vmatpush1.bf16.msk.msra.mxu1 %vm4150_vm11, %v4152_v9  ;;  %vm6328_vm11 = vmmov %vm6327_vm1 }
0x1004   : > { %4032 = vmatmul.mubr.msk.f32.vlgmr.msra.gmra.mrb[10].mxu1 %vm3371_vm13, %v5742_v17  ;;  %vm6329_vm13 = vmmov %vm6327_vm1 }
0x1006   : > { %v3369_v50 = vpop.permute.xlu0 %3368 }
0x10d7   : > { %v3440_v60 = vpop.f32.mrb[10].mxu1 }
0x10d8   : > { %v5839_v38 = vadd.f32 %v3440_v60, %v3369_v50  ;;  %v3442_v15 = vpop.f32.mrb[11].mxu1 }
0x10d9   : > { %v3443_v18 = vadd.f32 %v3442_v15, %v3369_v50 }
0x10da   : > { %3453 = vrot.lane.b32.xlu0 %v5839_v38, %s4268_s11  ;;  %3445 = vrot.lane.b32.xlu1 %v5839_v38, %s4269_s12 }
0x10de   : > { %3461 = vrot.lane.b32.xlu0 %v5839_v38, %s4270_s14  ;;  %3447 = vrot.lane.b32.xlu1 %v3443_v18, %s4269_s12 }
0x10e2   : > { %3469 = vrot.lane.b32.xlu0 %v5839_v38, %s4271_s15  ;;  %3455 = vrot.lane.b32.xlu1 %v3443_v18, %s4268_s11 }
0x10e6   : > { %3477 = vrot.lane.b32.xlu0 %v5839_v38, %s4272_s16  ;;  %3463 = vrot.lane.b32.xlu1 %v3443_v18, %s4270_s14 }
0x10ea   : > { %3485 = vrot.lane.b32.xlu0 %v5839_v38, %s6307_s30  ;;  %3471 = vrot.lane.b32.xlu1 %v3443_v18, %s4271_s15 }
0x10ee   : > { %3493 = vrot.lane.b32.xlu0 %v5839_v38, %s6308_s18  ;;  %3479 = vrot.lane.b32.xlu1 %v3443_v18, %s4272_s16 }
0x10f2   : > { %3501 = vrot.lane.b32.xlu0 %v5839_v38, %s6309_s19  ;;  %3487 = vrot.lane.b32.xlu1 %v3443_v18, %s6307_s30 }
0x10f6   : > { %2377 = vperm.xlu0 %4205, %v5497_v41   ;;  %3495 = vrot.lane.b32.xlu1 %v3443_v18, %s6308_s18 }
0x10fa   : > { %3503 = vrot.lane.b32.xlu1 %v3443_v18, %s6309_s19  ;;  %4207 = vset.pattern.permute.xlu0 %v6298_v21 }
0x114c   : > { %v3454_v17 = vpop.permute.xlu0 %3453  ;;  %v3446_v7 = vpop.permute.xlu1 %3445 }
0x1150   : > { %v3462_v4 = vpop.permute.xlu0 %3461  ;;  %v3448_v28 = vpop.permute.xlu1 %3447 }
0x1151   : > { %v3449_v31 = vsel %vm605_vm3, %v3446_v7, %v3448_v28  ;;  %v3450_v3 = vsel %vm605_vm3, %v3448_v28, %v3446_v7 }
0x1152   : > { %v3451_v13 = vmul.f32 %v3450_v3, %v4496_v56  ;;  %v3452_v26 = vmul.f32 %v3449_v31, %v4493_v55 }
0x1154   : > { %v3470_v39 = vpop.permute.xlu0 %3469  ;;  %v3456_v63 = vpop.permute.xlu1 %3455 }
0x1155   : > { %v3457_v41 = vsel %vm622_vm2, %v3454_v17, %v3456_v63  ;;  %v3458_v19 = vsel %vm622_vm2, %v3456_v63, %v3454_v17 }
0x1156   : > { %v3459_v46 = vmul.f32 %v3458_v19, %v4477_v47  ;;  %v3460_v27 = vmul.f32 %v3457_v41, %v4480_v48 }
0x1158   : > { %v4157_v32 = vpack.c.bf16 %v3459_v46, %v3451_v13  ;;  %v3464_v29 = vpop.permute.xlu1 %3463  ;;  %v4155_v44 = vpack.c.bf16 %v3460_v27, %v3452_v26  ;;  %v3478_v30 = vpop.permute.xlu0 %3477 }
0x1159   : > { %v3465_v11 = vsel %vm639_vm4, %v3462_v4, %v3464_v29  ;;  %v3466_v1 = vsel %vm639_vm4, %v3464_v29, %v3462_v4 }
0x115a   : > { %4156 = vmatprep.subr.bf16.mxu0 %v4155_v44  ;;  %v3467_v43 = vmul.f32 %v3466_v1, %v4520_v10  ;;  %v3468_v37 = vmul.f32 %v3465_v11, %v4499_v57 }
0x115b   : > { %4158 = vmatpush1.bf16.msra.mxu0 %v4157_v32  ;;  %v3509_v32 = vld [vmem:[%s6261_s8 + $0xd0] sm:$0xf] }
0x115c   : > { %v3472_v0 = vpop.permute.xlu1 %3471  ;;  %v3486_v34 = vpop.permute.xlu0 %3485 }
0x115d   : > { %v3473_v33 = vsel %vm656_vm5, %v3470_v39, %v3472_v0  ;;  %v3474_v58 = vsel %vm656_vm5, %v3472_v0, %v3470_v39 }
0x115e   : > { %v3475_v42 = vmul.f32 %v3474_v58, %v4501_v59  ;;  %v3476_v5 = vmul.f32 %v3473_v33, %v4490_v54  ;;  %v2573_v33 = vld [vmem:[%s6261_s8 + $0x98] sm:$0xff]  ;;  %v6324_v58 = vmov 127  }
0x1160   : > { %v4161_v8 = vpack.c.bf16 %v3475_v42, %v3467_v43  ;;  %v3480_v12 = vpop.permute.xlu1 %3479  ;;  %v4159_v35 = vpack.c.bf16 %v3476_v5, %v3468_v37  ;;  %v3494_v60 = vpop.permute.xlu0 %3493  ;;  %v2575_v43 = vld [vmem:[%s6261_s8 + $0xa8] sm:$0x3]  ;;  %v2576_v37 = vld [vmem:[%s6261_s8 + $0x98] sm:$0x1]  ;;  %v3689_v5 = vld [vmem:[%s6261_s8 + $0xf0] sm:$0xff] }
0x1161   : > { %v3481_v62 = vsel %vm673_vm6, %v3478_v30, %v3480_v12  ;;  %v3482_v24 = vsel %vm673_vm6, %v3480_v12, %v3478_v30  ;;  %v6323_v30 = vld [vmem:[#allocation8_spill] sm:$0xff]  ;;  %v3686_v42 = vld [vmem:[%s6261_s8 + $0xd8] sm:$0xff] }
0x1162   : > { %v3483_v20 = vmul.f32 %v3481_v62, %v4526_v25  ;;  %v3484_v2 = vmul.f32 %v3482_v24, %v4503_v61  ;;  %4160 = vmatprep.subr.bf16.mxu0 %v4159_v35 }
0x1163   : > { %4162 = vmatpush1.bf16.msra.mxu0 %v4161_v8 }
0x1164   : > { %v4165_v23 = vpack.c.bf16 %v3483_v20, %v5839_v38  ;;  %v3488_v9 = vpop.permute.xlu1 %3487  ;;  %v4163_v50 = vpack.c.bf16 %v3484_v2, %v3443_v18  ;;  %v3502_v39 = vpop.permute.xlu0 %3501 }
0x1165   : > { %v3489_v15 = vsel %vm690_vm7, %v3486_v34, %v3488_v9  ;;  %v3490_v17 = vsel %vm690_vm7, %v3488_v9, %v3486_v34 }
0x1166   : > { %4164 = vmatprep.subr.bf16.mxu0 %v4163_v50  ;;  %v3491_v38 = vmul.f32 %v3489_v15, %v4539_v45  ;;  %v3492_v18 = vmul.f32 %v3490_v17, %v4541_v49 }
0x1167   : > { %4166 = vmatpush1.bf16.msra.mxu0 %v4165_v23 }
0x1168   : > { %v3496_v7 = vpop.permute.xlu1 %3495 }
0x1169   : > { %v3497_v4 = vsel %vm707_vm8, %v3494_v60, %v3496_v7  ;;  %v3498_v28 = vsel %vm707_vm8, %v3496_v7, %v3494_v60 }
0x116a   : > { %v3499_v31 = vmul.f32 %v3497_v4, %v4544_v51  ;;  %v3500_v3 = vmul.f32 %v3498_v28, %v4546_v52 }
0x116c   : > { %v4169_v63 = vpack.c.bf16 %v3499_v31, %v3491_v38  ;;  %v3504_v41 = vpop.permute.xlu1 %3503  ;;  %v4167_v19 = vpack.c.bf16 %v3500_v3, %v3492_v18 }
0x116d   : > { %v3506_v13 = vsel %vm724_vm9, %v3504_v41, %v3502_v39  ;;  %v3505_v26 = vsel %vm724_vm9, %v3502_v39, %v3504_v41 }
0x116e   : > { %v3508_v46 = vmul.f32 %v4551_v53, %v3506_v13  ;;  %4168 = vmatprep.subr.bf16.mxu0 %v4167_v19  ;;  %v3507_v27 = vmul.f32 %v4570_v6, %v3505_v26 }
0x116f   : > { %4170 = vmatpush1.bf16.msra.mxu0 %v4169_v63 }
0x1170   : > { %3533 = vmatprep.subr.mxu0 %v3508_v46 }
0x1173   : > { %3534 = vmatpush1.msra.mxu0 %v3507_v27 }
0x1174   : > { %4033 = vmatmul.mubr.msk.f32.vlgmr.msra.gmra.mrb[20].mxu0 %vm6322_vm14, %v3509_v32  ;;  %vm6330_vm14 = vmmov %vm6327_vm1 }
0x1175   : > { %v2378_v29 = vpop.permute.xlu0 %2377 }
0x1176   : > { %v2455_v44 = vadd.f32 %v5566_v36, %v2378_v29  ;;  %v2457_v11 = vadd.f32 %v6323_v30, %v2378_v29  ;;  %v2574_v36 = vld [vmem:[%s6261_s8 + $0xa0] sm:$0xff] }
0x1178   : > { %v5922_v1 = vmax.f32 %v2455_v44, 0.0  ;;  %v5924_v0 = vmax.f32 %v2457_v11, 0.0 }
0x117a   : > { %2471 = vrot.lane.b32.xlu0 %v5924_v0, %s4268_s11  ;;  %2469 = vrot.lane.b32.xlu1 %v5922_v1, %s4268_s11 }
0x117e   : > { %2495 = vrot.lane.b32.xlu0 %v5924_v0, %s4272_s16  ;;  %2493 = vrot.lane.b32.xlu1 %v5922_v1, %s4272_s16 }
0x1182   : > { %2479 = vrot.lane.b32.xlu0 %v5924_v0, %s4270_s14  ;;  %2477 = vrot.lane.b32.xlu1 %v5922_v1, %s4270_s14 }
0x1186   : > { %2503 = vrot.lane.b32.xlu0 %v5924_v0, %s6307_s30  ;;  %2501 = vrot.lane.b32.xlu1 %v5922_v1, %s6307_s30 }
0x118a   : > { %2584 = vperm.xlu0 %4207, %v2574_v36   ;;  %2579 = vperm.xlu1 %4206, %v2573_v33  }
0x118e   : > { %2485 = vrot.lane.b32.xlu0 %v5922_v1, %s4271_s15  ;;  %2461 = vrot.lane.b32.xlu1 %v5922_v1, %s4269_s12 }
0x118f   : > { %4208 = vset.pattern.permute.xlu1 %v6324_v58 }
0x1192   : > { %2509 = vrot.lane.b32.xlu0 %v5922_v1, %s6308_s18  ;;  %2463 = vrot.lane.b32.xlu1 %v5924_v0, %s4269_s12 }
0x1196   : > { %2589 = vperm.xlu0 %4207, %v2575_v43   ;;  %2487 = vrot.lane.b32.xlu1 %v5924_v0, %s4271_s15 }
0x119a   : > { %2519 = vrot.lane.b32.xlu0 %v5924_v0, %s6309_s19  ;;  %2511 = vrot.lane.b32.xlu1 %v5924_v0, %s6308_s18 }
0x119b   : > { %4209 = vset.pattern.permute.xlu0 %v6324_v58 }
0x119e   : > { %2517 = vrot.lane.b32.xlu1 %v5922_v1, %s6309_s19  ;;  %3512 = vperm.xlu0 %4209, %v3509_v32  }
0x11a2   : > { %2618 = vperm.xlu1 %4208, %v2576_v37   ;;  %4210 = vset.pattern.permute.xlu0 %v6298_v21 }
0x11a3   : > { %3694 = vperm.xlu0 %4210, %v3686_v42  }
0x11a6   : > { %4211 = vset.pattern.permute.xlu1 %v6298_v21 }
0x11a7   : > { %3709 = vperm.xlu0 %4210, %v3689_v5  }
0x11ab   : > { %4212 = vset.pattern.permute.xlu0 %v6324_v58 }
0x11ec   : > { %v2472_v34 = vpop.permute.xlu0 %2471  ;;  %v2470_v8 = vpop.permute.xlu1 %2469 }
0x11ed   : > { %v2473_v60 = vsel %vm622_vm2, %v2470_v8, %v2472_v34  ;;  %v2474_v15 = vsel %vm622_vm2, %v2472_v34, %v2470_v8 }
0x11ee   : > { %v2475_v39 = vmul.f32 %v2474_v15, %v4477_v47  ;;  %v2476_v63 = vmul.f32 %v2473_v60, %v4480_v48 }
0x11f0   : > { %v2496_v12 = vpop.permute.xlu0 %2495  ;;  %v2494_v35 = vpop.permute.xlu1 %2493  ;;  %v2527_v58 = vrot.slane %v2475_v39, 6  ;;  %v2528_v43 = vrot.slane %v2476_v63, 6 }
0x11f1   : > { %v2497_v17 = vsel %vm673_vm6, %v2494_v35, %v2496_v12  ;;  %v2498_v7 = vsel %vm673_vm6, %v2496_v12, %v2494_v35 }
0x11f2   : > { %v2499_v13 = vmul.f32 %v2497_v17, %v4526_v25  ;;  %v2500_v26 = vmul.f32 %v2498_v7, %v4503_v61 }
0x11f4   : > { %v2480_v62 = vpop.permute.xlu0 %2479  ;;  %v2478_v24 = vpop.permute.xlu1 %2477  ;;  %v2545_v34 = vrot.slane %v2499_v13, 6  ;;  %v2546_v8 = vrot.slane %v2500_v26, 6 }
0x11f5   : > { %v2481_v4 = vsel %vm639_vm4, %v2478_v24, %v2480_v62  ;;  %v2482_v28 = vsel %vm639_vm4, %v2480_v62, %v2478_v24 }
0x11f6   : > { %v2483_v46 = vmul.f32 %v2482_v28, %v4520_v10  ;;  %v2484_v27 = vmul.f32 %v2481_v4, %v4499_v57  ;;  %v2567_v28 = vsel %vm6327_vm1, %v5922_v1, %v2545_v34 }
0x11f8   : > { %v2504_v20 = vpop.permute.xlu0 %2503  ;;  %v2502_v21 = vpop.permute.xlu1 %2501  ;;  %v2533_v12 = vrot.slane %v2483_v46, 4  ;;  %v2534_v35 = vrot.slane %v2484_v27, 4 }
0x11f9   : > { %v2505_v41 = vsel %vm690_vm7, %v2502_v21, %v2504_v20  ;;  %v2506_v19 = vsel %vm690_vm7, %v2504_v20, %v2502_v21 }
0x11fa   : > { %v2507_v30 = vmul.f32 %v2505_v41, %v4539_v45  ;;  %v2508_v11 = vmul.f32 %v2506_v19, %v4541_v49 }
0x11fc   : > { %v2551_v60 = vrot.slane %v2507_v30, 4 }
0x11fe   : > { %v2569_v26 = vsel %vm523_vm0, %v2567_v28, %v2551_v60 }
0x1209   : > { %v5981_v2 = vpop.permute.xlu0 %2584  ;;  %v5983_v23 = vpop.permute.xlu1 %2579 }
0x120d   : > { %v2486_v9 = vpop.permute.xlu0 %2485  ;;  %v2462_v50 = vpop.permute.xlu1 %2461 }
0x1211   : > { %v2510_v38 = vpop.permute.xlu0 %2509  ;;  %v2464_v18 = vpop.permute.xlu1 %2463 }
0x1212   : > { %v2465_v31 = vsel %vm605_vm3, %v2462_v50, %v2464_v18  ;;  %v2466_v3 = vsel %vm605_vm3, %v2464_v18, %v2462_v50  ;;  %v2568_v18 = vsel %vm6328_vm11, %v5924_v0, %v2546_v8 }
0x1213   : > { %v2467_v32 = vmul.f32 %v2466_v3, %v4496_v56  ;;  %v2468_v29 = vmul.f32 %v2465_v31, %v4493_v55 }
0x1215   : > { %v2488_v44 = vpop.permute.xlu1 %2487  ;;  %v2590_v37 = vpop.permute.xlu0 %2589  ;;  %v2561_v62 = vsel %vm6325_vm15, %v2467_v32, %v2527_v58  ;;  %v2562_v24 = vsel %vm6326_vm12, %v2468_v29, %v2528_v43 }
0x1216   : > { %v2489_v36 = vsel %vm656_vm5, %v2486_v9, %v2488_v44  ;;  %v2490_v33 = vsel %vm656_vm5, %v2488_v44, %v2486_v9  ;;  %v2552_v9 = vrot.slane %v2508_v11, 4  ;;  %v2563_v31 = vsel %vm523_vm0, %v2561_v62, %v2533_v12 }
0x1217   : > { %v2491_v42 = vmul.f32 %v2490_v33, %v4501_v59  ;;  %v2492_v5 = vmul.f32 %v2489_v36, %v4490_v54  ;;  %v2564_v3 = vsel %vm523_vm0, %v2562_v24, %v2534_v35 }
0x1218   : > { %v2570_v46 = vsel %vm523_vm0, %v2568_v18, %v2552_v9  ;;  %v3687_v18 = vld [vmem:[%s6261_s8 + $0xe0] sm:$0xff] }
0x1219   : > { %v2539_v20 = vrot.slane %v2491_v42, 2  ;;  %v2540_v21 = vrot.slane %v2492_v5, 2  ;;  %v2512_v50 = vpop.permute.xlu1 %2511  ;;  %v2520_v41 = vpop.permute.xlu0 %2519 }
0x121a   : > { %v2513_v15 = vsel %vm707_vm8, %v2510_v38, %v2512_v50  ;;  %v2514_v17 = vsel %vm707_vm8, %v2512_v50, %v2510_v38 }
0x121b   : > { %v2515_v7 = vmul.f32 %v2513_v15, %v4544_v51  ;;  %v2516_v4 = vmul.f32 %v2514_v17, %v4546_v52  ;;  %v2565_v39 = vsel %vm1218_vm10, %v2563_v31, %v2539_v20  ;;  %v2566_v63 = vsel %vm1218_vm10, %v2564_v3, %v2540_v21  ;;  %v3688_v31 = vld [vmem:[%s6261_s8 + $0xe8] sm:$0xff]  ;;  %v3690_v3 = vld [vmem:[%s6261_s8 + $0xf8] sm:$0xf] }
0x121c   : > { %v2592_v30 = vmul.f32 %v5983_v23, %v2565_v39  ;;  %v2593_v11 = vmul.f32 %v5983_v23, %v2566_v63 }
0x121d   : > { %v2557_v38 = vrot.slane %v2515_v7, 2  ;;  %v2558_v19 = vrot.slane %v2516_v4, 2  ;;  %v2518_v13 = vpop.permute.xlu1 %2517  ;;  %v3513_v39 = vpop.permute.xlu0 %3512 }
0x121e   : > { %v2521_v1 = vsel %vm724_vm9, %v2518_v13, %v2520_v41  ;;  %v2522_v0 = vsel %vm724_vm9, %v2520_v41, %v2518_v13 }
0x121f   : > { %v2571_v27 = vsel %vm1218_vm10, %v2569_v26, %v2557_v38  ;;  %v2572_v32 = vsel %vm1218_vm10, %v2570_v46, %v2558_v19  ;;  %v2523_v29 = vmul.f32 %v4570_v6, %v2521_v1  ;;  %v2524_v44 = vmul.f32 %v4551_v53, %v2522_v0 }
0x1220   : > { %v2594_v36 = vmul.f32 %v5981_v2, %v2571_v27  ;;  %v2595_v33 = vmul.f32 %v5981_v2, %v2572_v32 }
0x1221   : > { %v2596_v58 = vmul.f32 %v2590_v37, %v2523_v29  ;;  %v2597_v43 = vmul.f32 %v2590_v37, %v2524_v44  ;;  %v2619_v17 = vpop.permute.xlu1 %2618  ;;  %v6115_v44 = vld [vmem:[%s6260_s7] sm:$0xff] }
0x1222   : > { %v2598_v42 = vadd.f32 %v2594_v36, %v2592_v30  ;;  %v2607_v5 = vadd.f32 %v2595_v33, %v2593_v11  ;;  %v2641_v30 = vsub.f32 1.0, %v6115_v44  ;;  %v6121_v11 = vld [vmem:[%s6260_s7 + $0x8] sm:$0xff] }
0x1223   : > { %v2599_v34 = vsel %vm6329_vm13, %v2596_v58, 0.0  ;;  %v2608_v8 = vsel %vm6330_vm14, %v2597_v43, 0.0  ;;  %v2642_v36 = vsub.f32 1.0, %v6121_v11 }
0x1224   : > { %v2600_v12 = vadd.f32 %v2599_v34, %v2598_v42  ;;  %v2609_v35 = vadd.f32 %v2608_v8, %v2607_v5 }
0x1226   : > { %v2601_v62 = vrot.slane %v2600_v12, 4  ;;  %v2610_v24 = vrot.slane %v2609_v35, 4 }
0x1228   : > { %v2602_v20 = vadd.f32 %v2601_v62, %v2600_v12  ;;  %v2611_v21 = vadd.f32 %v2610_v24, %v2609_v35 }
0x122a   : > { %v2603_v50 = vrot.slane %v2602_v20, 2  ;;  %v2612_v23 = vrot.slane %v2611_v21, 2 }
0x122c   : > { %v2604_v60 = vadd.f32 %v2603_v50, %v2602_v20  ;;  %v2613_v9 = vadd.f32 %v2612_v23, %v2611_v21  ;;  %v3691_v23 = vld [vmem:[%s6261_s8 + $0xd8] sm:$0x1] }
0x122e   : > { %v2605_v15 = vrot.slane %v2604_v60, 1  ;;  %v2614_v2 = vrot.slane %v2613_v9, 1 }
0x1230   : > { %v2606_v37 = vadd.f32 %v2605_v15, %v2604_v60  ;;  %v2615_v7 = vadd.f32 %v2614_v2, %v2613_v9  ;;  %v3695_v9 = vpop.permute.xlu0 %3694 }
0x1232   : > { %v6053_v4 = vadd.f32 %v2619_v17, %v2606_v37  ;;  %v6057_v28 = vadd.f32 %v2619_v17, %v2615_v7 }
0x1234   : > { %2623 = vrot.lane.b32.xlu1 %v6053_v4, %s6308_s18  ;;  %v2645_v33 = vrot.slane %v6053_v4, 1  ;;  %v2646_v58 = vrot.slane %v6057_v28, 1  ;;  %v6145_v2 = vpop.permute.xlu0 %3709 }
0x1236   : > { %v2650_v8 = vmul.f32 %v2646_v58, %v2642_v36  ;;  %v2649_v62 = vmul.f32 %v2645_v33, %v2641_v30 }
0x1238   : > { %2625 = vrot.lane.b32.xlu1 %v6057_v28, %s6308_s18 }
0x123c   : > { %3699 = vperm.xlu1 %4211, %v3687_v18  }
0x1240   : > { %3704 = vperm.xlu1 %4211, %v3688_v31  }
0x1244   : > { %3714 = vperm.xlu1 %4211, %v3690_v3  }
0x1247   : > { %v3583_v63 = vpop.f32.mrb[20].mxu0 }
0x1248   : > { %v3584_v41 = vadd.f32 %v3583_v63, %v3513_v39  ;;  %v3585_v38 = vpop.f32.mrb[21].mxu0 }
0x1249   : > { %v3586_v13 = vadd.f32 %v3585_v38, %v3513_v39 }
0x124a   : > { %v6070_v19 = vmax.f32 %v3584_v41, 0.0 }
0x124b   : > { %v6082_v26 = vmax.f32 %v3586_v13, 0.0 }
0x124c   : > { %3590 = vrot.lane.b32.xlu0 %v6070_v19, %s4269_s12  ;;  %3598 = vrot.lane.b32.xlu1 %v6070_v19, %s4268_s11 }
0x1250   : > { %3606 = vrot.lane.b32.xlu0 %v6070_v19, %s4270_s14  ;;  %3614 = vrot.lane.b32.xlu1 %v6070_v19, %s4271_s15 }
0x1254   : > { %3622 = vrot.lane.b32.xlu0 %v6070_v19, %s4272_s16  ;;  %3638 = vrot.lane.b32.xlu1 %v6070_v19, %s6308_s18 }
0x1258   : > { %3630 = vrot.lane.b32.xlu0 %v6070_v19, %s6307_s30  ;;  %3592 = vrot.lane.b32.xlu1 %v6082_v26, %s4269_s12 }
0x125c   : > { %3600 = vrot.lane.b32.xlu0 %v6082_v26, %s4268_s11  ;;  %3608 = vrot.lane.b32.xlu1 %v6082_v26, %s4270_s14 }
0x1260   : > { %3616 = vrot.lane.b32.xlu0 %v6082_v26, %s4271_s15  ;;  %3624 = vrot.lane.b32.xlu1 %v6082_v26, %s4272_s16 }
0x1264   : > { %3640 = vrot.lane.b32.xlu0 %v6082_v26, %s6308_s18  ;;  %3632 = vrot.lane.b32.xlu1 %v6082_v26, %s6307_s30 }
0x1268   : > { %3646 = vrot.lane.b32.xlu0 %v6070_v19, %s6309_s19  ;;  %3648 = vrot.lane.b32.xlu1 %v6082_v26, %s6309_s19 }
0x12a6   : > { %v2624_v46 = vpop.permute.xlu1 %2623 }
0x12aa   : > { %v2626_v1 = vpop.permute.xlu1 %2625 }
0x12ab   : > { %v2627_v0 = vsel %vm707_vm8, %v2624_v46, %v2626_v1  ;;  %v2628_v27 = vsel %vm707_vm8, %v2626_v1, %v2624_v46 }
0x12ac   : > { %v2629_v32 = vsub.f32 %v6053_v4, %v2627_v0  ;;  %v2630_v29 = vsub.f32 %v6057_v28, %v2628_v27 }
0x12ae   : > { %v2631_v43 = vand.u32 2147483647, %v2629_v32  ;;  %v2632_v42 = vand.u32 2147483647, %v2630_v29 }
0x12b0   : > { %v2635_v5 = vrot.slane %v2631_v43, 1  ;;  %v2636_v34 = vrot.slane %v2632_v42, 1 }
0x12b2   : > { %v2639_v12 = vmul.f32 %v6115_v44, %v2635_v5  ;;  %v2640_v35 = vmul.f32 %v6121_v11, %v2636_v34 }
0x12b4   : > { %v6132_v24 = vadd.f32 %v2649_v62, %v2639_v12  ;;  %v6134_v20 = vadd.f32 %v2650_v8, %v2640_v35 }
0x12b6   : > { %v2656_v21 = vrot.slane %v6134_v20, 7  ;;  %v2655_v50 = vrot.slane %v6132_v24, 7 }
0x12b8   : > { %2661 = vrot.lane.b32.xlu1 %v2656_v21, %s4272_s16  ;;  %2659 = vrot.lane.b32.xlu0 %v2655_v50, %s4272_s16  ;;  %s470_s16 = scalar_lea.vmem %s6263_s10, %s4354_s17 }
0x12bb   : > { %v3700_v60 = vpop.permute.xlu1 %3699 }
0x12bc   : > { %3751 = vperm.xlu0 %4212, %v3691_v23  }
0x12be   : > { %v3591_v37 = vpop.permute.xlu0 %3590 }
0x12bf   : > { %v6143_v15 = vpop.permute.xlu1 %3704 }
0x12c2   : > { %v3607_v18 = vpop.permute.xlu0 %3606 }
0x12c3   : > { %v6147_v17 = vpop.permute.xlu1 %3714 }
0x12c6   : > { %v3623_v3 = vpop.permute.xlu0 %3622 }
0x12c7   : > { %v3599_v7 = vpop.permute.xlu1 %3598 }
0x12ca   : > { %v3631_v63 = vpop.permute.xlu0 %3630 }
0x12cb   : > { %v3615_v31 = vpop.permute.xlu1 %3614 }
0x12ce   : > { %v3601_v38 = vpop.permute.xlu0 %3600 }
0x12cf   : > { %v3639_v39 = vpop.permute.xlu1 %3638  ;;  %v3602_v1 = vsel %vm622_vm2, %v3599_v7, %v3601_v38  ;;  %v3603_v0 = vsel %vm622_vm2, %v3601_v38, %v3599_v7 }
0x12d0   : > { %v3604_v33 = vmul.f32 %v3603_v0, %v4477_v47  ;;  %v3605_v58 = vmul.f32 %v3602_v1, %v4480_v48 }
0x12d2   : > { %v3617_v46 = vpop.permute.xlu0 %3616  ;;  %v3657_v50 = vrot.slane %v3605_v58, 4 }
0x12d3   : > { %v3593_v41 = vpop.permute.xlu1 %3592  ;;  %v3618_v27 = vsel %vm656_vm5, %v3615_v31, %v3617_v46  ;;  %v3619_v32 = vsel %vm656_vm5, %v3617_v46, %v3615_v31 }
0x12d4   : > { %v3594_v43 = vsel %vm605_vm3, %v3591_v37, %v3593_v41  ;;  %v3595_v42 = vsel %vm605_vm3, %v3593_v41, %v3591_v37  ;;  %v3620_v5 = vmul.f32 %v3619_v32, %v4501_v59  ;;  %v3621_v34 = vmul.f32 %v3618_v27, %v4490_v54 }
0x12d5   : > { %v3596_v62 = vmul.f32 %v3595_v42, %v4496_v56  ;;  %v3597_v21 = vmul.f32 %v3594_v43, %v4493_v55  ;;  %v3656_v59 = vrot.slane %v3604_v33, 4 }
0x12d6   : > { %v3641_v8 = vpop.permute.xlu0 %3640  ;;  %v3662_v23 = vrot.slane %v3620_v5, 4  ;;  %v3663_v37 = vrot.slane %v3621_v34, 4 }
0x12d7   : > { %v3609_v13 = vpop.permute.xlu1 %3608  ;;  %v3642_v7 = vsel %vm707_vm8, %v3639_v39, %v3641_v8  ;;  %v3679_v46 = vsel %vm523_vm0, %v3597_v21, %v3657_v50 }
0x12d8   : > { %v3610_v12 = vsel %vm639_vm4, %v3607_v18, %v3609_v13  ;;  %v3611_v35 = vsel %vm639_vm4, %v3609_v13, %v3607_v18  ;;  %v3643_v18 = vsel %vm707_vm8, %v3641_v8, %v3639_v39  ;;  %v3644_v55 = vmul.f32 %v3642_v7, %v4544_v51 }
0x12d9   : > { %v3612_v31 = vmul.f32 %v3611_v35, %v4520_v10  ;;  %v3613_v41 = vmul.f32 %v3610_v12, %v4499_v57  ;;  %v3645_v38 = vmul.f32 %v3643_v18, %v4546_v52  ;;  %v3678_v13 = vsel %vm523_vm0, %v3596_v62, %v3656_v59 }
0x12da   : > { %v3647_v27 = vpop.permute.xlu0 %3646  ;;  %v3717_v51 = vmul.f32 %v3695_v9, %v3678_v13  ;;  %v3718_v52 = vmul.f32 %v3695_v9, %v3679_v46  ;;  %v3674_v32 = vrot.slane %v3644_v55, 4 }
0x12db   : > { %v3625_v29 = vpop.permute.xlu1 %3624  ;;  %v3680_v1 = vsel %vm523_vm0, %v3612_v31, %v3662_v23  ;;  %v3681_v39 = vsel %vm523_vm0, %v3613_v41, %v3663_v37 }
0x12dc   : > { %v3626_v47 = vsel %vm673_vm6, %v3623_v3, %v3625_v29  ;;  %v3627_v48 = vsel %vm673_vm6, %v3625_v29, %v3623_v3  ;;  %v3675_v29 = vrot.slane %v3645_v38, 4  ;;  %v3719_v33 = vmul.f32 %v3700_v60, %v3680_v1 }
0x12dd   : > { %v3628_v3 = vmul.f32 %v3626_v47, %v4526_v25  ;;  %v3629_v56 = vmul.f32 %v3627_v48, %v4503_v61  ;;  %v3720_v58 = vmul.f32 %v3700_v60, %v3681_v39 }
0x12de   : > { %v3727_v12 = vadd.f32 %v3719_v33, %v3717_v51 }
0x12df   : > { %v3633_v54 = vpop.permute.xlu1 %3632  ;;  %v3668_v0 = vrot.slane %v3628_v3, 4  ;;  %v3669_v10 = vrot.slane %v3629_v56, 4  ;;  %v3738_v35 = vadd.f32 %v3720_v58, %v3718_v52 }
0x12e0   : > { %v3634_v25 = vsel %vm690_vm7, %v3631_v63, %v3633_v54  ;;  %v3635_v61 = vsel %vm690_vm7, %v3633_v54, %v3631_v63 }
0x12e1   : > { %v3682_v5 = vsel %vm523_vm0, %v6070_v19, %v3668_v0  ;;  %v3683_v34 = vsel %vm523_vm0, %v6082_v26, %v3669_v10  ;;  %v3636_v63 = vmul.f32 %v3634_v25, %v4539_v45  ;;  %v3637_v9 = vmul.f32 %v3635_v61, %v4541_v49 }
0x12e2   : > { %v3721_v47 = vmul.f32 %v6143_v15, %v3682_v5  ;;  %v3722_v48 = vmul.f32 %v6143_v15, %v3683_v34  ;;  %v2683_v0 = vrot.slane %v6132_v24, 2  ;;  %v2684_v10 = vrot.slane %v6134_v20, 2 }
0x12e3   : > { %v3649_v57 = vpop.permute.xlu1 %3648  ;;  %v3684_v62 = vsel %vm523_vm0, %v3636_v63, %v3674_v32  ;;  %v3685_v19 = vsel %vm523_vm0, %v3637_v9, %v3675_v29 }
0x12e4   : > { %v3650_v43 = vsel %vm724_vm9, %v3647_v27, %v3649_v57  ;;  %v3651_v42 = vsel %vm724_vm9, %v3649_v57, %v3647_v27  ;;  %v3728_v21 = vadd.f32 %v3727_v12, %v3721_v47  ;;  %v3739_v49 = vadd.f32 %v3738_v35, %v3722_v48  ;;  %v4254_v35 = vld [vmem:[%s4366_s23] sm:$0x3] }
0x12e5   : > { %v3652_v8 = vmul.f32 %v4570_v6, %v3650_v43  ;;  %v3653_v60 = vmul.f32 %v4551_v53, %v3651_v42  ;;  %v3723_v6 = vmul.f32 %v6145_v2, %v3684_v62  ;;  %v3724_v53 = vmul.f32 %v6145_v2, %v3685_v19 }
0x12e6   : > { %v2687_v52 = vmul.f32 %v2683_v0, %v2641_v30  ;;  %v2688_v32 = vmul.f32 %v2684_v10, %v2642_v36  ;;  %v3773_v47 = vrot.slane %v4254_v35, %v4390_v22  ;;  %v3777_v48 = vrot.slane %v4254_v35, %v6306_v14 }
0x12e7   : > { %v3725_v26 = vmul.f32 %v6147_v17, %v3652_v8  ;;  %v3726_v45 = vmul.f32 %v6147_v17, %v3653_v60  ;;  %v3729_v54 = vadd.f32 %v3728_v21, %v3723_v6  ;;  %v3740_v15 = vadd.f32 %v3739_v49, %v3724_v53  ;;  %v4253_v8 = vld [vmem:[%s4360_s20] sm:$0x3] }
0x12e8   : > { %v3760_v30 = vrot.slane %v4253_v8, %v4390_v22  ;;  %v3764_v36 = vrot.slane %v4253_v8, %v6306_v14  ;;  %v4255_v6 = vld [vmem:[%s4372_s26] sm:$0x3] }
0x12e9   : > { %v3730_v59 = vsel %vm523_vm0, %v3725_v26, 0.0  ;;  %v3741_v50 = vsel %vm523_vm0, %v3726_v45, 0.0 }
0x12ea   : > { %v3731_v23 = vadd.f32 %v3730_v59, %v3729_v54  ;;  %v3742_v37 = vadd.f32 %v3741_v50, %v3740_v15 }
0x12ec   : > { %v3732_v7 = vrot.slane %v3731_v23, 4  ;;  %v3743_v18 = vrot.slane %v3742_v37, 4 }
0x12ee   : > { %v3733_v3 = vadd.f32 %v3732_v7, %v3731_v23  ;;  %v3744_v17 = vadd.f32 %v3743_v18, %v3742_v37 }
0x12f0   : > { %v3734_v1 = vrot.slane %v3733_v3, 2  ;;  %v3745_v39 = vrot.slane %v3744_v17, 2 }
0x12f2   : > { %v3735_v51 = vadd.f32 %v3734_v1, %v3733_v3  ;;  %v3746_v40 = vadd.f32 %v3745_v39, %v3744_v17 }
0x12f4   : > { %v3736_v42 = vrot.slane %v3735_v51, 1  ;;  %v3747_v5 = vrot.slane %v3746_v40, 1 }
0x12f6   : > { %v3737_v60 = vadd.f32 %v3736_v42, %v3735_v51  ;;  %v3748_v12 = vadd.f32 %v3747_v5, %v3746_v40 }
0x132a   : > { %v2662_v31 = vpop.permute.xlu1 %2661  ;;  %v2660_v41 = vpop.permute.xlu0 %2659 }
0x132b   : > { %v2663_v56 = vsel %vm673_vm6, %v2660_v41, %v2662_v31  ;;  %v2664_v2 = vsel %vm673_vm6, %v2662_v31, %v2660_v41 }
0x132c   : > { %v2667_v55 = vrot.slane %v2663_v56, 1  ;;  %v2668_v38 = vrot.slane %v2664_v2, 1 }
0x132e   : > { %v2671_v13 = vsub.f32 %v6132_v24, %v2667_v55  ;;  %v2672_v46 = vsub.f32 %v6134_v20, %v2668_v38  ;;  %v4280_v24 = vmov 1966171168  }
0x132f   : > { %v2707_v20 = vunpack.c.l.s4 %v4280_v24 }
0x1330   : > { %v2673_v27 = vand.u32 2147483647, %v2671_v13  ;;  %v2674_v57 = vand.u32 2147483647, %v2672_v46 }
0x1331   : > { %v2708_v9 = vunpack.c.0.s8 %v2707_v20 }
0x1332   : > { %v2677_v25 = vrot.slane %v2673_v27, 2  ;;  %v2678_v61 = vrot.slane %v2674_v57, 2 }
0x1333   : > { %v2711_v49 = vsub.s32 %v2708_v9, %v4378_v16  ;;  %v6331_v16 = vlaneseq }
0x1334   : > { %v2681_v29 = vmul.f32 %v6115_v44, %v2677_v25  ;;  %v2682_v33 = vmul.f32 %v6121_v11, %v2678_v61 }
0x1335   : > { %vm2723_vm0 = vcmp.lt.s32.totalorder %v6331_v16, 256 }
0x1336   : > { %v2689_v58 = vadd.f32 %v2687_v52, %v2681_v29  ;;  %v2690_v43 = vadd.f32 %v2688_v32, %v2682_v33 }
0x1338   : > { %v2693_v34 = vrot.slane %v2689_v58, 5  ;;  %v2694_v63 = vrot.slane %v2690_v43, 5 }
0x133a   : > { %v2697_v44 = vsub.f32 %v6053_v4, %v2693_v34  ;;  %v2698_v11 = vsub.f32 %v6057_v28, %v2694_v63  ;;  %v3786_v4 = vrot.slane %v4255_v6, %v4390_v22  ;;  %v3790_v28 = vrot.slane %v4255_v6, %v6306_v14 }
0x133b   : > { %v3752_v62 = vpop.permute.xlu0 %3751 }
0x133c   : > { %v2699_v19 = vmax.f32 %v2697_v44, 0.0  ;;  %v2700_v26 = vmax.f32 %v2698_v11, 0.0  ;;  %v3754_v45 = vadd.f32 %v3752_v62, %v3737_v60  ;;  %v3755_v21 = vadd.f32 %v3752_v62, %v3748_v12 }
0x133e   : > { %v2701_v53 = vmin.f32 %v2699_v19, 1.0  ;;  %v2702_v59 = vmin.f32 %v2700_v26, 1.0  ;;  %v3767_v50 = vadd.f32 %v3760_v30, %v3754_v45  ;;  %v3768_v54 = vadd.f32 %v3764_v36, %v3755_v21 }
0x1340   : > { %v2705_v15 = vcombine.low %v2701_v53, %v2702_v59  ;;  %v3780_v23 = vadd.f32 %v3773_v47, %v3767_v50  ;;  %v3781_v37 = vadd.f32 %v3777_v48, %v3768_v54 }
0x1342   : > { %v2712_v7 = vrot.slane %v2705_v15, %v2711_v49  ;;  %v3793_v18 = vadd.f32 %v3786_v4, %v3780_v23  ;;  %v3794_v31 = vadd.f32 %v3790_v28, %v3781_v37 }
0x1344   : > { %v2719_v22 = vrot.slane %v2712_v7, %v2711_v49  ;;  %v3797_v41 = vcombine.low %v3793_v18, %v3794_v31 }
0x1346   : > { %2725 = vst.msk [vmem:[%s470_s16] sm:$0x3] %vm2723_vm0, %v2719_v22  ;;  %v3804_v14 = vrot.slane %v3797_v41, %v2711_v49 }
0x1348   : > { %v3811_v3 = vrot.slane %v3804_v14, %v2711_v49 }
0x134a   : > { %3813 = vst.msk [vmem:[%s466_s28] sm:$0x3] %vm2723_vm0, %v3811_v3 }
0x134b PF: > { %s21_s13 = sadd.s32 1, %s4264_s13  }
0x134c   : > { %p18_p4 = scmp.ge.s32.totalorder %s21_s13, 4  }
0x134e   :  { %20 = sbr.rel (!%p18_p4) target bundleno = 1 (0x1), region = 116 }

</bundles_post_ra>
